<compile_context>
chip_gen: v6e
topology: v6e:2x2x1
jax: 0.10.0
libtpu: 0.0.40
codegen_flags: <defaults>
</compile_context>

<pallas_src>
import functools

import numpy as np
import jax
import jax.numpy as jnp
from jax.experimental import pallas as pl
from jax.experimental.pallas import tpu as pltpu


_VMEM = pl.BlockSpec(memory_space=pltpu.MemorySpace.VMEM)
_SMEM = pl.BlockSpec(memory_space=pltpu.MemorySpace.SMEM)

# 32 MiB is safe on every generation (v7x physical VMEM is only 64 MiB) and all
# working sets here are far below it.
# TODO(synk): on v6e/v5e with production feature-map sizes raise this to 64-96 MiB
# (128 MiB physical) to keep monolithic blocks single-step; on v7x prefer finer grids.
_VMEM_LIMIT = 32 * 1024 * 1024


def _cparams(*sem):
    return pltpu.CompilerParams(
        dimension_semantics=sem if sem else None,
        vmem_limit_bytes=_VMEM_LIMIT,
    )


# ----------------------------- Pallas kernels -----------------------------

def _spatial_attn_threshold_kernel(x_ref, w_ref, b_ref, o_ref, *, H, W, K, Wl):
    """SpatialAttention (channel max/mean + 7x7 conv + sigmoid) + global threshold.

    x_ref: (N, H, W, C) f32 NHWC input (unpadded; zero padding is built in VMEM).
    w_ref: (2*K*K,) f32 SMEM, torch conv weight flattened (channel, di, dj),
           channel 0 = max plane, channel 1 = mean plane.
    b_ref: (1,) f32 SMEM.
    o_ref: (N, H, Wl) f32 lane-dense output; only columns [:W] are meaningful
           (wrapper slices them), columns >= W hold finite wrap-around junk.
    """
    x = x_ref[...]
    n = x.shape[0]
    P = K // 2

    mx = jnp.max(x, axis=-1)          # (N, H, W)
    mn = jnp.mean(x, axis=-1)

    def pad_plane(p):
        # zero-pad to (N, H + 2P, Wl) entirely in VMEM (no HBM round trip).
        zl = jnp.zeros((n, H, P), jnp.float32)
        zr = jnp.zeros((n, H, Wl - W - P), jnp.float32)
        p = jnp.concatenate([zl, p, zr], axis=2)
        zt = jnp.zeros((n, P, Wl), jnp.float32)
        return jnp.concatenate([zt, p, zt], axis=1)

    planes = (pad_plane(mx), pad_plane(mn))     # order matches torch.cat([max, avg], 1)

    acc = jnp.zeros((n, H, Wl), jnp.float32)
    for c in range(2):
        for di in range(K):
            row = planes[c][:, di:di + H, :]    # 7 row slices per plane
            for dj in range(K):
                coef = w_ref[(c * K + di) * K + dj]
                # column offset = native 128-lane XLU rotation (otherwise-idle slot)
                shifted = row if dj == 0 else pltpu.roll(row, shift=Wl - dj, axis=2)
                acc = acc + shifted * coef

    att = jax.nn.sigmoid(acc + b_ref[0])        # (N, H, Wl); cols >= W are junk
    valid = att[:, :, :W]
    lo = jnp.min(valid)
    hi = jnp.max(valid)
    thr = lo + 0.75 * (hi - lo)                 # global (whole batch) threshold
    o_ref[...] = jnp.where(att < thr, 0.0, att)


def _conv3x3_bn_silu_kernel(ph_ref, w_ref, b_ref, o_ref, *, taps, OH, OW):
    """BaseConv: 3x3 conv (BN folded) + SiLU; one batch element per grid step.

    ph_ref: (P, 1, PH, PW, C) bf16 stride-phase views of the zero-padded input.
    w_ref : (9*C, Cout) bf16 tap-concatenated weight (BN scale folded in).
    b_ref : (1, Cout) f32 folded bias.
    o_ref : (OH*OW, Cout) f32; OW is the sublane-padded width -- the padded columns
            compute SiLU(bias) and are sliced off by the wrapper (do not consume
            the raw kernel output directly).
    """
    ph = ph_ref[...]
    # in-VMEM im2col: concat the 9 tap windows along lanes -> ONE K = 9*C matmul.
    cols = [ph[p, 0, oi:oi + OH, oj:oj + OW, :] for (p, oi, oj) in taps]
    col = jnp.concatenate(cols, axis=-1)                       # (OH, OW, 9*C) bf16
    col = col.reshape(OH * OW, col.shape[-1])                  # merge leading dims (layout no-op)
    y = jnp.dot(col, w_ref[...], preferred_element_type=jnp.float32) + b_ref[...]
    o_ref[...] = y * jax.nn.sigmoid(y)                         # SiLU, f32


def _nonlocal_block_kernel(x_ref, wproj_ref, bproj_ref, wo_ref, bo_ref, o_ref, *, n, L, Ci):
    """Whole Non_local_Block for the whole batch in one launch.

    x_ref : (N*L, C) f32 rows (batch-major).
    wproj : (C, 3*Ci) bf16 fused [theta/L | phi | g] projection, bproj (1, 3*Ci) f32.
    wo    : (Ci, C) bf16 conv_out, bo (1, C) f32.
    """
    x = x_ref[...]
    wo = wo_ref[...]
    # one projection matmul for ALL batch elements (M = N*L); 1/L folded into theta.
    proj = jnp.dot(x.astype(jnp.bfloat16), wproj_ref[...],
                   preferred_element_type=jnp.float32) + bproj_ref[...]   # (N*L, 3Ci)
    ys = []
    for b in range(n):                                   # static unroll over tiny batch
        pb = proj[b * L:(b + 1) * L, :]
        th = pb[:, :Ci]
        ph = pb[:, Ci:2 * Ci]
        g = pb[:, 2 * Ci:3 * Ci]
        pw = jax.lax.dot_general(th, ph, (((1,), (1,)), ((), ())),
                                 preferred_element_type=jnp.float32)       # (L, L)
        ys.append(jnp.dot(pw, g, preferred_element_type=jnp.float32))      # (L, Ci)
    y = jnp.concatenate(ys, axis=0)                      # (N*L, Ci)
    out = x + jnp.dot(y.astype(jnp.bfloat16), wo,
                      preferred_element_type=jnp.float32) + bo_ref[...]
    o_ref[...] = out


def _mm_bias_act_kernel(x_ref, w_ref, b_ref, o_ref, *, act):
    y = jnp.dot(x_ref[...].astype(jnp.bfloat16), w_ref[...],
                preferred_element_type=jnp.float32) + b_ref[...]
    if act == "silu":
        y = y * jax.nn.sigmoid(y)
    o_ref[...] = y


# ----------------------------- kernel wrappers -----------------------------

def spatial_attention_threshold(x_nhwc, w7, b7):
    N, H, W, C = x_nhwc.shape
    K = w7.shape[-1]
    Wl = max(128, ((W + (K - 1) + 127) // 128) * 128)     # lane-dense store width
    w_flat = w7.reshape(-1).astype(jnp.float32)           # (2*K*K,), (channel, di, dj)
    att = pl.pallas_call(
        functools.partial(_spatial_attn_threshold_kernel, H=H, W=W, K=K, Wl=Wl),
        in_specs=[_VMEM, _SMEM, _SMEM],
        out_specs=_VMEM,
        out_shape=jax.ShapeDtypeStruct((N, H, Wl), jnp.float32),
        compiler_params=_cparams(),
    )(x_nhwc, w_flat, b7.astype(jnp.float32))
    # TODO(synk): for v7x both-core use, split into a gridded attention pass + a tiny
    # threshold pass (the GLOBAL min/max semantics force a single block here).
    return att[:, :, :W]


def base_conv(x_nhwc, w, gamma, beta, rmean, rvar, *, stride, eps=1e-5):
    """BaseConv = Conv2d(3x3, pad 1, no bias) + folded eval BatchNorm2d + SiLU (NHWC)."""
    N, H, W, C = x_nhwc.shape
    Cout = w.shape[0]
    scale = gamma / jnp.sqrt(rvar + eps)
    w_mat = ((w * scale[:, None, None, None])
             .transpose(2, 3, 1, 0)              # (3, 3, C, Cout), (di, dj) row-major
             .reshape(9 * C, Cout)
             .astype(jnp.bfloat16))
    b_eff = (beta - rmean * scale).reshape(1, Cout).astype(jnp.float32)

    OH = (H + 2 - 3) // stride + 1
    OW = (W + 2 - 3) // stride + 1
    OWp = ((OW + 7) // 8) * 8       # padded output width keeps the row collapse aligned

    # pad + phase-stack directly in bf16 (halves the HBM copy and the kernel DMA).
    # TODO(synk): handle the 1-px halo / stride phases fully inside the kernel
    # (zero-initialised VMEM scratch + manual DMA) to drop this copy entirely.
    xp = jnp.pad(x_nhwc.astype(jnp.bfloat16), ((0, 0), (1, 1), (1, 1), (0, 0)))
    if stride == 1:
        phases = xp[None]                                          # (1, N, H+2, W+2, C)
        taps = tuple((0, di, dj) for di in range(3) for dj in range(3))
        need_w = OWp + 2
    elif stride == 2:
        assert H % 2 == 0 and W % 2 == 0, "stride-2 patches must have even dims"
        phases = jnp.stack([xp[:, p::2, q::2, :]
                            for p in range(2) for q in range(2)])  # (4, N, OH+1, OW+1, C)
        taps = tuple(((di % 2) * 2 + (dj % 2), di // 2, dj // 2)
                     for di in range(3) for dj in range(3))
        need_w = OWp + 1
    else:
        raise NotImplementedError(stride)

    pad_w = need_w - phases.shape[3]
    if pad_w > 0:
        phases = jnp.pad(phases, ((0, 0), (0, 0), (0, 0), (0, pad_w), (0, 0)))
    P_, _, PH, PW, _ = phases.shape

    y = pl.pallas_call(
        functools.partial(_conv3x3_bn_silu_kernel, taps=taps, OH=OH, OW=OWp),
        grid=(N,),
        in_specs=[pl.BlockSpec((P_, 1, PH, PW, C), lambda n: (0, n, 0, 0, 0)),
                  pl.BlockSpec((9 * C, Cout), lambda n: (0, 0)),
                  pl.BlockSpec((1, Cout), lambda n: (0, 0))],
        out_specs=pl.BlockSpec((OH * OWp, Cout), lambda n: (n, 0)),
        out_shape=jax.ShapeDtypeStruct((N * OH * OWp, Cout), jnp.float32),
        compiler_params=_cparams("parallel"),
    )(phases, w_mat, b_eff)
    return y.reshape(N, OH, OWp, Cout)[:, :, :OW, :]


def non_local_block(x_nhwc, p):
    """Non_local_Block (dot-product mode) on an NHWC tensor, one launch per call."""
    N, H, W, C = x_nhwc.shape
    L = H * W
    Ci = p["wg"].shape[0]
    x2 = x_nhwc.reshape(N * L, C)

    def mat(wk):  # (Ci, C, 1, 1) torch conv weight -> (C, Ci) matmul matrix
        return wk.reshape(wk.shape[0], wk.shape[1]).T

    # fuse g/theta/phi into one projection; fold the 1/L dot-product scale into theta.
    wproj = jnp.concatenate([mat(p["wt"]) / L, mat(p["wp"]), mat(p["wg"])],
                            axis=1).astype(jnp.bfloat16)              # (C, 3Ci)
    bproj = jnp.concatenate([p["bt"] / L, p["bp"], p["bg"]]).reshape(1, 3 * Ci)
    bproj = bproj.astype(jnp.float32)
    wo = p["wo"].reshape(C, Ci).T.astype(jnp.bfloat16)                # (Ci, C)
    bo = p["bo"].reshape(1, C).astype(jnp.float32)
    # TODO(synk): if Ci is ever >=128, align the theta/phi/g lane slices to 128-lane
    # boundaries (pad Ci) to avoid re-layout copies of the projection output.

    out = pl.pallas_call(
        functools.partial(_nonlocal_block_kernel, n=N, L=L, Ci=Ci),
        in_specs=[_VMEM, _VMEM, _VMEM, _VMEM, _VMEM],
        out_specs=_VMEM,
        out_shape=jax.ShapeDtypeStruct((N * L, C), jnp.float32),
        compiler_params=_cparams(),
    )(x2, wproj, bproj, wo, bo)
    return out.reshape(N, H, W, C)


def matmul_bias_act(x, w, b, act=None):
    """Row-tiled fused matmul + bias (+ activation); robust to any M via tail padding."""
    M, K = x.shape
    Nout = w.shape[1]
    tm = min(512, ((M + 7) // 8) * 8)
    Mp = ((M + tm - 1) // tm) * tm
    xp = jnp.pad(x, ((0, Mp - M), (0, 0))) if Mp != M else x
    out = pl.pallas_call(
        functools.partial(_mm_bias_act_kernel, act=act),
        grid=(Mp // tm,),
        in_specs=[pl.BlockSpec((tm, K), lambda i: (i, 0)),
                  pl.BlockSpec((K, Nout), lambda i: (0, 0)),
                  pl.BlockSpec((1, Nout), lambda i: (0, 0))],
        out_specs=pl.BlockSpec((tm, Nout), lambda i: (i, 0)),
        out_shape=jax.ShapeDtypeStruct((Mp, Nout), jnp.float32),
        compiler_params=_cparams("parallel"),
    )(xp, w.astype(jnp.bfloat16), b.reshape(1, Nout).astype(jnp.float32))
    return out[:M]


# ----------------------------- host-side centroid -----------------------------

def get_centroid(a):
    """Host-side exact mirror of Patch_Conv_NonLocal_adapt.get_centroid (numpy, NCHW)."""
    x2 = a.sum(axis=2)   # (N, 1, W)
    x3 = a.sum(axis=3)   # (N, 1, H)
    total = a.sum()
    d = 0
    i = 0
    for i in range(a.shape[3]):
        d = x2[:, :, i] + d
        if d.sum() > 0.5 * total:
            break
    i = i // 2 * 2
    i = 4 if i < 4 else i
    i = a.shape[3] - 4 if i > a.shape[3] - 4 else i
    centroid_y = i
    d = 0
    for i in range(a.shape[2]):
        d = x3[:, :, i] + d
        if d.sum() > 0.5 * total:
            break
    i = i // 2 * 2
    i = 4 if i < 4 else i
    i = a.shape[2] - 4 if i > a.shape[2] - 4 else i
    centroid_x = i
    return centroid_x, centroid_y


# ----------------------------- forward pass -----------------------------

def patch_conv_nonlocal_adapt(x_nchw, params):
    N, C, H, W = x_nchw.shape
    x = jnp.transpose(x_nchw, (0, 2, 3, 1))                          # NHWC, once

    att = spatial_attention_threshold(x, params["sa_w"], params["sa_b"])   # (N, H, W)

    # data-dependent centroids -> host (python control flow with early break); this
    # sync also makes the patch shapes static for the Pallas calls below.
    att_np = np.asarray(jax.device_get(att)).reshape(N, 1, H, W)
    cx, _ = get_centroid(att_np)
    _, cyl = get_centroid(att_np[:, :, :cx, :])
    _, cyr = get_centroid(att_np[:, :, cx:, :])

    # TODO(synk): bucket (cx, cyl, cyr) to a small set of padded quadrant shapes and
    # merge the four base_conv / non_local calls into one pallas_call each (leading
    # "parallel" quadrant axis) to avoid per-centroid recompiles and feed both v7x
    # TensorCores; the non-local merge needs per-quadrant masks and 1/L scalars.
    lt = base_conv(x[:, :cx, :cyl, :], *params["pc_lt"], stride=2)
    lb = base_conv(x[:, cx:, :cyr, :], *params["pc_lb"], stride=2)
    rt = base_conv(x[:, :cx, cyl:, :], *params["pc_rt"], stride=2)
    rb = base_conv(x[:, cx:, cyr:, :], *params["pc_rb"], stride=2)

    lt = non_local_block(lt, params["nl_lt"])
    lb = non_local_block(lb, params["nl_lb"])
    rt = non_local_block(rt, params["nl_rt"])
    rb = non_local_block(rb, params["nl_rb"])

    t = jnp.concatenate([lt, rt], axis=2)                            # cat along W (NHWC)
    b = jnp.concatenate([lb, rb], axis=2)
    t = base_conv(t, *params["pc_t"], stride=1)
    b = base_conv(b, *params["pc_b"], stride=1)
    feat = jnp.concatenate([t, b], axis=1)                           # cat along H

    # channel_conv: 1x1 linear conv with bias
    Nf, Hf, Wf, Cm = feat.shape
    Co = params["cc_w"].shape[0]
    out = matmul_bias_act(feat.reshape(Nf * Hf * Wf, Cm),
                          params["cc_w"].reshape(Co, Cm).T,
                          params["cc_b"])
    return jnp.transpose(out.reshape(Nf, Hf, Wf, Co), (0, 3, 1, 2))  # back to NCHW


# ----------------------------- parameter init -----------------------------

def init_params(key, in_ch, out_ch, channel_scale=1):
    middle = int(channel_scale * in_ch)
    inter = middle // 2
    if inter == 0:
        inter = 1
    keys = iter(jax.random.split(key, 64))

    def nrm(shape, scale=0.1):
        return scale * jax.random.normal(next(keys), shape, jnp.float32)

    def bn(c):  # eval-mode defaults: gamma, beta, running_mean, running_var
        return (jnp.ones((c,), jnp.float32), jnp.zeros((c,), jnp.float32),
                jnp.zeros((c,), jnp.float32), jnp.ones((c,), jnp.float32))

    def baseconv_p(cin, cout):
        return (nrm((cout, cin, 3, 3)),) + bn(cout)

    def nl_p(c, ci):
        return dict(
            wg=nrm((ci, c, 1, 1)), bg=nrm((ci,)),
            wt=nrm((ci, c, 1, 1)), bt=nrm((ci,)),
            wp=nrm((ci, c, 1, 1)), bp=nrm((ci,)),
            wo=nrm((c, ci, 1, 1)), bo=nrm((c,)),
        )

    return dict(
        sa_w=nrm((1, 2, 7, 7)), sa_b=nrm((1,)),
        pc_lt=baseconv_p(in_ch, middle), pc_lb=baseconv_p(in_ch, middle),
        pc_rt=baseconv_p(in_ch, middle), pc_rb=baseconv_p(in_ch, middle),
        nl_lt=nl_p(middle, inter), nl_lb=nl_p(middle, inter),
        nl_rt=nl_p(middle, inter), nl_rb=nl_p(middle, inter),
        pc_t=baseconv_p(middle, middle), pc_b=baseconv_p(middle, middle),
        cc_w=nrm((out_ch, middle, 1, 1)), cc_b=nrm((out_ch,)),
    )


# ----------------------------- main -----------------------------

if __name__ == "__main__":
    key = jax.random.PRNGKey(0)
    kx, kp = jax.random.split(key)
    in_ch, out_ch, N, H, W = 8, 16, 2, 16, 16
    x = jax.random.normal(kx, (N, in_ch, H, W), jnp.float32)
    params = init_params(kp, in_ch, out_ch)

    out = patch_conv_nonlocal_adapt(x, params)
    out = jax.block_until_ready(out)
    assert out.shape == (N, out_ch, H // 2, W // 2), out.shape
    assert bool(jnp.all(jnp.isfinite(out)))
    print("KERNEL_OK")
</pallas_src>

<mosaic_0001>
module attributes {stable_mosaic.version = 11 : i64} {
  func.func @_spatial_attn_threshold_kernel(%arg0: memref<2x16x16x8xf32, #tpu.memory_space<vmem>>, %arg1: memref<98xf32, #tpu.memory_space<smem>>, %arg2: memref<1xf32, #tpu.memory_space<smem>>, %arg3: memref<2x16x128xf32, #tpu.memory_space<vmem>>) attributes {dimension_semantics = [], scalar_prefetch = 0 : i64, scratch_operands = 0 : i64, tpu.core_type = #tpu.core_type<tc>} {
    %c0 = arith.constant 0 : index
    %c0_0 = arith.constant 0 : index
    %c0_1 = arith.constant 0 : index
    %c0_2 = arith.constant 0 : index
    %0 = vector.load %arg0[%c0, %c0_0, %c0_1, %c0_2] : memref<2x16x16x8xf32, #tpu.memory_space<vmem>>, vector<2x16x16x8xf32>
    %cst = arith.constant dense<0xFF800000> : vector<2x16x16xf32>
    %1 = vector.multi_reduction <maximumf>, %0, %cst [3] : vector<2x16x16x8xf32> to vector<2x16x16xf32>
    %cst_3 = arith.constant dense<0.000000e+00> : vector<2x16x16xf32>
    %2 = vector.multi_reduction <add>, %0, %cst_3 [3] : vector<2x16x16x8xf32> to vector<2x16x16xf32>
    %cst_4 = arith.constant 8.000000e+00 : f32
    %3 = vector.broadcast %cst_4 : f32 to vector<2x16x16xf32>
    %4 = arith.divf %2, %3 : vector<2x16x16xf32>
    %cst_5 = arith.constant 0.000000e+00 : f32
    %5 = vector.broadcast %cst_5 : f32 to vector<2x16x3xf32>
    %cst_6 = arith.constant 0.000000e+00 : f32
    %6 = vector.broadcast %cst_6 : f32 to vector<2x16x109xf32>
    %7 = tpu.concatenate %5, %1, %6 in 2 : vector<2x16x3xf32>, vector<2x16x16xf32>, vector<2x16x109xf32> -> vector<2x16x128xf32>
    %cst_7 = arith.constant 0.000000e+00 : f32
    %8 = vector.broadcast %cst_7 : f32 to vector<2x3x128xf32>
    %9 = tpu.concatenate %8, %7, %8 in 1 : vector<2x3x128xf32>, vector<2x16x128xf32>, vector<2x3x128xf32> -> vector<2x22x128xf32>
    %cst_8 = arith.constant 0.000000e+00 : f32
    %10 = vector.broadcast %cst_8 : f32 to vector<2x16x3xf32>
    %cst_9 = arith.constant 0.000000e+00 : f32
    %11 = vector.broadcast %cst_9 : f32 to vector<2x16x109xf32>
    %12 = tpu.concatenate %10, %4, %11 in 2 : vector<2x16x3xf32>, vector<2x16x16xf32>, vector<2x16x109xf32> -> vector<2x16x128xf32>
    %cst_10 = arith.constant 0.000000e+00 : f32
    %13 = vector.broadcast %cst_10 : f32 to vector<2x3x128xf32>
    %14 = tpu.concatenate %13, %12, %13 in 1 : vector<2x3x128xf32>, vector<2x16x128xf32>, vector<2x3x128xf32> -> vector<2x22x128xf32>
    %cst_11 = arith.constant 0.000000e+00 : f32
    %15 = vector.broadcast %cst_11 : f32 to vector<2x16x128xf32>
    %16 = vector.extract_strided_slice %9 {offsets = [0, 0, 0], sizes = [2, 16, 128], strides = [1, 1, 1]} : vector<2x22x128xf32> to vector<2x16x128xf32>
    %c0_12 = arith.constant 0 : index
    %17 = memref.load %arg1[%c0_12] : memref<98xf32, #tpu.memory_space<smem>>
    %18 = vector.broadcast %17 : f32 to vector<2x16x128xf32>
    %19 = arith.mulf %16, %18 : vector<2x16x128xf32>
    %20 = arith.addf %15, %19 : vector<2x16x128xf32>
    %c1 = arith.constant 1 : index
    %21 = memref.load %arg1[%c1] : memref<98xf32, #tpu.memory_space<smem>>
    %c127_i32 = arith.constant 127 : i32
    %22 = tpu.dynamic_rotate %16 by %c127_i32 dim 2 : vector<2x16x128xf32>, i32 -> vector<2x16x128xf32>
    %23 = vector.broadcast %21 : f32 to vector<2x16x128xf32>
    %24 = arith.mulf %22, %23 : vector<2x16x128xf32>
    %25 = arith.addf %20, %24 : vector<2x16x128xf32>
    %c2 = arith.constant 2 : index
    %26 = memref.load %arg1[%c2] : memref<98xf32, #tpu.memory_space<smem>>
    %c126_i32 = arith.constant 126 : i32
    %27 = tpu.dynamic_rotate %16 by %c126_i32 dim 2 : vector<2x16x128xf32>, i32 -> vector<2x16x128xf32>
    %28 = vector.broadcast %26 : f32 to vector<2x16x128xf32>
    %29 = arith.mulf %27, %28 : vector<2x16x128xf32>
    %30 = arith.addf %25, %29 : vector<2x16x128xf32>
    %c3 = arith.constant 3 : index
    %31 = memref.load %arg1[%c3] : memref<98xf32, #tpu.memory_space<smem>>
    %c125_i32 = arith.constant 125 : i32
    %32 = tpu.dynamic_rotate %16 by %c125_i32 dim 2 : vector<2x16x128xf32>, i32 -> vector<2x16x128xf32>
    %33 = vector.broadcast %31 : f32 to vector<2x16x128xf32>
    %34 = arith.mulf %32, %33 : vector<2x16x128xf32>
    %35 = arith.addf %30, %34 : vector<2x16x128xf32>
    %c4 = arith.constant 4 : index
    %36 = memref.load %arg1[%c4] : memref<98xf32, #tpu.memory_space<smem>>
    %c124_i32 = arith.constant 124 : i32
    %37 = tpu.dynamic_rotate %16 by %c124_i32 dim 2 : vector<2x16x128xf32>, i32 -> vector<2x16x128xf32>
    %38 = vector.broadcast %36 : f32 to vector<2x16x128xf32>
    %39 = arith.mulf %37, %38 : vector<2x16x128xf32>
    %40 = arith.addf %35, %39 : vector<2x16x128xf32>
    %c5 = arith.constant 5 : index
    %41 = memref.load %arg1[%c5] : memref<98xf32, #tpu.memory_space<smem>>
    %c123_i32 = arith.constant 123 : i32
    %42 = tpu.dynamic_rotate %16 by %c123_i32 dim 2 : vector<2x16x128xf32>, i32 -> vector<2x16x128xf32>
    %43 = vector.broadcast %41 : f32 to vector<2x16x128xf32>
    %44 = arith.mulf %42, %43 : vector<2x16x128xf32>
    %45 = arith.addf %40, %44 : vector<2x16x128xf32>
    %c6 = arith.constant 6 : index
    %46 = memref.load %arg1[%c6] : memref<98xf32, #tpu.memory_space<smem>>
    %c122_i32 = arith.constant 122 : i32
    %47 = tpu.dynamic_rotate %16 by %c122_i32 dim 2 : vector<2x16x128xf32>, i32 -> vector<2x16x128xf32>
    %48 = vector.broadcast %46 : f32 to vector<2x16x128xf32>
    %49 = arith.mulf %47, %48 : vector<2x16x128xf32>
    %50 = arith.addf %45, %49 : vector<2x16x128xf32>
    %51 = vector.extract_strided_slice %9 {offsets = [0, 1, 0], sizes = [2, 16, 128], strides = [1, 1, 1]} : vector<2x22x128xf32> to vector<2x16x128xf32>
    %c7 = arith.constant 7 : index
    %52 = memref.load %arg1[%c7] : memref<98xf32, #tpu.memory_space<smem>>
    %53 = vector.broadcast %52 : f32 to vector<2x16x128xf32>
    %54 = arith.mulf %51, %53 : vector<2x16x128xf32>
    %55 = arith.addf %50, %54 : vector<2x16x128xf32>
    %c8 = arith.constant 8 : index
    %56 = memref.load %arg1[%c8] : memref<98xf32, #tpu.memory_space<smem>>
    %c127_i32_13 = arith.constant 127 : i32
    %57 = tpu.dynamic_rotate %51 by %c127_i32_13 dim 2 : vector<2x16x128xf32>, i32 -> vector<2x16x128xf32>
    %58 = vector.broadcast %56 : f32 to vector<2x16x128xf32>
    %59 = arith.mulf %57, %58 : vector<2x16x128xf32>
    %60 = arith.addf %55, %59 : vector<2x16x128xf32>
    %c9 = arith.constant 9 : index
    %61 = memref.load %arg1[%c9] : memref<98xf32, #tpu.memory_space<smem>>
    %c126_i32_14 = arith.constant 126 : i32
    %62 = tpu.dynamic_rotate %51 by %c126_i32_14 dim 2 : vector<2x16x128xf32>, i32 -> vector<2x16x128xf32>
    %63 = vector.broadcast %61 : f32 to vector<2x16x128xf32>
    %64 = arith.mulf %62, %63 : vector<2x16x128xf32>
    %65 = arith.addf %60, %64 : vector<2x16x128xf32>
    %c10 = arith.constant 10 : index
    %66 = memref.load %arg1[%c10] : memref<98xf32, #tpu.memory_space<smem>>
    %c125_i32_15 = arith.constant 125 : i32
    %67 = tpu.dynamic_rotate %51 by %c125_i32_15 dim 2 : vector<2x16x128xf32>, i32 -> vector<2x16x128xf32>
    %68 = vector.broadcast %66 : f32 to vector<2x16x128xf32>
    %69 = arith.mulf %67, %68 : vector<2x16x128xf32>
    %70 = arith.addf %65, %69 : vector<2x16x128xf32>
    %c11 = arith.constant 11 : index
    %71 = memref.load %arg1[%c11] : memref<98xf32, #tpu.memory_space<smem>>
    %c124_i32_16 = arith.constant 124 : i32
    %72 = tpu.dynamic_rotate %51 by %c124_i32_16 dim 2 : vector<2x16x128xf32>, i32 -> vector<2x16x128xf32>
    %73 = vector.broadcast %71 : f32 to vector<2x16x128xf32>
    %74 = arith.mulf %72, %73 : vector<2x16x128xf32>
    %75 = arith.addf %70, %74 : vector<2x16x128xf32>
    %c12 = arith.constant 12 : index
    %76 = memref.load %arg1[%c12] : memref<98xf32, #tpu.memory_space<smem>>
    %c123_i32_17 = arith.constant 123 : i32
    %77 = tpu.dynamic_rotate %51 by %c123_i32_17 dim 2 : vector<2x16x128xf32>, i32 -> vector<2x16x128xf32>
    %78 = vector.broadcast %76 : f32 to vector<2x16x128xf32>
    %79 = arith.mulf %77, %78 : vector<2x16x128xf32>
    %80 = arith.addf %75, %79 : vector<2x16x128xf32>
    %c13 = arith.constant 13 : index
    %81 = memref.load %arg1[%c13] : memref<98xf32, #tpu.memory_space<smem>>
    %c122_i32_18 = arith.constant 122 : i32
    %82 = tpu.dynamic_rotate %51 by %c122_i32_18 dim 2 : vector<2x16x128xf32>, i32 -> vector<2x16x128xf32>
    %83 = vector.broadcast %81 : f32 to vector<2x16x128xf32>
    %84 = arith.mulf %82, %83 : vector<2x16x128xf32>
    %85 = arith.addf %80, %84 : vector<2x16x128xf32>
    %86 = vector.extract_strided_slice %9 {offsets = [0, 2, 0], sizes = [2, 16, 128], strides = [1, 1, 1]} : vector<2x22x128xf32> to vector<2x16x128xf32>
    %c14 = arith.constant 14 : index
    %87 = memref.load %arg1[%c14] : memref<98xf32, #tpu.memory_space<smem>>
    %88 = vector.broadcast %87 : f32 to vector<2x16x128xf32>
    %89 = arith.mulf %86, %88 : vector<2x16x128xf32>
    %90 = arith.addf %85, %89 : vector<2x16x128xf32>
    %c15 = arith.constant 15 : index
    %91 = memref.load %arg1[%c15] : memref<98xf32, #tpu.memory_space<smem>>
    %c127_i32_19 = arith.constant 127 : i32
    %92 = tpu.dynamic_rotate %86 by %c127_i32_19 dim 2 : vector<2x16x128xf32>, i32 -> vector<2x16x128xf32>
    %93 = vector.broadcast %91 : f32 to vector<2x16x128xf32>
    %94 = arith.mulf %92, %93 : vector<2x16x128xf32>
    %95 = arith.addf %90, %94 : vector<2x16x128xf32>
    %c16 = arith.constant 16 : index
    %96 = memref.load %arg1[%c16] : memref<98xf32, #tpu.memory_space<smem>>
    %c126_i32_20 = arith.constant 126 : i32
    %97 = tpu.dynamic_rotate %86 by %c126_i32_20 dim 2 : vector<2x16x128xf32>, i32 -> vector<2x16x128xf32>
    %98 = vector.broadcast %96 : f32 to vector<2x16x128xf32>
    %99 = arith.mulf %97, %98 : vector<2x16x128xf32>
    %100 = arith.addf %95, %99 : vector<2x16x128xf32>
    %c17 = arith.constant 17 : index
    %101 = memref.load %arg1[%c17] : memref<98xf32, #tpu.memory_space<smem>>
    %c125_i32_21 = arith.constant 125 : i32
    %102 = tpu.dynamic_rotate %86 by %c125_i32_21 dim 2 : vector<2x16x128xf32>, i32 -> vector<2x16x128xf32>
    %103 = vector.broadcast %101 : f32 to vector<2x16x128xf32>
    %104 = arith.mulf %102, %103 : vector<2x16x128xf32>
    %105 = arith.addf %100, %104 : vector<2x16x128xf32>
    %c18 = arith.constant 18 : index
    %106 = memref.load %arg1[%c18] : memref<98xf32, #tpu.memory_space<smem>>
    %c124_i32_22 = arith.constant 124 : i32
    %107 = tpu.dynamic_rotate %86 by %c124_i32_22 dim 2 : vector<2x16x128xf32>, i32 -> vector<2x16x128xf32>
    %108 = vector.broadcast %106 : f32 to vector<2x16x128xf32>
    %109 = arith.mulf %107, %108 : vector<2x16x128xf32>
    %110 = arith.addf %105, %109 : vector<2x16x128xf32>
    %c19 = arith.constant 19 : index
    %111 = memref.load %arg1[%c19] : memref<98xf32, #tpu.memory_space<smem>>
    %c123_i32_23 = arith.constant 123 : i32
    %112 = tpu.dynamic_rotate %86 by %c123_i32_23 dim 2 : vector<2x16x128xf32>, i32 -> vector<2x16x128xf32>
    %113 = vector.broadcast %111 : f32 to vector<2x16x128xf32>
    %114 = arith.mulf %112, %113 : vector<2x16x128xf32>
    %115 = arith.addf %110, %114 : vector<2x16x128xf32>
    %c20 = arith.constant 20 : index
    %116 = memref.load %arg1[%c20] : memref<98xf32, #tpu.memory_space<smem>>
    %c122_i32_24 = arith.constant 122 : i32
    %117 = tpu.dynamic_rotate %86 by %c122_i32_24 dim 2 : vector<2x16x128xf32>, i32 -> vector<2x16x128xf32>
    %118 = vector.broadcast %116 : f32 to vector<2x16x128xf32>
    %119 = arith.mulf %117, %118 : vector<2x16x128xf32>
    %120 = arith.addf %115, %119 : vector<2x16x128xf32>
    %121 = vector.extract_strided_slice %9 {offsets = [0, 3, 0], sizes = [2, 16, 128], strides = [1, 1, 1]} : vector<2x22x128xf32> to vector<2x16x128xf32>
    %c21 = arith.constant 21 : index
    %122 = memref.load %arg1[%c21] : memref<98xf32, #tpu.memory_space<smem>>
    %123 = vector.broadcast %122 : f32 to vector<2x16x128xf32>
    %124 = arith.mulf %121, %123 : vector<2x16x128xf32>
    %125 = arith.addf %120, %124 : vector<2x16x128xf32>
    %c22 = arith.constant 22 : index
    %126 = memref.load %arg1[%c22] : memref<98xf32, #tpu.memory_space<smem>>
    %c127_i32_25 = arith.constant 127 : i32
    %127 = tpu.dynamic_rotate %121 by %c127_i32_25 dim 2 : vector<2x16x128xf32>, i32 -> vector<2x16x128xf32>
    %128 = vector.broadcast %126 : f32 to vector<2x16x128xf32>
    %129 = arith.mulf %127, %128 : vector<2x16x128xf32>
    %130 = arith.addf %125, %129 : vector<2x16x128xf32>
    %c23 = arith.constant 23 : index
    %131 = memref.load %arg1[%c23] : memref<98xf32, #tpu.memory_space<smem>>
    %c126_i32_26 = arith.constant 126 : i32
    %132 = tpu.dynamic_rotate %121 by %c126_i32_26 dim 2 : vector<2x16x128xf32>, i32 -> vector<2x16x128xf32>
    %133 = vector.broadcast %131 : f32 to vector<2x16x128xf32>
    %134 = arith.mulf %132, %133 : vector<2x16x128xf32>
    %135 = arith.addf %130, %134 : vector<2x16x128xf32>
    %c24 = arith.constant 24 : index
    %136 = memref.load %arg1[%c24] : memref<98xf32, #tpu.memory_space<smem>>
    %c125_i32_27 = arith.constant 125 : i32
    %137 = tpu.dynamic_rotate %121 by %c125_i32_27 dim 2 : vector<2x16x128xf32>, i32 -> vector<2x16x128xf32>
    %138 = vector.broadcast %136 : f32 to vector<2x16x128xf32>
    %139 = arith.mulf %137, %138 : vector<2x16x128xf32>
    %140 = arith.addf %135, %139 : vector<2x16x128xf32>
    %c25 = arith.constant 25 : index
    %141 = memref.load %arg1[%c25] : memref<98xf32, #tpu.memory_space<smem>>
    %c124_i32_28 = arith.constant 124 : i32
    %142 = tpu.dynamic_rotate %121 by %c124_i32_28 dim 2 : vector<2x16x128xf32>, i32 -> vector<2x16x128xf32>
    %143 = vector.broadcast %141 : f32 to vector<2x16x128xf32>
    %144 = arith.mulf %142, %143 : vector<2x16x128xf32>
    %145 = arith.addf %140, %144 : vector<2x16x128xf32>
    %c26 = arith.constant 26 : index
    %146 = memref.load %arg1[%c26] : memref<98xf32, #tpu.memory_space<smem>>
    %c123_i32_29 = arith.constant 123 : i32
    %147 = tpu.dynamic_rotate %121 by %c123_i32_29 dim 2 : vector<2x16x128xf32>, i32 -> vector<2x16x128xf32>
    %148 = vector.broadcast %146 : f32 to vector<2x16x128xf32>
    %149 = arith.mulf %147, %148 : vector<2x16x128xf32>
    %150 = arith.addf %145, %149 : vector<2x16x128xf32>
    %c27 = arith.constant 27 : index
    %151 = memref.load %arg1[%c27] : memref<98xf32, #tpu.memory_space<smem>>
    %c122_i32_30 = arith.constant 122 : i32
    %152 = tpu.dynamic_rotate %121 by %c122_i32_30 dim 2 : vector<2x16x128xf32>, i32 -> vector<2x16x128xf32>
    %153 = vector.broadcast %151 : f32 to vector<2x16x128xf32>
    %154 = arith.mulf %152, %153 : vector<2x16x128xf32>
    %155 = arith.addf %150, %154 : vector<2x16x128xf32>
    %156 = vector.extract_strided_slice %9 {offsets = [0, 4, 0], sizes = [2, 16, 128], strides = [1, 1, 1]} : vector<2x22x128xf32> to vector<2x16x128xf32>
    %c28 = arith.constant 28 : index
    %157 = memref.load %arg1[%c28] : memref<98xf32, #tpu.memory_space<smem>>
    %158 = vector.broadcast %157 : f32 to vector<2x16x128xf32>
    %159 = arith.mulf %156, %158 : vector<2x16x128xf32>
    %160 = arith.addf %155, %159 : vector<2x16x128xf32>
    %c29 = arith.constant 29 : index
    %161 = memref.load %arg1[%c29] : memref<98xf32, #tpu.memory_space<smem>>
    %c127_i32_31 = arith.constant 127 : i32
    %162 = tpu.dynamic_rotate %156 by %c127_i32_31 dim 2 : vector<2x16x128xf32>, i32 -> vector<2x16x128xf32>
    %163 = vector.broadcast %161 : f32 to vector<2x16x128xf32>
    %164 = arith.mulf %162, %163 : vector<2x16x128xf32>
    %165 = arith.addf %160, %164 : vector<2x16x128xf32>
    %c30 = arith.constant 30 : index
    %166 = memref.load %arg1[%c30] : memref<98xf32, #tpu.memory_space<smem>>
    %c126_i32_32 = arith.constant 126 : i32
    %167 = tpu.dynamic_rotate %156 by %c126_i32_32 dim 2 : vector<2x16x128xf32>, i32 -> vector<2x16x128xf32>
    %168 = vector.broadcast %166 : f32 to vector<2x16x128xf32>
    %169 = arith.mulf %167, %168 : vector<2x16x128xf32>
    %170 = arith.addf %165, %169 : vector<2x16x128xf32>
    %c31 = arith.constant 31 : index
    %171 = memref.load %arg1[%c31] : memref<98xf32, #tpu.memory_space<smem>>
    %c125_i32_33 = arith.constant 125 : i32
    %172 = tpu.dynamic_rotate %156 by %c125_i32_33 dim 2 : vector<2x16x128xf32>, i32 -> vector<2x16x128xf32>
    %173 = vector.broadcast %171 : f32 to vector<2x16x128xf32>
    %174 = arith.mulf %172, %173 : vector<2x16x128xf32>
    %175 = arith.addf %170, %174 : vector<2x16x128xf32>
    %c32 = arith.constant 32 : index
    %176 = memref.load %arg1[%c32] : memref<98xf32, #tpu.memory_space<smem>>
    %c124_i32_34 = arith.constant 124 : i32
    %177 = tpu.dynamic_rotate %156 by %c124_i32_34 dim 2 : vector<2x16x128xf32>, i32 -> vector<2x16x128xf32>
    %178 = vector.broadcast %176 : f32 to vector<2x16x128xf32>
    %179 = arith.mulf %177, %178 : vector<2x16x128xf32>
    %180 = arith.addf %175, %179 : vector<2x16x128xf32>
    %c33 = arith.constant 33 : index
    %181 = memref.load %arg1[%c33] : memref<98xf32, #tpu.memory_space<smem>>
    %c123_i32_35 = arith.constant 123 : i32
    %182 = tpu.dynamic_rotate %156 by %c123_i32_35 dim 2 : vector<2x16x128xf32>, i32 -> vector<2x16x128xf32>
    %183 = vector.broadcast %181 : f32 to vector<2x16x128xf32>
    %184 = arith.mulf %182, %183 : vector<2x16x128xf32>
    %185 = arith.addf %180, %184 : vector<2x16x128xf32>
    %c34 = arith.constant 34 : index
    %186 = memref.load %arg1[%c34] : memref<98xf32, #tpu.memory_space<smem>>
    %c122_i32_36 = arith.constant 122 : i32
    %187 = tpu.dynamic_rotate %156 by %c122_i32_36 dim 2 : vector<2x16x128xf32>, i32 -> vector<2x16x128xf32>
    %188 = vector.broadcast %186 : f32 to vector<2x16x128xf32>
    %189 = arith.mulf %187, %188 : vector<2x16x128xf32>
    %190 = arith.addf %185, %189 : vector<2x16x128xf32>
    %191 = vector.extract_strided_slice %9 {offsets = [0, 5, 0], sizes = [2, 16, 128], strides = [1, 1, 1]} : vector<2x22x128xf32> to vector<2x16x128xf32>
    %c35 = arith.constant 35 : index
    %192 = memref.load %arg1[%c35] : memref<98xf32, #tpu.memory_space<smem>>
    %193 = vector.broadcast %192 : f32 to vector<2x16x128xf32>
    %194 = arith.mulf %191, %193 : vector<2x16x128xf32>
    %195 = arith.addf %190, %194 : vector<2x16x128xf32>
    %c36 = arith.constant 36 : index
    %196 = memref.load %arg1[%c36] : memref<98xf32, #tpu.memory_space<smem>>
    %c127_i32_37 = arith.constant 127 : i32
    %197 = tpu.dynamic_rotate %191 by %c127_i32_37 dim 2 : vector<2x16x128xf32>, i32 -> vector<2x16x128xf32>
    %198 = vector.broadcast %196 : f32 to vector<2x16x128xf32>
    %199 = arith.mulf %197, %198 : vector<2x16x128xf32>
    %200 = arith.addf %195, %199 : vector<2x16x128xf32>
    %c37 = arith.constant 37 : index
    %201 = memref.load %arg1[%c37] : memref<98xf32, #tpu.memory_space<smem>>
    %c126_i32_38 = arith.constant 126 : i32
    %202 = tpu.dynamic_rotate %191 by %c126_i32_38 dim 2 : vector<2x16x128xf32>, i32 -> vector<2x16x128xf32>
    %203 = vector.broadcast %201 : f32 to vector<2x16x128xf32>
    %204 = arith.mulf %202, %203 : vector<2x16x128xf32>
    %205 = arith.addf %200, %204 : vector<2x16x128xf32>
    %c38 = arith.constant 38 : index
    %206 = memref.load %arg1[%c38] : memref<98xf32, #tpu.memory_space<smem>>
    %c125_i32_39 = arith.constant 125 : i32
    %207 = tpu.dynamic_rotate %191 by %c125_i32_39 dim 2 : vector<2x16x128xf32>, i32 -> vector<2x16x128xf32>
    %208 = vector.broadcast %206 : f32 to vector<2x16x128xf32>
    %209 = arith.mulf %207, %208 : vector<2x16x128xf32>
    %210 = arith.addf %205, %209 : vector<2x16x128xf32>
    %c39 = arith.constant 39 : index
    %211 = memref.load %arg1[%c39] : memref<98xf32, #tpu.memory_space<smem>>
    %c124_i32_40 = arith.constant 124 : i32
    %212 = tpu.dynamic_rotate %191 by %c124_i32_40 dim 2 : vector<2x16x128xf32>, i32 -> vector<2x16x128xf32>
    %213 = vector.broadcast %211 : f32 to vector<2x16x128xf32>
    %214 = arith.mulf %212, %213 : vector<2x16x128xf32>
    %215 = arith.addf %210, %214 : vector<2x16x128xf32>
    %c40 = arith.constant 40 : index
    %216 = memref.load %arg1[%c40] : memref<98xf32, #tpu.memory_space<smem>>
    %c123_i32_41 = arith.constant 123 : i32
    %217 = tpu.dynamic_rotate %191 by %c123_i32_41 dim 2 : vector<2x16x128xf32>, i32 -> vector<2x16x128xf32>
    %218 = vector.broadcast %216 : f32 to vector<2x16x128xf32>
    %219 = arith.mulf %217, %218 : vector<2x16x128xf32>
    %220 = arith.addf %215, %219 : vector<2x16x128xf32>
    %c41 = arith.constant 41 : index
    %221 = memref.load %arg1[%c41] : memref<98xf32, #tpu.memory_space<smem>>
    %c122_i32_42 = arith.constant 122 : i32
    %222 = tpu.dynamic_rotate %191 by %c122_i32_42 dim 2 : vector<2x16x128xf32>, i32 -> vector<2x16x128xf32>
    %223 = vector.broadcast %221 : f32 to vector<2x16x128xf32>
    %224 = arith.mulf %222, %223 : vector<2x16x128xf32>
    %225 = arith.addf %220, %224 : vector<2x16x128xf32>
    %226 = vector.extract_strided_slice %9 {offsets = [0, 6, 0], sizes = [2, 16, 128], strides = [1, 1, 1]} : vector<2x22x128xf32> to vector<2x16x128xf32>
    %c42 = arith.constant 42 : index
    %227 = memref.load %arg1[%c42] : memref<98xf32, #tpu.memory_space<smem>>
    %228 = vector.broadcast %227 : f32 to vector<2x16x128xf32>
    %229 = arith.mulf %226, %228 : vector<2x16x128xf32>
    %230 = arith.addf %225, %229 : vector<2x16x128xf32>
    %c43 = arith.constant 43 : index
    %231 = memref.load %arg1[%c43] : memref<98xf32, #tpu.memory_space<smem>>
    %c127_i32_43 = arith.constant 127 : i32
    %232 = tpu.dynamic_rotate %226 by %c127_i32_43 dim 2 : vector<2x16x128xf32>, i32 -> vector<2x16x128xf32>
    %233 = vector.broadcast %231 : f32 to vector<2x16x128xf32>
    %234 = arith.mulf %232, %233 : vector<2x16x128xf32>
    %235 = arith.addf %230, %234 : vector<2x16x128xf32>
    %c44 = arith.constant 44 : index
    %236 = memref.load %arg1[%c44] : memref<98xf32, #tpu.memory_space<smem>>
    %c126_i32_44 = arith.constant 126 : i32
    %237 = tpu.dynamic_rotate %226 by %c126_i32_44 dim 2 : vector<2x16x128xf32>, i32 -> vector<2x16x128xf32>
    %238 = vector.broadcast %236 : f32 to vector<2x16x128xf32>
    %239 = arith.mulf %237, %238 : vector<2x16x128xf32>
    %240 = arith.addf %235, %239 : vector<2x16x128xf32>
    %c45 = arith.constant 45 : index
    %241 = memref.load %arg1[%c45] : memref<98xf32, #tpu.memory_space<smem>>
    %c125_i32_45 = arith.constant 125 : i32
    %242 = tpu.dynamic_rotate %226 by %c125_i32_45 dim 2 : vector<2x16x128xf32>, i32 -> vector<2x16x128xf32>
    %243 = vector.broadcast %241 : f32 to vector<2x16x128xf32>
    %244 = arith.mulf %242, %243 : vector<2x16x128xf32>
    %245 = arith.addf %240, %244 : vector<2x16x128xf32>
    %c46 = arith.constant 46 : index
    %246 = memref.load %arg1[%c46] : memref<98xf32, #tpu.memory_space<smem>>
    %c124_i32_46 = arith.constant 124 : i32
    %247 = tpu.dynamic_rotate %226 by %c124_i32_46 dim 2 : vector<2x16x128xf32>, i32 -> vector<2x16x128xf32>
    %248 = vector.broadcast %246 : f32 to vector<2x16x128xf32>
    %249 = arith.mulf %247, %248 : vector<2x16x128xf32>
    %250 = arith.addf %245, %249 : vector<2x16x128xf32>
    %c47 = arith.constant 47 : index
    %251 = memref.load %arg1[%c47] : memref<98xf32, #tpu.memory_space<smem>>
    %c123_i32_47 = arith.constant 123 : i32
    %252 = tpu.dynamic_rotate %226 by %c123_i32_47 dim 2 : vector<2x16x128xf32>, i32 -> vector<2x16x128xf32>
    %253 = vector.broadcast %251 : f32 to vector<2x16x128xf32>
    %254 = arith.mulf %252, %253 : vector<2x16x128xf32>
    %255 = arith.addf %250, %254 : vector<2x16x128xf32>
    %c48 = arith.constant 48 : index
    %256 = memref.load %arg1[%c48] : memref<98xf32, #tpu.memory_space<smem>>
    %c122_i32_48 = arith.constant 122 : i32
    %257 = tpu.dynamic_rotate %226 by %c122_i32_48 dim 2 : vector<2x16x128xf32>, i32 -> vector<2x16x128xf32>
    %258 = vector.broadcast %256 : f32 to vector<2x16x128xf32>
    %259 = arith.mulf %257, %258 : vector<2x16x128xf32>
    %260 = arith.addf %255, %259 : vector<2x16x128xf32>
    %261 = vector.extract_strided_slice %14 {offsets = [0, 0, 0], sizes = [2, 16, 128], strides = [1, 1, 1]} : vector<2x22x128xf32> to vector<2x16x128xf32>
    %c49 = arith.constant 49 : index
    %262 = memref.load %arg1[%c49] : memref<98xf32, #tpu.memory_space<smem>>
    %263 = vector.broadcast %262 : f32 to vector<2x16x128xf32>
    %264 = arith.mulf %261, %263 : vector<2x16x128xf32>
    %265 = arith.addf %260, %264 : vector<2x16x128xf32>
    %c50 = arith.constant 50 : index
    %266 = memref.load %arg1[%c50] : memref<98xf32, #tpu.memory_space<smem>>
    %c127_i32_49 = arith.constant 127 : i32
    %267 = tpu.dynamic_rotate %261 by %c127_i32_49 dim 2 : vector<2x16x128xf32>, i32 -> vector<2x16x128xf32>
    %268 = vector.broadcast %266 : f32 to vector<2x16x128xf32>
    %269 = arith.mulf %267, %268 : vector<2x16x128xf32>
    %270 = arith.addf %265, %269 : vector<2x16x128xf32>
    %c51 = arith.constant 51 : index
    %271 = memref.load %arg1[%c51] : memref<98xf32, #tpu.memory_space<smem>>
    %c126_i32_50 = arith.constant 126 : i32
    %272 = tpu.dynamic_rotate %261 by %c126_i32_50 dim 2 : vector<2x16x128xf32>, i32 -> vector<2x16x128xf32>
    %273 = vector.broadcast %271 : f32 to vector<2x16x128xf32>
    %274 = arith.mulf %272, %273 : vector<2x16x128xf32>
    %275 = arith.addf %270, %274 : vector<2x16x128xf32>
    %c52 = arith.constant 52 : index
    %276 = memref.load %arg1[%c52] : memref<98xf32, #tpu.memory_space<smem>>
    %c125_i32_51 = arith.constant 125 : i32
    %277 = tpu.dynamic_rotate %261 by %c125_i32_51 dim 2 : vector<2x16x128xf32>, i32 -> vector<2x16x128xf32>
    %278 = vector.broadcast %276 : f32 to vector<2x16x128xf32>
    %279 = arith.mulf %277, %278 : vector<2x16x128xf32>
    %280 = arith.addf %275, %279 : vector<2x16x128xf32>
    %c53 = arith.constant 53 : index
    %281 = memref.load %arg1[%c53] : memref<98xf32, #tpu.memory_space<smem>>
    %c124_i32_52 = arith.constant 124 : i32
    %282 = tpu.dynamic_rotate %261 by %c124_i32_52 dim 2 : vector<2x16x128xf32>, i32 -> vector<2x16x128xf32>
    %283 = vector.broadcast %281 : f32 to vector<2x16x128xf32>
    %284 = arith.mulf %282, %283 : vector<2x16x128xf32>
    %285 = arith.addf %280, %284 : vector<2x16x128xf32>
    %c54 = arith.constant 54 : index
    %286 = memref.load %arg1[%c54] : memref<98xf32, #tpu.memory_space<smem>>
    %c123_i32_53 = arith.constant 123 : i32
    %287 = tpu.dynamic_rotate %261 by %c123_i32_53 dim 2 : vector<2x16x128xf32>, i32 -> vector<2x16x128xf32>
    %288 = vector.broadcast %286 : f32 to vector<2x16x128xf32>
    %289 = arith.mulf %287, %288 : vector<2x16x128xf32>
    %290 = arith.addf %285, %289 : vector<2x16x128xf32>
    %c55 = arith.constant 55 : index
    %291 = memref.load %arg1[%c55] : memref<98xf32, #tpu.memory_space<smem>>
    %c122_i32_54 = arith.constant 122 : i32
    %292 = tpu.dynamic_rotate %261 by %c122_i32_54 dim 2 : vector<2x16x128xf32>, i32 -> vector<2x16x128xf32>
    %293 = vector.broadcast %291 : f32 to vector<2x16x128xf32>
    %294 = arith.mulf %292, %293 : vector<2x16x128xf32>
    %295 = arith.addf %290, %294 : vector<2x16x128xf32>
    %296 = vector.extract_strided_slice %14 {offsets = [0, 1, 0], sizes = [2, 16, 128], strides = [1, 1, 1]} : vector<2x22x128xf32> to vector<2x16x128xf32>
    %c56 = arith.constant 56 : index
    %297 = memref.load %arg1[%c56] : memref<98xf32, #tpu.memory_space<smem>>
    %298 = vector.broadcast %297 : f32 to vector<2x16x128xf32>
    %299 = arith.mulf %296, %298 : vector<2x16x128xf32>
    %300 = arith.addf %295, %299 : vector<2x16x128xf32>
    %c57 = arith.constant 57 : index
    %301 = memref.load %arg1[%c57] : memref<98xf32, #tpu.memory_space<smem>>
    %c127_i32_55 = arith.constant 127 : i32
    %302 = tpu.dynamic_rotate %296 by %c127_i32_55 dim 2 : vector<2x16x128xf32>, i32 -> vector<2x16x128xf32>
    %303 = vector.broadcast %301 : f32 to vector<2x16x128xf32>
    %304 = arith.mulf %302, %303 : vector<2x16x128xf32>
    %305 = arith.addf %300, %304 : vector<2x16x128xf32>
    %c58 = arith.constant 58 : index
    %306 = memref.load %arg1[%c58] : memref<98xf32, #tpu.memory_space<smem>>
    %c126_i32_56 = arith.constant 126 : i32
    %307 = tpu.dynamic_rotate %296 by %c126_i32_56 dim 2 : vector<2x16x128xf32>, i32 -> vector<2x16x128xf32>
    %308 = vector.broadcast %306 : f32 to vector<2x16x128xf32>
    %309 = arith.mulf %307, %308 : vector<2x16x128xf32>
    %310 = arith.addf %305, %309 : vector<2x16x128xf32>
    %c59 = arith.constant 59 : index
    %311 = memref.load %arg1[%c59] : memref<98xf32, #tpu.memory_space<smem>>
    %c125_i32_57 = arith.constant 125 : i32
    %312 = tpu.dynamic_rotate %296 by %c125_i32_57 dim 2 : vector<2x16x128xf32>, i32 -> vector<2x16x128xf32>
    %313 = vector.broadcast %311 : f32 to vector<2x16x128xf32>
    %314 = arith.mulf %312, %313 : vector<2x16x128xf32>
    %315 = arith.addf %310, %314 : vector<2x16x128xf32>
    %c60 = arith.constant 60 : index
    %316 = memref.load %arg1[%c60] : memref<98xf32, #tpu.memory_space<smem>>
    %c124_i32_58 = arith.constant 124 : i32
    %317 = tpu.dynamic_rotate %296 by %c124_i32_58 dim 2 : vector<2x16x128xf32>, i32 -> vector<2x16x128xf32>
    %318 = vector.broadcast %316 : f32 to vector<2x16x128xf32>
    %319 = arith.mulf %317, %318 : vector<2x16x128xf32>
    %320 = arith.addf %315, %319 : vector<2x16x128xf32>
    %c61 = arith.constant 61 : index
    %321 = memref.load %arg1[%c61] : memref<98xf32, #tpu.memory_space<smem>>
    %c123_i32_59 = arith.constant 123 : i32
    %322 = tpu.dynamic_rotate %296 by %c123_i32_59 dim 2 : vector<2x16x128xf32>, i32 -> vector<2x16x128xf32>
    %323 = vector.broadcast %321 : f32 to vector<2x16x128xf32>
    %324 = arith.mulf %322, %323 : vector<2x16x128xf32>
    %325 = arith.addf %320, %324 : vector<2x16x128xf32>
    %c62 = arith.constant 62 : index
    %326 = memref.load %arg1[%c62] : memref<98xf32, #tpu.memory_space<smem>>
    %c122_i32_60 = arith.constant 122 : i32
    %327 = tpu.dynamic_rotate %296 by %c122_i32_60 dim 2 : vector<2x16x128xf32>, i32 -> vector<2x16x128xf32>
    %328 = vector.broadcast %326 : f32 to vector<2x16x128xf32>
    %329 = arith.mulf %327, %328 : vector<2x16x128xf32>
    %330 = arith.addf %325, %329 : vector<2x16x128xf32>
    %331 = vector.extract_strided_slice %14 {offsets = [0, 2, 0], sizes = [2, 16, 128], strides = [1, 1, 1]} : vector<2x22x128xf32> to vector<2x16x128xf32>
    %c63 = arith.constant 63 : index
    %332 = memref.load %arg1[%c63] : memref<98xf32, #tpu.memory_space<smem>>
    %333 = vector.broadcast %332 : f32 to vector<2x16x128xf32>
    %334 = arith.mulf %331, %333 : vector<2x16x128xf32>
    %335 = arith.addf %330, %334 : vector<2x16x128xf32>
    %c64 = arith.constant 64 : index
    %336 = memref.load %arg1[%c64] : memref<98xf32, #tpu.memory_space<smem>>
    %c127_i32_61 = arith.constant 127 : i32
    %337 = tpu.dynamic_rotate %331 by %c127_i32_61 dim 2 : vector<2x16x128xf32>, i32 -> vector<2x16x128xf32>
    %338 = vector.broadcast %336 : f32 to vector<2x16x128xf32>
    %339 = arith.mulf %337, %338 : vector<2x16x128xf32>
    %340 = arith.addf %335, %339 : vector<2x16x128xf32>
    %c65 = arith.constant 65 : index
    %341 = memref.load %arg1[%c65] : memref<98xf32, #tpu.memory_space<smem>>
    %c126_i32_62 = arith.constant 126 : i32
    %342 = tpu.dynamic_rotate %331 by %c126_i32_62 dim 2 : vector<2x16x128xf32>, i32 -> vector<2x16x128xf32>
    %343 = vector.broadcast %341 : f32 to vector<2x16x128xf32>
    %344 = arith.mulf %342, %343 : vector<2x16x128xf32>
    %345 = arith.addf %340, %344 : vector<2x16x128xf32>
    %c66 = arith.constant 66 : index
    %346 = memref.load %arg1[%c66] : memref<98xf32, #tpu.memory_space<smem>>
    %c125_i32_63 = arith.constant 125 : i32
    %347 = tpu.dynamic_rotate %331 by %c125_i32_63 dim 2 : vector<2x16x128xf32>, i32 -> vector<2x16x128xf32>
    %348 = vector.broadcast %346 : f32 to vector<2x16x128xf32>
    %349 = arith.mulf %347, %348 : vector<2x16x128xf32>
    %350 = arith.addf %345, %349 : vector<2x16x128xf32>
    %c67 = arith.constant 67 : index
    %351 = memref.load %arg1[%c67] : memref<98xf32, #tpu.memory_space<smem>>
    %c124_i32_64 = arith.constant 124 : i32
    %352 = tpu.dynamic_rotate %331 by %c124_i32_64 dim 2 : vector<2x16x128xf32>, i32 -> vector<2x16x128xf32>
    %353 = vector.broadcast %351 : f32 to vector<2x16x128xf32>
    %354 = arith.mulf %352, %353 : vector<2x16x128xf32>
    %355 = arith.addf %350, %354 : vector<2x16x128xf32>
    %c68 = arith.constant 68 : index
    %356 = memref.load %arg1[%c68] : memref<98xf32, #tpu.memory_space<smem>>
    %c123_i32_65 = arith.constant 123 : i32
    %357 = tpu.dynamic_rotate %331 by %c123_i32_65 dim 2 : vector<2x16x128xf32>, i32 -> vector<2x16x128xf32>
    %358 = vector.broadcast %356 : f32 to vector<2x16x128xf32>
    %359 = arith.mulf %357, %358 : vector<2x16x128xf32>
    %360 = arith.addf %355, %359 : vector<2x16x128xf32>
    %c69 = arith.constant 69 : index
    %361 = memref.load %arg1[%c69] : memref<98xf32, #tpu.memory_space<smem>>
    %c122_i32_66 = arith.constant 122 : i32
    %362 = tpu.dynamic_rotate %331 by %c122_i32_66 dim 2 : vector<2x16x128xf32>, i32 -> vector<2x16x128xf32>
    %363 = vector.broadcast %361 : f32 to vector<2x16x128xf32>
    %364 = arith.mulf %362, %363 : vector<2x16x128xf32>
    %365 = arith.addf %360, %364 : vector<2x16x128xf32>
    %366 = vector.extract_strided_slice %14 {offsets = [0, 3, 0], sizes = [2, 16, 128], strides = [1, 1, 1]} : vector<2x22x128xf32> to vector<2x16x128xf32>
    %c70 = arith.constant 70 : index
    %367 = memref.load %arg1[%c70] : memref<98xf32, #tpu.memory_space<smem>>
    %368 = vector.broadcast %367 : f32 to vector<2x16x128xf32>
    %369 = arith.mulf %366, %368 : vector<2x16x128xf32>
    %370 = arith.addf %365, %369 : vector<2x16x128xf32>
    %c71 = arith.constant 71 : index
    %371 = memref.load %arg1[%c71] : memref<98xf32, #tpu.memory_space<smem>>
    %c127_i32_67 = arith.constant 127 : i32
    %372 = tpu.dynamic_rotate %366 by %c127_i32_67 dim 2 : vector<2x16x128xf32>, i32 -> vector<2x16x128xf32>
    %373 = vector.broadcast %371 : f32 to vector<2x16x128xf32>
    %374 = arith.mulf %372, %373 : vector<2x16x128xf32>
    %375 = arith.addf %370, %374 : vector<2x16x128xf32>
    %c72 = arith.constant 72 : index
    %376 = memref.load %arg1[%c72] : memref<98xf32, #tpu.memory_space<smem>>
    %c126_i32_68 = arith.constant 126 : i32
    %377 = tpu.dynamic_rotate %366 by %c126_i32_68 dim 2 : vector<2x16x128xf32>, i32 -> vector<2x16x128xf32>
    %378 = vector.broadcast %376 : f32 to vector<2x16x128xf32>
    %379 = arith.mulf %377, %378 : vector<2x16x128xf32>
    %380 = arith.addf %375, %379 : vector<2x16x128xf32>
    %c73 = arith.constant 73 : index
    %381 = memref.load %arg1[%c73] : memref<98xf32, #tpu.memory_space<smem>>
    %c125_i32_69 = arith.constant 125 : i32
    %382 = tpu.dynamic_rotate %366 by %c125_i32_69 dim 2 : vector<2x16x128xf32>, i32 -> vector<2x16x128xf32>
    %383 = vector.broadcast %381 : f32 to vector<2x16x128xf32>
    %384 = arith.mulf %382, %383 : vector<2x16x128xf32>
    %385 = arith.addf %380, %384 : vector<2x16x128xf32>
    %c74 = arith.constant 74 : index
    %386 = memref.load %arg1[%c74] : memref<98xf32, #tpu.memory_space<smem>>
    %c124_i32_70 = arith.constant 124 : i32
    %387 = tpu.dynamic_rotate %366 by %c124_i32_70 dim 2 : vector<2x16x128xf32>, i32 -> vector<2x16x128xf32>
    %388 = vector.broadcast %386 : f32 to vector<2x16x128xf32>
    %389 = arith.mulf %387, %388 : vector<2x16x128xf32>
    %390 = arith.addf %385, %389 : vector<2x16x128xf32>
    %c75 = arith.constant 75 : index
    %391 = memref.load %arg1[%c75] : memref<98xf32, #tpu.memory_space<smem>>
    %c123_i32_71 = arith.constant 123 : i32
    %392 = tpu.dynamic_rotate %366 by %c123_i32_71 dim 2 : vector<2x16x128xf32>, i32 -> vector<2x16x128xf32>
    %393 = vector.broadcast %391 : f32 to vector<2x16x128xf32>
    %394 = arith.mulf %392, %393 : vector<2x16x128xf32>
    %395 = arith.addf %390, %394 : vector<2x16x128xf32>
    %c76 = arith.constant 76 : index
    %396 = memref.load %arg1[%c76] : memref<98xf32, #tpu.memory_space<smem>>
    %c122_i32_72 = arith.constant 122 : i32
    %397 = tpu.dynamic_rotate %366 by %c122_i32_72 dim 2 : vector<2x16x128xf32>, i32 -> vector<2x16x128xf32>
    %398 = vector.broadcast %396 : f32 to vector<2x16x128xf32>
    %399 = arith.mulf %397, %398 : vector<2x16x128xf32>
    %400 = arith.addf %395, %399 : vector<2x16x128xf32>
    %401 = vector.extract_strided_slice %14 {offsets = [0, 4, 0], sizes = [2, 16, 128], strides = [1, 1, 1]} : vector<2x22x128xf32> to vector<2x16x128xf32>
    %c77 = arith.constant 77 : index
    %402 = memref.load %arg1[%c77] : memref<98xf32, #tpu.memory_space<smem>>
    %403 = vector.broadcast %402 : f32 to vector<2x16x128xf32>
    %404 = arith.mulf %401, %403 : vector<2x16x128xf32>
    %405 = arith.addf %400, %404 : vector<2x16x128xf32>
    %c78 = arith.constant 78 : index
    %406 = memref.load %arg1[%c78] : memref<98xf32, #tpu.memory_space<smem>>
    %c127_i32_73 = arith.constant 127 : i32
    %407 = tpu.dynamic_rotate %401 by %c127_i32_73 dim 2 : vector<2x16x128xf32>, i32 -> vector<2x16x128xf32>
    %408 = vector.broadcast %406 : f32 to vector<2x16x128xf32>
    %409 = arith.mulf %407, %408 : vector<2x16x128xf32>
    %410 = arith.addf %405, %409 : vector<2x16x128xf32>
    %c79 = arith.constant 79 : index
    %411 = memref.load %arg1[%c79] : memref<98xf32, #tpu.memory_space<smem>>
    %c126_i32_74 = arith.constant 126 : i32
    %412 = tpu.dynamic_rotate %401 by %c126_i32_74 dim 2 : vector<2x16x128xf32>, i32 -> vector<2x16x128xf32>
    %413 = vector.broadcast %411 : f32 to vector<2x16x128xf32>
    %414 = arith.mulf %412, %413 : vector<2x16x128xf32>
    %415 = arith.addf %410, %414 : vector<2x16x128xf32>
    %c80 = arith.constant 80 : index
    %416 = memref.load %arg1[%c80] : memref<98xf32, #tpu.memory_space<smem>>
    %c125_i32_75 = arith.constant 125 : i32
    %417 = tpu.dynamic_rotate %401 by %c125_i32_75 dim 2 : vector<2x16x128xf32>, i32 -> vector<2x16x128xf32>
    %418 = vector.broadcast %416 : f32 to vector<2x16x128xf32>
    %419 = arith.mulf %417, %418 : vector<2x16x128xf32>
    %420 = arith.addf %415, %419 : vector<2x16x128xf32>
    %c81 = arith.constant 81 : index
    %421 = memref.load %arg1[%c81] : memref<98xf32, #tpu.memory_space<smem>>
    %c124_i32_76 = arith.constant 124 : i32
    %422 = tpu.dynamic_rotate %401 by %c124_i32_76 dim 2 : vector<2x16x128xf32>, i32 -> vector<2x16x128xf32>
    %423 = vector.broadcast %421 : f32 to vector<2x16x128xf32>
    %424 = arith.mulf %422, %423 : vector<2x16x128xf32>
    %425 = arith.addf %420, %424 : vector<2x16x128xf32>
    %c82 = arith.constant 82 : index
    %426 = memref.load %arg1[%c82] : memref<98xf32, #tpu.memory_space<smem>>
    %c123_i32_77 = arith.constant 123 : i32
    %427 = tpu.dynamic_rotate %401 by %c123_i32_77 dim 2 : vector<2x16x128xf32>, i32 -> vector<2x16x128xf32>
    %428 = vector.broadcast %426 : f32 to vector<2x16x128xf32>
    %429 = arith.mulf %427, %428 : vector<2x16x128xf32>
    %430 = arith.addf %425, %429 : vector<2x16x128xf32>
    %c83 = arith.constant 83 : index
    %431 = memref.load %arg1[%c83] : memref<98xf32, #tpu.memory_space<smem>>
    %c122_i32_78 = arith.constant 122 : i32
    %432 = tpu.dynamic_rotate %401 by %c122_i32_78 dim 2 : vector<2x16x128xf32>, i32 -> vector<2x16x128xf32>
    %433 = vector.broadcast %431 : f32 to vector<2x16x128xf32>
    %434 = arith.mulf %432, %433 : vector<2x16x128xf32>
    %435 = arith.addf %430, %434 : vector<2x16x128xf32>
    %436 = vector.extract_strided_slice %14 {offsets = [0, 5, 0], sizes = [2, 16, 128], strides = [1, 1, 1]} : vector<2x22x128xf32> to vector<2x16x128xf32>
    %c84 = arith.constant 84 : index
    %437 = memref.load %arg1[%c84] : memref<98xf32, #tpu.memory_space<smem>>
    %438 = vector.broadcast %437 : f32 to vector<2x16x128xf32>
    %439 = arith.mulf %436, %438 : vector<2x16x128xf32>
    %440 = arith.addf %435, %439 : vector<2x16x128xf32>
    %c85 = arith.constant 85 : index
    %441 = memref.load %arg1[%c85] : memref<98xf32, #tpu.memory_space<smem>>
    %c127_i32_79 = arith.constant 127 : i32
    %442 = tpu.dynamic_rotate %436 by %c127_i32_79 dim 2 : vector<2x16x128xf32>, i32 -> vector<2x16x128xf32>
    %443 = vector.broadcast %441 : f32 to vector<2x16x128xf32>
    %444 = arith.mulf %442, %443 : vector<2x16x128xf32>
    %445 = arith.addf %440, %444 : vector<2x16x128xf32>
    %c86 = arith.constant 86 : index
    %446 = memref.load %arg1[%c86] : memref<98xf32, #tpu.memory_space<smem>>
    %c126_i32_80 = arith.constant 126 : i32
    %447 = tpu.dynamic_rotate %436 by %c126_i32_80 dim 2 : vector<2x16x128xf32>, i32 -> vector<2x16x128xf32>
    %448 = vector.broadcast %446 : f32 to vector<2x16x128xf32>
    %449 = arith.mulf %447, %448 : vector<2x16x128xf32>
    %450 = arith.addf %445, %449 : vector<2x16x128xf32>
    %c87 = arith.constant 87 : index
    %451 = memref.load %arg1[%c87] : memref<98xf32, #tpu.memory_space<smem>>
    %c125_i32_81 = arith.constant 125 : i32
    %452 = tpu.dynamic_rotate %436 by %c125_i32_81 dim 2 : vector<2x16x128xf32>, i32 -> vector<2x16x128xf32>
    %453 = vector.broadcast %451 : f32 to vector<2x16x128xf32>
    %454 = arith.mulf %452, %453 : vector<2x16x128xf32>
    %455 = arith.addf %450, %454 : vector<2x16x128xf32>
    %c88 = arith.constant 88 : index
    %456 = memref.load %arg1[%c88] : memref<98xf32, #tpu.memory_space<smem>>
    %c124_i32_82 = arith.constant 124 : i32
    %457 = tpu.dynamic_rotate %436 by %c124_i32_82 dim 2 : vector<2x16x128xf32>, i32 -> vector<2x16x128xf32>
    %458 = vector.broadcast %456 : f32 to vector<2x16x128xf32>
    %459 = arith.mulf %457, %458 : vector<2x16x128xf32>
    %460 = arith.addf %455, %459 : vector<2x16x128xf32>
    %c89 = arith.constant 89 : index
    %461 = memref.load %arg1[%c89] : memref<98xf32, #tpu.memory_space<smem>>
    %c123_i32_83 = arith.constant 123 : i32
    %462 = tpu.dynamic_rotate %436 by %c123_i32_83 dim 2 : vector<2x16x128xf32>, i32 -> vector<2x16x128xf32>
    %463 = vector.broadcast %461 : f32 to vector<2x16x128xf32>
    %464 = arith.mulf %462, %463 : vector<2x16x128xf32>
    %465 = arith.addf %460, %464 : vector<2x16x128xf32>
    %c90 = arith.constant 90 : index
    %466 = memref.load %arg1[%c90] : memref<98xf32, #tpu.memory_space<smem>>
    %c122_i32_84 = arith.constant 122 : i32
    %467 = tpu.dynamic_rotate %436 by %c122_i32_84 dim 2 : vector<2x16x128xf32>, i32 -> vector<2x16x128xf32>
    %468 = vector.broadcast %466 : f32 to vector<2x16x128xf32>
    %469 = arith.mulf %467, %468 : vector<2x16x128xf32>
    %470 = arith.addf %465, %469 : vector<2x16x128xf32>
    %471 = vector.extract_strided_slice %14 {offsets = [0, 6, 0], sizes = [2, 16, 128], strides = [1, 1, 1]} : vector<2x22x128xf32> to vector<2x16x128xf32>
    %c91 = arith.constant 91 : index
    %472 = memref.load %arg1[%c91] : memref<98xf32, #tpu.memory_space<smem>>
    %473 = vector.broadcast %472 : f32 to vector<2x16x128xf32>
    %474 = arith.mulf %471, %473 : vector<2x16x128xf32>
    %475 = arith.addf %470, %474 : vector<2x16x128xf32>
    %c92 = arith.constant 92 : index
    %476 = memref.load %arg1[%c92] : memref<98xf32, #tpu.memory_space<smem>>
    %c127_i32_85 = arith.constant 127 : i32
    %477 = tpu.dynamic_rotate %471 by %c127_i32_85 dim 2 : vector<2x16x128xf32>, i32 -> vector<2x16x128xf32>
    %478 = vector.broadcast %476 : f32 to vector<2x16x128xf32>
    %479 = arith.mulf %477, %478 : vector<2x16x128xf32>
    %480 = arith.addf %475, %479 : vector<2x16x128xf32>
    %c93 = arith.constant 93 : index
    %481 = memref.load %arg1[%c93] : memref<98xf32, #tpu.memory_space<smem>>
    %c126_i32_86 = arith.constant 126 : i32
    %482 = tpu.dynamic_rotate %471 by %c126_i32_86 dim 2 : vector<2x16x128xf32>, i32 -> vector<2x16x128xf32>
    %483 = vector.broadcast %481 : f32 to vector<2x16x128xf32>
    %484 = arith.mulf %482, %483 : vector<2x16x128xf32>
    %485 = arith.addf %480, %484 : vector<2x16x128xf32>
    %c94 = arith.constant 94 : index
    %486 = memref.load %arg1[%c94] : memref<98xf32, #tpu.memory_space<smem>>
    %c125_i32_87 = arith.constant 125 : i32
    %487 = tpu.dynamic_rotate %471 by %c125_i32_87 dim 2 : vector<2x16x128xf32>, i32 -> vector<2x16x128xf32>
    %488 = vector.broadcast %486 : f32 to vector<2x16x128xf32>
    %489 = arith.mulf %487, %488 : vector<2x16x128xf32>
    %490 = arith.addf %485, %489 : vector<2x16x128xf32>
    %c95 = arith.constant 95 : index
    %491 = memref.load %arg1[%c95] : memref<98xf32, #tpu.memory_space<smem>>
    %c124_i32_88 = arith.constant 124 : i32
    %492 = tpu.dynamic_rotate %471 by %c124_i32_88 dim 2 : vector<2x16x128xf32>, i32 -> vector<2x16x128xf32>
    %493 = vector.broadcast %491 : f32 to vector<2x16x128xf32>
    %494 = arith.mulf %492, %493 : vector<2x16x128xf32>
    %495 = arith.addf %490, %494 : vector<2x16x128xf32>
    %c96 = arith.constant 96 : index
    %496 = memref.load %arg1[%c96] : memref<98xf32, #tpu.memory_space<smem>>
    %c123_i32_89 = arith.constant 123 : i32
    %497 = tpu.dynamic_rotate %471 by %c123_i32_89 dim 2 : vector<2x16x128xf32>, i32 -> vector<2x16x128xf32>
    %498 = vector.broadcast %496 : f32 to vector<2x16x128xf32>
    %499 = arith.mulf %497, %498 : vector<2x16x128xf32>
    %500 = arith.addf %495, %499 : vector<2x16x128xf32>
    %c97 = arith.constant 97 : index
    %501 = memref.load %arg1[%c97] : memref<98xf32, #tpu.memory_space<smem>>
    %c122_i32_90 = arith.constant 122 : i32
    %502 = tpu.dynamic_rotate %471 by %c122_i32_90 dim 2 : vector<2x16x128xf32>, i32 -> vector<2x16x128xf32>
    %503 = vector.broadcast %501 : f32 to vector<2x16x128xf32>
    %504 = arith.mulf %502, %503 : vector<2x16x128xf32>
    %505 = arith.addf %500, %504 : vector<2x16x128xf32>
    %c0_91 = arith.constant 0 : index
    %506 = memref.load %arg2[%c0_91] : memref<1xf32, #tpu.memory_space<smem>>
    %507 = vector.broadcast %506 : f32 to vector<2x16x128xf32>
    %508 = arith.addf %505, %507 : vector<2x16x128xf32>
    %509 = arith.negf %508 : vector<2x16x128xf32>
    %510 = math.exp %509 : vector<2x16x128xf32>
    %cst_92 = arith.constant 1.000000e+00 : f32
    %511 = vector.broadcast %cst_92 : f32 to vector<2x16x128xf32>
    %512 = arith.addf %511, %510 : vector<2x16x128xf32>
    %513 = arith.divf %511, %512 : vector<2x16x128xf32>
    %514 = vector.extract_strided_slice %513 {offsets = [0, 0, 0], sizes = [2, 16, 16], strides = [1, 1, 1]} : vector<2x16x128xf32> to vector<2x16x16xf32>
    %515 = vector.shape_cast %514 : vector<2x16x16xf32> to vector<1x2x16x16xf32>
    %cst_93 = arith.constant dense<0x7F800000> : vector<1xf32>
    %516 = vector.multi_reduction <minimumf>, %515, %cst_93 [1, 2, 3] : vector<1x2x16x16xf32> to vector<1xf32>
    %517 = vector.shape_cast %516 : vector<1xf32> to vector<1x1x1x1xf32>
    %518 = vector.extract %517[0, 0, 0, 0] : f32 from vector<1x1x1x1xf32>
    %519 = vector.shape_cast %514 : vector<2x16x16xf32> to vector<1x2x16x16xf32>
    %cst_94 = arith.constant dense<0xFF800000> : vector<1xf32>
    %520 = vector.multi_reduction <maximumf>, %519, %cst_94 [1, 2, 3] : vector<1x2x16x16xf32> to vector<1xf32>
    %521 = vector.shape_cast %520 : vector<1xf32> to vector<1x1x1x1xf32>
    %522 = vector.extract %521[0, 0, 0, 0] : f32 from vector<1x1x1x1xf32>
    %523 = arith.subf %522, %518 : f32
    %cst_95 = arith.constant 7.500000e-01 : f32
    %524 = arith.mulf %cst_95, %523 : f32
    %525 = arith.addf %518, %524 : f32
    %526 = vector.broadcast %525 : f32 to vector<2x16x128xf32>
    %527 = arith.cmpf olt, %513, %526 : vector<2x16x128xf32>
    %cst_96 = arith.constant 0.000000e+00 : f32
    %528 = vector.broadcast %cst_96 : f32 to vector<2x16x128xf32>
    %529 = arith.select %527, %528, %513 : vector<2x16x128xi1>, vector<2x16x128xf32>
    %c0_97 = arith.constant 0 : index
    %c0_98 = arith.constant 0 : index
    %c0_99 = arith.constant 0 : index
    %530 = vector.load %arg3[%c0_97, %c0_98, %c0_99] : memref<2x16x128xf32, #tpu.memory_space<vmem>>, vector<2x16x128xf32>
    tpu.vector_store %arg3[%c0_97, %c0_98, %c0_99], %529 {strides = array<i32>} : memref<2x16x128xf32, #tpu.memory_space<vmem>>, vector<2x16x128xf32>,
    return
  }
}

</mosaic_0001>

<bundles_post_ra>
// kernel: tpu_custom_call.1
= control target key start
LH: loop header
LB: loop body
LE: loop exit
PB: predicated region body
PF: predicated region fallthrough
CT: control target
= control target key end

     0   :  { %9 = vsyncpa [#allocation5], 0  ;;  %s7328_s0 = inlined_call_operand.vmem [shape: f32[2,16,16,8], index: 0, kind: input, shape index: {}]   ;;  %s7329_s1 = inlined_call_operand.vmem [shape: f32[98], index: 1, kind: input, shape index: {}]   ;;  %s7330_s2 = inlined_call_operand.<no memory space> [shape: f32[1], index: 2, kind: input, shape index: {}]   ;;  %s7331_s3 = inlined_call_operand.hbm [shape: f32[2,16,128], index: 3, kind: output, shape index: {}]  }
   0x1   :  { %10 = vsyncpa [#allocation4], 0  ;;  %s19_s14 = sshll.u32 %s7329_s1, 4  ;;  %s20_s14 = int_to_ptr.vmem [resolvable:$true] %s19_s14 }
   0x2   :  { %s3706_s15 = scalar_lea.vmem %s20_s14, 16  ;;  %p3711_p1 = scmp.lt.s32.totalorder %s20_s14, %s20_s14 }
   0x3   :  { %p3707_p0 = scmp.ne.s32.totalorder %s20_s14, %s3706_s15  ;;  %p3712_p2 = scmp.lt.s32.totalorder %s3706_s15, %s3706_s15 }
   0x5   :  { %p3713_p3 = por %p3712_p2, %p3711_p1 }
   0x7   :  { %p3714_p4 = pnand %p3713_p3, %p3707_p0 }
   0x9   :  { %3717 = shalt.err (!%p3714_p4)
}
   0xa   :  { %s3742_s16 = smov [#allocation3]  }
   0xb   :  { %22 = dma.vmem_to_smem %s20_s14, 16, %s3742_s16, [#allocation5]  }
   0xc   :  { %3738 = dma.done.wait [#allocation5], 16  }
   0xd   :  { %3739 = vsyncadd [#allocation5], 4294967280 }
   0xe   :  { %28 = sfence }
   0xf   :  { %v3778_v0 = vld [vmem:[%s7328_s0 + $0x10] sm:$0xff]  ;;  %vm93_vm0 = vcmask 64512   ;;  %v3783_v1 = vld [vmem:[%s7328_s0] sm:$0xff]  ;;  %v3788_v2 = vld [vmem:[%s7328_s0 + $0x18] sm:$0xff]  ;;  %vm619_vm1 = vcmask 154712   ;;  %vm900_vm2 = vcmask 1041409  }
  0x10   :  { %v100_v3 = vsel %vm93_vm0, %v3778_v0, -inf  ;;  %v94_v4 = vsel %vm93_vm0, %v3783_v1, -inf  ;;  %v3797_v5 = vld [vmem:[%s7328_s0 + $0x8] sm:$0xff]  ;;  %v103_v6 = vsel %vm93_vm0, %v3788_v2, -inf  ;;  %v3811_v9 = vld [vmem:[%s7328_s0 + $0x20] sm:$0xff]  ;;  %v3820_v12 = vld [vmem:[%s7328_s0 + $0x38] sm:$0xff] }
  0x11   :  { %101 = vmax.xlane.f32.xlu1 %v100_v3  ;;  %95 = vmax.xlane.f32.xlu0 %v94_v4  ;;  %v97_v7 = vsel %vm93_vm0, %v3797_v5, -inf  ;;  %v3806_v8 = vld [vmem:[%s7328_s0 + $0x28] sm:$0xff]  ;;  %v106_v11 = vsel %vm93_vm0, %v3811_v9, -inf  ;;  %v3825_v13 = vld [vmem:[%s7328_s0 + $0x30] sm:$0xff]  ;;  %v115_v14 = vsel %vm93_vm0, %v3820_v12, -inf  ;;  %v3839_v17 = vld [vmem:[%s7328_s0 + $0x40] sm:$0xff] }
  0x12   :  { %v109_v10 = vsel %vm93_vm0, %v3806_v8, -inf  ;;  %v112_v15 = vsel %vm93_vm0, %v3825_v13, -inf  ;;  %v3834_v16 = vld [vmem:[%s7328_s0 + $0x48] sm:$0xff]  ;;  %v118_v19 = vsel %vm93_vm0, %v3839_v17, -inf  ;;  %v3848_v20 = vld [vmem:[%s7328_s0 + $0x58] sm:$0xff]  ;;  %v3853_v21 = vld [vmem:[%s7328_s0 + $0x50] sm:$0xff] }
  0x13   :  { %v121_v18 = vsel %vm93_vm0, %v3834_v16, -inf  ;;  %v127_v22 = vsel %vm93_vm0, %v3848_v20, -inf  ;;  %v124_v23 = vsel %vm93_vm0, %v3853_v21, -inf  ;;  %v3862_v24 = vld [vmem:[%s7328_s0 + $0x68] sm:$0xff]  ;;  %v3867_v25 = vld [vmem:[%s7328_s0 + $0x60] sm:$0xff]  ;;  %v3876_v28 = vld [vmem:[%s7328_s0 + $0x78] sm:$0xff] }
  0x14   :  { %v133_v26 = vsel %vm93_vm0, %v3862_v24, -inf  ;;  %v130_v27 = vsel %vm93_vm0, %v3867_v25, -inf  ;;  %v3881_v29 = vld [vmem:[%s7328_s0 + $0x70] sm:$0xff]  ;;  %v139_v30 = vsel %vm93_vm0, %v3876_v28, -inf  ;;  %v3890_v32 = vld [vmem:[%s7328_s0 + $0x88] sm:$0xff]  ;;  %v3895_v33 = vld [vmem:[%s7328_s0 + $0x80] sm:$0xff] }
  0x15   :  { %104 = vmax.xlane.f32.xlu1 %v103_v6  ;;  %98 = vmax.xlane.f32.xlu0 %v97_v7  ;;  %v136_v31 = vsel %vm93_vm0, %v3881_v29, -inf  ;;  %v145_v34 = vsel %vm93_vm0, %v3890_v32, -inf  ;;  %v142_v35 = vsel %vm93_vm0, %v3895_v33, -inf  ;;  %v3904_v36 = vld [vmem:[%s7328_s0 + $0x98] sm:$0xff]  ;;  %v3909_v37 = vld [vmem:[%s7328_s0 + $0x90] sm:$0xff]  ;;  %v3918_v40 = vld [vmem:[%s7328_s0 + $0xa8] sm:$0xff] }
  0x16   :  { %v151_v38 = vsel %vm93_vm0, %v3904_v36, -inf  ;;  %v148_v39 = vsel %vm93_vm0, %v3909_v37, -inf  ;;  %v3923_v41 = vld [vmem:[%s7328_s0 + $0xa0] sm:$0xff]  ;;  %v157_v42 = vsel %vm93_vm0, %v3918_v40, -inf  ;;  %v3932_v44 = vld [vmem:[%s7328_s0 + $0xb8] sm:$0xff]  ;;  %v3937_v45 = vld [vmem:[%s7328_s0 + $0xb0] sm:$0xff] }
  0x17   :  { %v154_v43 = vsel %vm93_vm0, %v3923_v41, -inf  ;;  %v163_v46 = vsel %vm93_vm0, %v3932_v44, -inf  ;;  %v160_v47 = vsel %vm93_vm0, %v3937_v45, -inf  ;;  %v3946_v48 = vld [vmem:[%s7328_s0 + $0xc8] sm:$0xff]  ;;  %v3951_v49 = vld [vmem:[%s7328_s0 + $0xc0] sm:$0xff]  ;;  %v3960_v52 = vld [vmem:[%s7328_s0 + $0xd8] sm:$0xff] }
  0x18   :  { %v169_v50 = vsel %vm93_vm0, %v3946_v48, -inf  ;;  %v166_v51 = vsel %vm93_vm0, %v3951_v49, -inf  ;;  %v3965_v53 = vld [vmem:[%s7328_s0 + $0xd0] sm:$0xff]  ;;  %v175_v54 = vsel %vm93_vm0, %v3960_v52, -inf  ;;  %v3974_v56 = vld [vmem:[%s7328_s0 + $0xe8] sm:$0xff]  ;;  %v3979_v57 = vld [vmem:[%s7328_s0 + $0xe0] sm:$0xff] }
  0x19   :  { %110 = vmax.xlane.f32.xlu1 %v109_v10  ;;  %107 = vmax.xlane.f32.xlu0 %v106_v11  ;;  %v172_v55 = vsel %vm93_vm0, %v3965_v53, -inf  ;;  %v181_v58 = vsel %vm93_vm0, %v3974_v56, -inf  ;;  %v178_v59 = vsel %vm93_vm0, %v3979_v57, -inf  ;;  %v3988_v60 = vld [vmem:[%s7328_s0 + $0xf8] sm:$0xff]  ;;  %v3993_v61 = vld [vmem:[%s7328_s0 + $0xf0] sm:$0xff]  ;;  %v4002_v3 = vld [vmem:[%s7328_s0 + $0x108] sm:$0xff] }
  0x1a   :  { %v187_v62 = vsel %vm93_vm0, %v3988_v60, -inf  ;;  %v184_v63 = vsel %vm93_vm0, %v3993_v61, -inf  ;;  %v4007_v4 = vld [vmem:[%s7328_s0 + $0x100] sm:$0xff]  ;;  %v193_v6 = vsel %vm93_vm0, %v4002_v3, -inf  ;;  %v4016_v10 = vld [vmem:[%s7328_s0 + $0x118] sm:$0xff]  ;;  %v4021_v11 = vld [vmem:[%s7328_s0 + $0x110] sm:$0xff] }
  0x1b   :  { %v190_v7 = vsel %vm93_vm0, %v4007_v4, -inf  ;;  %vm902_vm3 = vcmask 1042434   ;;  %vm904_vm4 = vcmask 1043459   ;;  %vm906_vm5 = vcmask 1044484   ;;  %s4550_s5 = sld [smem:[#allocation3 + $0xe]]  ;;  %s3743_s9 = smov 127  }
  0x1c   :  { %vm908_vm6 = vcmask 1045509   ;;  %vm910_vm7 = vcmask 1046534   ;;  %vm912_vm8 = vcmask 1047559   ;;  %vm939_vm9 = vcmask 23552   ;;  %s3595_s6 = sld [smem:[#allocation3 + $0x15]]  ;;  %s3744_s10 = smov 126  }
  0x1d   :  { %116 = vmax.xlane.f32.xlu1 %v115_v14  ;;  %113 = vmax.xlane.f32.xlu0 %v112_v15  ;;  %v199_v14 = vsel %vm93_vm0, %v4016_v10, -inf  ;;  %v196_v15 = vsel %vm93_vm0, %v4021_v11, -inf  ;;  %vm944_vm10 = vcmask 154624   ;;  %vm953_vm11 = vcmask 1042432   ;;  %s3602_s7 = sld [smem:[#allocation3 + $0x1c]]  ;;  %s3745_s12 = smov 125  }
  0x1e   :  { %s3609_s8 = sld [smem:[#allocation3 + $0x23]]  ;;  %vm1514_vm12 = vcmask 1046528   ;;  %vm1673_vm13 = vcmask 1045504   ;;  %vm1828_vm14 = vcmask 1044480   ;;  %vm1983_vm15 = vcmask 1043456   ;;  %s3746_s13 = smov 124  }
  0x1f   :  { %s3616_s11 = sld [smem:[#allocation3 + $0x2a]]  ;;  %s3747_s14 = smov 123  }
  0x20   :  { %s3748_s15 = smov 122   ;;  %s3575_s16 = sld [smem:[#allocation3 + $0x1]] }
  0x21   :  { %122 = vmax.xlane.f32.xlu1 %v121_v18  ;;  %119 = vmax.xlane.f32.xlu0 %v118_v19  ;;  %v4030_v18 = vld [vmem:[%s7328_s0 + $0x128] sm:$0xff]  ;;  %v4035_v19 = vld [vmem:[%s7328_s0 + $0x120] sm:$0xff]  ;;  %s1382_s17 = sld [smem:[#allocation3]] }
  0x22   :  { %s3576_s18 = sld [smem:[#allocation3 + $0x2]] }
  0x23   :  { %s3577_s1 = sld [smem:[#allocation3 + $0x3]] }
  0x24   :  { %s3578_s19 = sld [smem:[#allocation3 + $0x4]] }
  0x25   :  { %128 = vmax.xlane.f32.xlu1 %v127_v22  ;;  %125 = vmax.xlane.f32.xlu0 %v124_v23  ;;  %v205_v22 = vsel %vm93_vm0, %v4030_v18, -inf  ;;  %v202_v23 = vsel %vm93_vm0, %v4035_v19, -inf  ;;  %s3579_s20 = sld [smem:[#allocation3 + $0x5]] }
  0x26   :  { %s3580_s21 = sld [smem:[#allocation3 + $0x6]] }
  0x27   :  { %s3582_s22 = sld [smem:[#allocation3 + $0x8]] }
  0x28   :  { %s3583_s23 = sld [smem:[#allocation3 + $0x9]] }
  0x29   :  { %134 = vmax.xlane.f32.xlu1 %v133_v26  ;;  %131 = vmax.xlane.f32.xlu0 %v130_v27  ;;  %v4044_v26 = vld [vmem:[%s7328_s0 + $0x138] sm:$0xff]  ;;  %v4049_v27 = vld [vmem:[%s7328_s0 + $0x130] sm:$0xff]  ;;  %s3584_s24 = sld [smem:[#allocation3 + $0xa]] }
  0x2a   :  { %s3585_s25 = sld [smem:[#allocation3 + $0xb]] }
  0x2b   :  { %s3586_s26 = sld [smem:[#allocation3 + $0xc]] }
  0x2c   :  { %s3587_s27 = sld [smem:[#allocation3 + $0xd]] }
  0x2d   :  { %140 = vmax.xlane.f32.xlu1 %v139_v30  ;;  %137 = vmax.xlane.f32.xlu0 %v136_v31  ;;  %v211_v30 = vsel %vm93_vm0, %v4044_v26, -inf  ;;  %v208_v31 = vsel %vm93_vm0, %v4049_v27, -inf  ;;  %s3589_s28 = sld [smem:[#allocation3 + $0xf]] }
  0x2e   :  { %s3590_s29 = sld [smem:[#allocation3 + $0x10]] }
  0x2f   :  { %s3591_s30 = sld [smem:[#allocation3 + $0x11]] }
  0x30   :  { %s3592_s4 = sld [smem:[#allocation3 + $0x12]] }
  0x31   :  { %146 = vmax.xlane.f32.xlu1 %v145_v34  ;;  %143 = vmax.xlane.f32.xlu0 %v142_v35  ;;  %v4058_v34 = vld [vmem:[%s7328_s0 + $0x148] sm:$0xff]  ;;  %v4063_v35 = vld [vmem:[%s7328_s0 + $0x140] sm:$0xff] }
  0x35   :  { %152 = vmax.xlane.f32.xlu1 %v151_v38  ;;  %149 = vmax.xlane.f32.xlu0 %v148_v39  ;;  %v217_v38 = vsel %vm93_vm0, %v4058_v34, -inf  ;;  %v214_v39 = vsel %vm93_vm0, %v4063_v35, -inf }
  0x39   :  { %158 = vmax.xlane.f32.xlu1 %v157_v42  ;;  %155 = vmax.xlane.f32.xlu0 %v154_v43  ;;  %v4072_v42 = vld [vmem:[%s7328_s0 + $0x158] sm:$0xff]  ;;  %v4077_v43 = vld [vmem:[%s7328_s0 + $0x150] sm:$0xff] }
  0x3d   :  { %164 = vmax.xlane.f32.xlu1 %v163_v46  ;;  %161 = vmax.xlane.f32.xlu0 %v160_v47  ;;  %v223_v46 = vsel %vm93_vm0, %v4072_v42, -inf  ;;  %v220_v47 = vsel %vm93_vm0, %v4077_v43, -inf }
  0x41   :  { %170 = vmax.xlane.f32.xlu1 %v169_v50  ;;  %167 = vmax.xlane.f32.xlu0 %v166_v51  ;;  %v4086_v50 = vld [vmem:[%s7328_s0 + $0x168] sm:$0xff]  ;;  %v4091_v51 = vld [vmem:[%s7328_s0 + $0x160] sm:$0xff] }
  0x45   :  { %176 = vmax.xlane.f32.xlu1 %v175_v54  ;;  %173 = vmax.xlane.f32.xlu0 %v172_v55  ;;  %v229_v54 = vsel %vm93_vm0, %v4086_v50, -inf  ;;  %v226_v55 = vsel %vm93_vm0, %v4091_v51, -inf }
  0x49   :  { %182 = vmax.xlane.f32.xlu1 %v181_v58  ;;  %179 = vmax.xlane.f32.xlu0 %v178_v59  ;;  %v4100_v58 = vld [vmem:[%s7328_s0 + $0x178] sm:$0xff]  ;;  %v4105_v59 = vld [vmem:[%s7328_s0 + $0x170] sm:$0xff] }
  0x4d   :  { %188 = vmax.xlane.f32.xlu1 %v187_v62  ;;  %185 = vmax.xlane.f32.xlu0 %v184_v63  ;;  %v235_v62 = vsel %vm93_vm0, %v4100_v58, -inf  ;;  %v232_v63 = vsel %vm93_vm0, %v4105_v59, -inf }
  0x51   :  { %194 = vmax.xlane.f32.xlu1 %v193_v6  ;;  %191 = vmax.xlane.f32.xlu0 %v190_v7  ;;  %v4114_v6 = vld [vmem:[%s7328_s0 + $0x188] sm:$0xff]  ;;  %v4119_v7 = vld [vmem:[%s7328_s0 + $0x180] sm:$0xff] }
  0x55   :  { %200 = vmax.xlane.f32.xlu1 %v199_v14  ;;  %197 = vmax.xlane.f32.xlu0 %v196_v15  ;;  %v241_v14 = vsel %vm93_vm0, %v4114_v6, -inf  ;;  %v238_v15 = vsel %vm93_vm0, %v4119_v7, -inf }
  0x59   :  { %206 = vmax.xlane.f32.xlu1 %v205_v22  ;;  %203 = vmax.xlane.f32.xlu0 %v202_v23  ;;  %v4128_v22 = vld [vmem:[%s7328_s0 + $0x198] sm:$0xff]  ;;  %v4133_v23 = vld [vmem:[%s7328_s0 + $0x190] sm:$0xff] }
  0x5d   :  { %212 = vmax.xlane.f32.xlu1 %v211_v30  ;;  %209 = vmax.xlane.f32.xlu0 %v208_v31  ;;  %v247_v30 = vsel %vm93_vm0, %v4128_v22, -inf  ;;  %v244_v31 = vsel %vm93_vm0, %v4133_v23, -inf }
  0x61   :  { %218 = vmax.xlane.f32.xlu1 %v217_v38  ;;  %215 = vmax.xlane.f32.xlu0 %v214_v39  ;;  %v4142_v38 = vld [vmem:[%s7328_s0 + $0x1a8] sm:$0xff]  ;;  %v4147_v39 = vld [vmem:[%s7328_s0 + $0x1a0] sm:$0xff] }
  0x65   :  { %224 = vmax.xlane.f32.xlu1 %v223_v46  ;;  %221 = vmax.xlane.f32.xlu0 %v220_v47  ;;  %v253_v46 = vsel %vm93_vm0, %v4142_v38, -inf  ;;  %v250_v47 = vsel %vm93_vm0, %v4147_v39, -inf }
  0x69   :  { %230 = vmax.xlane.f32.xlu1 %v229_v54  ;;  %227 = vmax.xlane.f32.xlu0 %v226_v55  ;;  %v4156_v54 = vld [vmem:[%s7328_s0 + $0x1b8] sm:$0xff]  ;;  %v4161_v55 = vld [vmem:[%s7328_s0 + $0x1b0] sm:$0xff] }
  0x6a   :  { %7453 = vst [vmem:[#allocation9_spill] sm:$0xff] %v4161_v55 }
  0x6d   :  { %236 = vmax.xlane.f32.xlu1 %v235_v62  ;;  %233 = vmax.xlane.f32.xlu0 %v232_v63  ;;  %v259_v62 = vsel %vm93_vm0, %v4156_v54, -inf  ;;  %v256_v63 = vsel %vm93_vm0, %v4161_v55, -inf  ;;  %v607_v55 = vlaneseq }
  0x71   :  { %242 = vmax.xlane.f32.xlu1 %v241_v14  ;;  %239 = vmax.xlane.f32.xlu0 %v238_v15  ;;  %v4170_v14 = vld [vmem:[%s7328_s0 + $0x1c8] sm:$0xff]  ;;  %v4175_v15 = vld [vmem:[%s7328_s0 + $0x1c0] sm:$0xff] }
  0x72   :  { %7454 = vst [vmem:[#allocation10_spill] sm:$0xff] %v4170_v14  ;;  %7455 = vst [vmem:[#allocation11_spill] sm:$0xff] %v4175_v15 }
  0x75   :  { %248 = vmax.xlane.f32.xlu1 %v247_v30  ;;  %245 = vmax.xlane.f32.xlu0 %v244_v31  ;;  %v265_v30 = vsel %vm93_vm0, %v4170_v14, -inf  ;;  %v262_v31 = vsel %vm93_vm0, %v4175_v15, -inf  ;;  %v4198_v15 = vld [vmem:[%s7328_s0 + $0x1e8] sm:$0xff]  ;;  %v4203_v14 = vld [vmem:[%s7328_s0 + $0x1e0] sm:$0xff] }
  0x76   :  { %7458 = vst [vmem:[#allocation14_spill] sm:$0xff] %v4198_v15  ;;  %7459 = vst [vmem:[#allocation15_spill] sm:$0xff] %v4203_v14 }
  0x79   :  { %254 = vmax.xlane.f32.xlu1 %v253_v46  ;;  %251 = vmax.xlane.f32.xlu0 %v250_v47  ;;  %v4184_v46 = vld [vmem:[%s7328_s0 + $0x1d8] sm:$0xff]  ;;  %v4189_v47 = vld [vmem:[%s7328_s0 + $0x1d0] sm:$0xff] }
  0x7a   :  { %7456 = vst [vmem:[#allocation12_spill] sm:$0xff] %v4184_v46  ;;  %7457 = vst [vmem:[#allocation13_spill] sm:$0xff] %v4189_v47 }
  0x7d   :  { %260 = vmax.xlane.f32.xlu1 %v259_v62  ;;  %257 = vmax.xlane.f32.xlu0 %v256_v63  ;;  %v271_v62 = vsel %vm93_vm0, %v4184_v46, -inf  ;;  %v268_v63 = vsel %vm93_vm0, %v4189_v47, -inf  ;;  %v4212_v47 = vld [vmem:[%s7328_s0 + $0x1f8] sm:$0xff]  ;;  %v4217_v46 = vld [vmem:[%s7328_s0 + $0x1f0] sm:$0xff]  ;;  %s4546_s0 = sld [smem:[#allocation3 + $0x7]] }
  0x7e   :  { %7460 = vst [vmem:[#allocation16_spill] sm:$0xff] %v4212_v47  ;;  %7461 = vst [vmem:[#allocation17_spill] sm:$0xff] %v4217_v46 }
  0x81   :  { %266 = vmax.xlane.f32.xlu1 %v265_v30  ;;  %263 = vmax.xlane.f32.xlu0 %v262_v31  ;;  %v277_v30 = vsel %vm93_vm0, %v4198_v15, -inf  ;;  %v274_v31 = vsel %vm93_vm0, %v4203_v14, -inf  ;;  %v289_v14 = vsel %vm93_vm0, %v3797_v5, 0.0  ;;  %v286_v15 = vsel %vm93_vm0, %v3783_v1, 0.0 }
  0x82   :  { %v298_v5 = vsel %vm93_vm0, %v3811_v9, 0.0  ;;  %v611_v1 = vshrl.u32 %v607_v55, 7 }
  0x85   :  { %272 = vmax.xlane.f32.xlu1 %v271_v62  ;;  %269 = vmax.xlane.f32.xlu0 %v268_v63  ;;  %v283_v62 = vsel %vm93_vm0, %v4212_v47, -inf  ;;  %v280_v63 = vsel %vm93_vm0, %v4217_v46, -inf  ;;  %v608_v47 = vand.u32 127, %v607_v55 }
  0x87   :  { %v614_v46 = vadd.s32 4294967285, %v608_v47 }
  0x89   :  { %278 = vmax.xlane.f32.xlu1 %v277_v30  ;;  %275 = vmax.xlane.f32.xlu0 %v274_v31  ;;  %v295_v30 = vsel %vm93_vm0, %v3788_v2, 0.0  ;;  %v292_v31 = vsel %vm93_vm0, %v3778_v0, 0.0  ;;  %v307_v2 = vsel %vm93_vm0, %v3820_v12, 0.0  ;;  %v304_v0 = vsel %vm93_vm0, %v3825_v13, 0.0 }
  0x8a   :  { %v310_v12 = vsel %vm93_vm0, %v3839_v17, 0.0  ;;  %v319_v17 = vsel %vm93_vm0, %v3848_v20, 0.0  ;;  %v322_v20 = vsel %vm93_vm0, %v3867_v25, 0.0 }
  0x8d   :  { %284 = vmax.xlane.f32.xlu1 %v283_v62  ;;  %281 = vmax.xlane.f32.xlu0 %v280_v63  ;;  %v301_v62 = vsel %vm93_vm0, %v3806_v8, 0.0  ;;  %v609_v63 = vadd.s32 4294967293, %v608_v47  ;;  %v313_v47 = vsel %vm93_vm0, %v3834_v16, 0.0 }
  0x91   :  { %290 = vadd.xlane.f32.xlu1 %v289_v14  ;;  %287 = vadd.xlane.f32.xlu0 %v286_v15 }
  0x95   :  { %296 = vadd.xlane.f32.xlu1 %v295_v30  ;;  %293 = vadd.xlane.f32.xlu0 %v292_v31  ;;  %v4239_v30 = vsub.s32 %v609_v63, %v611_v1  ;;  %v4241_v31 = vsub.s32 %v614_v46, %v611_v1 }
  0x99   :  { %302 = vadd.xlane.f32.xlu1 %v301_v62  ;;  %299 = vadd.xlane.f32.xlu0 %v298_v5 }
  0x9a   :  { %v102_v14 = vpop.xlane.xlu1 %101  ;;  %v96_v15 = vpop.xlane.xlu0 %95 }
  0x9b   :  { %v613_v8 = vrot.slane %v96_v15, %v4239_v30  ;;  %v624_v62 = vrot.slane %v102_v14, %v4239_v30  ;;  %v316_v14 = vsel %vm93_vm0, %v3853_v21, 0.0 }
  0x9d   :  { %308 = vadd.xlane.f32.xlu1 %v307_v2  ;;  %305 = vadd.xlane.f32.xlu0 %v304_v0 }
  0x9e   :  { %v105_v9 = vpop.xlane.xlu1 %104  ;;  %v99_v55 = vpop.xlane.xlu0 %98 }
  0x9f   :  { %v628_v13 = vrot.slane %v105_v9, %v4241_v31  ;;  %v618_v46 = vrot.slane %v99_v55, %v4241_v31 }
  0xa1   :  { %v629_v5 = vsel %vm619_vm1, %v628_v13, %v624_v62  ;;  %v620_v63 = vsel %vm619_vm1, %v618_v46, %v613_v8  ;;  %314 = vadd.xlane.f32.xlu1 %v313_v47  ;;  %311 = vadd.xlane.f32.xlu0 %v310_v12  ;;  %v325_v12 = vsel %vm93_vm0, %v3862_v24, 0.0  ;;  %v328_v24 = vsel %vm93_vm0, %v3881_v29, 0.0 }
  0xa2   :  { %v901_v1 = vsel %vm900_vm2, %v629_v5, %v620_v63  ;;  %v111_v15 = vpop.xlane.xlu1 %110  ;;  %v108_v16 = vpop.xlane.xlu0 %107 }
  0xa3   :  { %v637_v2 = vrot.slane %v111_v15, %v4241_v31  ;;  %v633_v0 = vrot.slane %v108_v16, %v4239_v30 }
  0xa5   :  { %v638_v9 = vsel %vm619_vm1, %v637_v2, %v633_v0  ;;  %320 = vadd.xlane.f32.xlu1 %v319_v17  ;;  %317 = vadd.xlane.f32.xlu0 %v316_v14  ;;  %v337_v0 = vsel %vm93_vm0, %v3890_v32, 0.0  ;;  %v340_v32 = vsel %vm93_vm0, %v3909_v37, 0.0 }
  0xa6   :  { %v903_v8 = vsel %vm902_vm3, %v638_v9, %v901_v1  ;;  %v117_v55 = vpop.xlane.xlu1 %116  ;;  %v114_v47 = vpop.xlane.xlu0 %113  ;;  %v331_v1 = vsel %vm93_vm0, %v3876_v28, 0.0  ;;  %v334_v28 = vsel %vm93_vm0, %v3895_v33, 0.0 }
  0xa7   :  { %v646_v21 = vrot.slane %v117_v55, %v4241_v31  ;;  %v642_v62 = vrot.slane %v114_v47, %v4239_v30 }
  0xa9   :  { %v647_v13 = vsel %vm619_vm1, %v646_v21, %v642_v62  ;;  %326 = vadd.xlane.f32.xlu1 %v325_v12  ;;  %323 = vadd.xlane.f32.xlu0 %v322_v20  ;;  %v343_v20 = vsel %vm93_vm0, %v3904_v36, 0.0  ;;  %v346_v36 = vsel %vm93_vm0, %v3923_v41, 0.0  ;;  %v352_v41 = vsel %vm93_vm0, %v3937_v45, 0.0 }
  0xaa   :  { %v905_v46 = vsel %vm904_vm4, %v647_v13, %v903_v8  ;;  %v123_v5 = vpop.xlane.xlu1 %122  ;;  %v120_v63 = vpop.xlane.xlu0 %119 }
  0xab   :  { %v655_v25 = vrot.slane %v123_v5, %v4241_v31  ;;  %v651_v15 = vrot.slane %v120_v63, %v4239_v30  ;;  %v349_v63 = vsel %vm93_vm0, %v3918_v40, 0.0  ;;  %v355_v40 = vsel %vm93_vm0, %v3932_v44, 0.0 }
  0xad   :  { %v656_v16 = vsel %vm619_vm1, %v655_v25, %v651_v15  ;;  %332 = vadd.xlane.f32.xlu1 %v331_v1  ;;  %329 = vadd.xlane.f32.xlu0 %v328_v24 }
  0xae   :  { %v907_v17 = vsel %vm906_vm5, %v656_v16, %v905_v46  ;;  %v129_v14 = vpop.xlane.xlu1 %128  ;;  %v126_v2 = vpop.xlane.xlu0 %125 }
  0xaf   :  { %v664_v29 = vrot.slane %v129_v14, %v4241_v31  ;;  %v660_v9 = vrot.slane %v126_v2, %v4239_v30 }
  0xb1   :  { %v665_v8 = vsel %vm619_vm1, %v664_v29, %v660_v9  ;;  %338 = vadd.xlane.f32.xlu1 %v337_v0  ;;  %335 = vadd.xlane.f32.xlu0 %v334_v28  ;;  %v361_v29 = vsel %vm93_vm0, %v3946_v48, 0.0  ;;  %v358_v9 = vsel %vm93_vm0, %v3951_v49, 0.0  ;;  %v364_v48 = vsel %vm93_vm0, %v3965_v53, 0.0 }
  0xb2   :  { %v909_v55 = vsel %vm908_vm6, %v665_v8, %v907_v17  ;;  %v135_v47 = vpop.xlane.xlu1 %134  ;;  %v132_v12 = vpop.xlane.xlu0 %131 }
  0xb3   :  { %v673_v33 = vrot.slane %v135_v47, %v4241_v31  ;;  %v669_v21 = vrot.slane %v132_v12, %v4239_v30 }
  0xb5   :  { %v674_v62 = vsel %vm619_vm1, %v673_v33, %v669_v21  ;;  %344 = vadd.xlane.f32.xlu1 %v343_v20  ;;  %341 = vadd.xlane.f32.xlu0 %v340_v32  ;;  %v367_v20 = vsel %vm93_vm0, %v3960_v52, 0.0  ;;  %v370_v52 = vsel %vm93_vm0, %v3979_v57, 0.0 }
  0xb6   :  { %v911_v13 = vsel %vm910_vm7, %v674_v62, %v909_v55  ;;  %v141_v46 = vpop.xlane.xlu1 %140  ;;  %v138_v5 = vpop.xlane.xlu0 %137 }
  0xb7   :  { %v682_v37 = vrot.slane %v141_v46, %v4241_v31  ;;  %v678_v1 = vrot.slane %v138_v5, %v4239_v30  ;;  %v373_v46 = vsel %vm93_vm0, %v3974_v56, 0.0  ;;  %v376_v56 = vsel %vm93_vm0, %v3993_v61, 0.0 }
  0xb9   :  { %v683_v24 = vsel %vm619_vm1, %v682_v37, %v678_v1  ;;  %350 = vadd.xlane.f32.xlu1 %v349_v63  ;;  %347 = vadd.xlane.f32.xlu0 %v346_v36 }
  0xba   :  { %v4302_v25 = vsel %vm912_vm8, %v683_v24, %v911_v13  ;;  %v147_v15 = vpop.xlane.xlu1 %146  ;;  %v144_v16 = vpop.xlane.xlu0 %143  ;;  %v379_v24 = vsel %vm93_vm0, %v3988_v60, 0.0  ;;  %v382_v60 = vsel %vm93_vm0, %v4007_v4, 0.0 }
  0xbb   :  { %v691_v17 = vrot.slane %v147_v15, %v4241_v31  ;;  %v687_v14 = vrot.slane %v144_v16, %v4239_v30 }
  0xbd   :  { %v692_v2 = vsel %vm619_vm1, %v691_v17, %v687_v14  ;;  %356 = vadd.xlane.f32.xlu1 %v355_v40  ;;  %353 = vadd.xlane.f32.xlu0 %v352_v41  ;;  %v385_v14 = vsel %vm93_vm0, %v4002_v3, 0.0  ;;  %v388_v3 = vsel %vm93_vm0, %v4021_v11, 0.0  ;;  %v940_v11 = vsel %vm939_vm9, 0.0, %v4302_v25 }
  0xbe   :  { %v153_v0 = vpop.xlane.xlu1 %152  ;;  %v150_v28 = vpop.xlane.xlu0 %149  ;;  %v403_v25 = vsel %vm93_vm0, %v4044_v26, 0.0  ;;  %v409_v26 = vsel %vm93_vm0, %v4058_v34, 0.0  ;;  %v412_v34 = vsel %vm93_vm0, %v4077_v43, 0.0  ;;  %v427_v43 = vsel %vm93_vm0, %v4100_v58, 0.0 }
  0xbf   :  { %v700_v44 = vrot.slane %v153_v0, %v4241_v31  ;;  %v696_v45 = vrot.slane %v150_v28, %v4239_v30 }
  0xc1   :  { %v701_v8 = vsel %vm619_vm1, %v700_v44, %v696_v45  ;;  %362 = vadd.xlane.f32.xlu1 %v361_v29  ;;  %359 = vadd.xlane.f32.xlu0 %v358_v9  ;;  %v391_v44 = vsel %vm93_vm0, %v4016_v10, 0.0  ;;  %v394_v10 = vsel %vm93_vm0, %v4035_v19, 0.0 }
  0xc2   :  { %v914_v55 = vsel %vm900_vm2, %v701_v8, %v692_v2  ;;  %v159_v47 = vpop.xlane.xlu1 %158  ;;  %v156_v12 = vpop.xlane.xlu0 %155 }
  0xc3   :  { %v709_v49 = vrot.slane %v159_v47, %v4241_v31  ;;  %v705_v32 = vrot.slane %v156_v12, %v4239_v30 }
  0xc5   :  { %v710_v33 = vsel %vm619_vm1, %v709_v49, %v705_v32  ;;  %368 = vadd.xlane.f32.xlu1 %v367_v20  ;;  %365 = vadd.xlane.f32.xlu0 %v364_v48  ;;  %v397_v20 = vsel %vm93_vm0, %v4030_v18, 0.0 }
  0xc6   :  { %v915_v21 = vsel %vm902_vm3, %v710_v33, %v914_v55  ;;  %v165_v62 = vpop.xlane.xlu1 %164  ;;  %v162_v13 = vpop.xlane.xlu0 %161  ;;  %v4369_v33 = vsel %vm944_vm10, %v940_v11, 0.0  ;;  %v7466_v11 = vld [vmem:[#allocation13_spill] sm:$0xff] }
  0xc7   :  { %v718_v53 = vrot.slane %v165_v62, %v4241_v31  ;;  %v714_v5 = vrot.slane %v162_v13, %v4239_v30  ;;  %v400_v62 = vsel %vm93_vm0, %v4049_v27, 0.0 }
  0xc9   :  { %v719_v63 = vsel %vm619_vm1, %v718_v53, %v714_v5  ;;  %374 = vadd.xlane.f32.xlu1 %v373_v46  ;;  %371 = vadd.xlane.f32.xlu0 %v370_v52  ;;  %v954_v52 = vrot.slane %v4369_v33, 5 }
  0xca   :  { %v916_v36 = vsel %vm904_vm4, %v719_v63, %v915_v21  ;;  %v171_v37 = vpop.xlane.xlu1 %170  ;;  %v168_v1 = vpop.xlane.xlu0 %167 }
  0xcb   :  { %v727_v57 = vrot.slane %v171_v37, %v4241_v31  ;;  %v723_v15 = vrot.slane %v168_v1, %v4239_v30 }
  0xcd   :  { %v728_v16 = vsel %vm619_vm1, %v727_v57, %v723_v15  ;;  %380 = vadd.xlane.f32.xlu1 %v379_v24  ;;  %377 = vadd.xlane.f32.xlu0 %v376_v56  ;;  %v415_v24 = vsel %vm93_vm0, %v4072_v42, 0.0  ;;  %v418_v15 = vsel %vm93_vm0, %v4091_v51, 0.0  ;;  %v433_v51 = vsel %vm93_vm0, %v4114_v6, 0.0 }
  0xce   :  { %v917_v40 = vsel %vm906_vm5, %v728_v16, %v916_v36  ;;  %v177_v41 = vpop.xlane.xlu1 %176  ;;  %v174_v17 = vpop.xlane.xlu0 %173  ;;  %v406_v36 = vsel %vm93_vm0, %v4063_v35, 0.0  ;;  %v421_v35 = vsel %vm93_vm0, %v4086_v50, 0.0 }
  0xcf   :  { %v736_v61 = vrot.slane %v177_v41, %v4241_v31  ;;  %v732_v2 = vrot.slane %v174_v17, %v4239_v30  ;;  %v430_v17 = vsel %vm93_vm0, %v4119_v7, 0.0  ;;  %v445_v7 = vsel %vm93_vm0, %v4142_v38, 0.0 }
  0xd1   :  { %v737_v0 = vsel %vm619_vm1, %v736_v61, %v732_v2  ;;  %386 = vadd.xlane.f32.xlu1 %v385_v14  ;;  %383 = vadd.xlane.f32.xlu0 %v382_v60  ;;  %v436_v60 = vsel %vm93_vm0, %v4133_v23, 0.0  ;;  %v442_v2 = vsel %vm93_vm0, %v4147_v39, 0.0  ;;  %v451_v23 = vsel %vm93_vm0, %v4156_v54, 0.0 }
  0xd2   :  { %v918_v28 = vsel %vm908_vm6, %v737_v0, %v917_v40  ;;  %v183_v29 = vpop.xlane.xlu1 %182  ;;  %v180_v9 = vpop.xlane.xlu0 %179  ;;  %v424_v40 = vsel %vm93_vm0, %v4105_v59, 0.0  ;;  %v439_v59 = vsel %vm93_vm0, %v4128_v22, 0.0 }
  0xd3   :  { %v745_v4 = vrot.slane %v183_v29, %v4241_v31  ;;  %v741_v45 = vrot.slane %v180_v9, %v4239_v30 }
  0xd5   :  { %v746_v8 = vsel %vm619_vm1, %v745_v4, %v741_v45  ;;  %392 = vadd.xlane.f32.xlu1 %v391_v44  ;;  %389 = vadd.xlane.f32.xlu0 %v388_v3  ;;  %v7463_v44 = vld [vmem:[#allocation10_spill] sm:$0xff]  ;;  %v7464_v3 = vld [vmem:[#allocation11_spill] sm:$0xff] }
  0xd6   :  { %v919_v55 = vsel %vm910_vm7, %v746_v8, %v918_v28  ;;  %v189_v47 = vpop.xlane.xlu1 %188  ;;  %v186_v12 = vpop.xlane.xlu0 %185  ;;  %v7462_v28 = vld [vmem:[#allocation9_spill] sm:$0xff]  ;;  %v457_v39 = vsel %vm93_vm0, %v7463_v44, 0.0  ;;  %v454_v4 = vsel %vm93_vm0, %v7464_v3, 0.0 }
  0xd7   :  { %v754_v48 = vrot.slane %v189_v47, %v4241_v31  ;;  %v750_v49 = vrot.slane %v186_v12, %v4239_v30  ;;  %v448_v29 = vsel %vm93_vm0, %v7462_v28, 0.0  ;;  %v7465_v47 = vld [vmem:[#allocation12_spill] sm:$0xff] }
  0xd8   :  { %v463_v12 = vsel %vm93_vm0, %v7465_v47, 0.0 }
  0xd9   :  { %v755_v32 = vsel %vm619_vm1, %v754_v48, %v750_v49  ;;  %398 = vadd.xlane.f32.xlu1 %v397_v20  ;;  %395 = vadd.xlane.f32.xlu0 %v394_v10  ;;  %v460_v48 = vsel %vm93_vm0, %v7466_v11, 0.0 }
  0xda   :  { %v920_v18 = vsel %vm912_vm8, %v755_v32, %v919_v55  ;;  %v4372_v21 = vpop.xlane.xlu1 %194  ;;  %v4374_v19 = vpop.xlane.xlu0 %191 }
  0xdb   :  { %v941_v13 = vsel %vm939_vm9, 0.0, %v920_v18  ;;  %v763_v20 = vrot.slane %v4372_v21, %v4241_v31  ;;  %v759_v10 = vrot.slane %v4374_v19, %v4239_v30 }
  0xdc   :  { %v4382_v46 = vsel %vm944_vm10, %v941_v13, 0.0 }
  0xdd   :  { %v955_v53 = vrot.slane %v4382_v46, 5  ;;  %404 = vadd.xlane.f32.xlu1 %v403_v25  ;;  %401 = vadd.xlane.f32.xlu0 %v400_v62 }
  0xde   :  { %v4386_v5 = vpop.xlane.xlu1 %200  ;;  %v4388_v63 = vpop.xlane.xlu0 %197 }
  0xdf   :  { %v4397_v27 = vsel %vm953_vm11, %v954_v52, %v955_v53  ;;  %v772_v45 = vrot.slane %v4386_v5, %v4241_v31  ;;  %v768_v54 = vrot.slane %v4388_v63, %v4239_v30  ;;  %v7467_v63 = vld [vmem:[#allocation14_spill] sm:$0xff] }
  0xe1   :  { %410 = vadd.xlane.f32.xlu1 %v409_v26  ;;  %407 = vadd.xlane.f32.xlu0 %v406_v36  ;;  %v773_v49 = vsel %vm619_vm1, %v772_v45, %v768_v54  ;;  %v469_v26 = vsel %vm93_vm0, %v7467_v63, 0.0  ;;  %v764_v36 = vsel %vm619_vm1, %v763_v20, %v759_v10 }
  0xe2   :  { %v4401_v37 = vpop.xlane.xlu1 %206  ;;  %v4403_v1 = vpop.xlane.xlu0 %203 }
  0xe3   :  { %v781_v32 = vrot.slane %v4401_v37, %v4241_v31  ;;  %v777_v18 = vrot.slane %v4403_v1, %v4239_v30  ;;  %v7468_v37 = vld [vmem:[#allocation15_spill] sm:$0xff] }
  0xe4   :  { %v466_v1 = vsel %vm93_vm0, %v7468_v37, 0.0 }
  0xe5   :  { %416 = vadd.xlane.f32.xlu1 %v415_v24  ;;  %413 = vadd.xlane.f32.xlu0 %v412_v34  ;;  %v921_v24 = vsel %vm900_vm2, %v773_v49, %v764_v36  ;;  %v782_v34 = vsel %vm619_vm1, %v781_v32, %v777_v18 }
  0xe6   :  { %v4409_v56 = vpop.xlane.xlu1 %212  ;;  %v4411_v57 = vpop.xlane.xlu0 %209 }
  0xe7   :  { %v790_v25 = vrot.slane %v4409_v56, %v4241_v31  ;;  %v786_v21 = vrot.slane %v4411_v57, %v4239_v30  ;;  %v7469_v56 = vld [vmem:[#allocation16_spill] sm:$0xff] }
  0xe8   :  { %v475_v57 = vsel %vm93_vm0, %v7469_v56, 0.0 }
  0xe9   :  { %422 = vadd.xlane.f32.xlu1 %v421_v35  ;;  %419 = vadd.xlane.f32.xlu0 %v418_v15  ;;  %v791_v35 = vsel %vm619_vm1, %v790_v25, %v786_v21 }
  0xea   :  { %v4417_v16 = vpop.xlane.xlu1 %218  ;;  %v4419_v42 = vpop.xlane.xlu0 %215 }
  0xeb   :  { %v799_v19 = vrot.slane %v4417_v16, %v4241_v31  ;;  %v795_v62 = vrot.slane %v4419_v42, %v4239_v30 }
  0xed   :  { %428 = vadd.xlane.f32.xlu1 %v427_v43  ;;  %425 = vadd.xlane.f32.xlu0 %v424_v40  ;;  %v800_v15 = vsel %vm619_vm1, %v799_v19, %v795_v62 }
  0xee   :  { %v4425_v41 = vpop.xlane.xlu1 %224  ;;  %v4427_v50 = vpop.xlane.xlu0 %221 }
  0xef   :  { %v808_v16 = vrot.slane %v4425_v41, %v4241_v31  ;;  %v804_v42 = vrot.slane %v4427_v50, %v4239_v30  ;;  %v922_v41 = vsel %vm902_vm3, %v782_v34, %v921_v24 }
  0xf1   :  { %434 = vadd.xlane.f32.xlu1 %v433_v51  ;;  %431 = vadd.xlane.f32.xlu0 %v430_v17 }
  0xf2   :  { %v4433_v14 = vpop.xlane.xlu1 %230  ;;  %v4435_v58 = vpop.xlane.xlu0 %227 }
  0xf3   :  { %v817_v43 = vrot.slane %v4433_v14, %v4241_v31  ;;  %v813_v40 = vrot.slane %v4435_v58, %v4239_v30  ;;  %v809_v58 = vsel %vm619_vm1, %v808_v16, %v804_v42 }
  0xf5   :  { %440 = vadd.xlane.f32.xlu1 %v439_v59  ;;  %437 = vadd.xlane.f32.xlu0 %v436_v60 }
  0xf6   :  { %v4441_v61 = vpop.xlane.xlu1 %236  ;;  %v4443_v6 = vpop.xlane.xlu0 %233 }
  0xf7   :  { %v826_v51 = vrot.slane %v4441_v61, %v4241_v31  ;;  %v822_v17 = vrot.slane %v4443_v6, %v4239_v30 }
  0xf9   :  { %446 = vadd.xlane.f32.xlu1 %v445_v7  ;;  %443 = vadd.xlane.f32.xlu0 %v442_v2  ;;  %v7470_v7 = vld [vmem:[#allocation17_spill] sm:$0xff]  ;;  %v923_v2 = vsel %vm904_vm4, %v791_v35, %v922_v41  ;;  %v827_v28 = vsel %vm619_vm1, %v826_v51, %v822_v17 }
  0xfa   :  { %v4449_v0 = vpop.xlane.xlu1 %242  ;;  %v4451_v22 = vpop.xlane.xlu0 %239  ;;  %v472_v50 = vsel %vm93_vm0, %v7470_v7, 0.0  ;;  %v924_v14 = vsel %vm906_vm5, %v800_v15, %v923_v2  ;;  %v4583_v7 = vstv %s3595_s6  ;;  %v4587_v2 = vstv %s3609_s8  ;;  %s5439_s6 = sld [smem:[#allocation3 + $0x16]] }
  0xfb   :  { %v925_v54 = vsel %vm908_vm6, %v809_v58, %v924_v14  ;;  %7473 = vst [vmem:[#allocation11_spill] sm:$0xff] %v4583_v7  ;;  %7475 = vst [vmem:[#allocation13_spill] sm:$0xff] %v4587_v2  ;;  %vm2292_vm0 = vcmask 1041408   ;;  %s5467_s8 = sld [smem:[#allocation3 + $0x18]] }
  0xfd   :  { %452 = vadd.xlane.f32.xlu1 %v451_v23  ;;  %449 = vadd.xlane.f32.xlu0 %v448_v29  ;;  %v818_v23 = vsel %vm619_vm1, %v817_v43, %v813_v40 }
  0xfe   :  { %v4457_v9 = vpop.xlane.xlu1 %248  ;;  %v4459_v38 = vpop.xlane.xlu0 %245 }
  0xff   :  { %v844_v61 = vrot.slane %v4457_v9, %v4241_v31  ;;  %v840_v6 = vrot.slane %v4459_v38, %v4239_v30  ;;  %v835_v9 = vrot.slane %v4449_v0, %v4241_v31  ;;  %v831_v38 = vrot.slane %v4451_v22, %v4239_v30 }
 0x101   :  { %458 = vadd.xlane.f32.xlu1 %v457_v39  ;;  %455 = vadd.xlane.f32.xlu0 %v454_v4  ;;  %v836_v49 = vsel %vm619_vm1, %v835_v9, %v831_v38 }
 0x102   :  { %v4469_v8 = vpop.xlane.xlu1 %254  ;;  %v4471_v55 = vpop.xlane.xlu0 %251 }
 0x103   :  { %v853_v29 = vrot.slane %v4469_v8, %v4241_v31  ;;  %v849_v44 = vrot.slane %v4471_v55, %v4239_v30  ;;  %v926_v55 = vsel %vm910_vm7, %v818_v23, %v925_v54 }
 0x104   :  { %v927_v22 = vsel %vm912_vm8, %v827_v28, %v926_v55 }
 0x105   :  { %464 = vadd.xlane.f32.xlu1 %v463_v12  ;;  %461 = vadd.xlane.f32.xlu0 %v460_v48  ;;  %v845_v12 = vsel %vm619_vm1, %v844_v61, %v840_v6  ;;  %v854_v10 = vsel %vm619_vm1, %v853_v29, %v849_v44  ;;  %v4598_v61 = vsel %vm953_vm11, 0.0, %v954_v52 }
 0x106   :  { %v261_v13 = vpop.xlane.xlu1 %260  ;;  %v258_v5 = vpop.xlane.xlu0 %257  ;;  %v928_v21 = vsel %vm900_vm2, %v845_v12, %v836_v49  ;;  %7476 = vst [vmem:[#allocation14_spill] sm:$0xff] %v4598_v61 }
 0x107   :  { %v862_v4 = vrot.slane %v261_v13, %v4241_v31  ;;  %v858_v45 = vrot.slane %v258_v5, %v4239_v30  ;;  %v929_v62 = vsel %vm902_vm3, %v854_v10, %v928_v21  ;;  %v942_v5 = vsel %vm939_vm9, 0.0, %v927_v22 }
 0x109   :  { %470 = vadd.xlane.f32.xlu1 %v469_v26  ;;  %467 = vadd.xlane.f32.xlu0 %v466_v1  ;;  %v863_v32 = vsel %vm619_vm1, %v862_v4, %v858_v45 }
 0x10a   :  { %v267_v59 = vpop.xlane.xlu1 %266  ;;  %v264_v60 = vpop.xlane.xlu0 %263  ;;  %v930_v63 = vsel %vm904_vm4, %v863_v32, %v929_v62 }
 0x10b   :  { %v871_v8 = vrot.slane %v267_v59, %v4241_v31  ;;  %v867_v47 = vrot.slane %v264_v60, %v4239_v30  ;;  %v4578_v59 = vstv %s4546_s0  ;;  %v4581_v60 = vstv %s4550_s5  ;;  %s3593_s0 = sld [smem:[#allocation3 + $0x13]] }
 0x10c   :  { %7471 = vst [vmem:[#allocation9_spill] sm:$0xff] %v4578_v59  ;;  %7472 = vst [vmem:[#allocation10_spill] sm:$0xff] %v4581_v60  ;;  %s3594_s5 = sld [smem:[#allocation3 + $0x14]] }
 0x10d   :  { %476 = vadd.xlane.f32.xlu1 %v475_v57  ;;  %473 = vadd.xlane.f32.xlu0 %v472_v50  ;;  %v872_v19 = vsel %vm619_vm1, %v871_v8, %v867_v47  ;;  %v947_v57 = vsel %vm944_vm10, %v942_v5, 0.0  ;;  %v4585_v50 = vstv %s3602_s7  ;;  %s5455_s7 = sld [smem:[#allocation3 + $0x17]] }
 0x10e   :  { %v273_v39 = vpop.xlane.xlu1 %272  ;;  %v270_v3 = vpop.xlane.xlu0 %269  ;;  %v931_v1 = vsel %vm906_vm5, %v872_v19, %v930_v63  ;;  %v957_v51 = vrot.slane %v947_v57, 5  ;;  %7474 = vst [vmem:[#allocation12_spill] sm:$0xff] %v4585_v50 }
 0x10f   :  { %v880_v20 = vrot.slane %v273_v39, %v4241_v31  ;;  %v876_v0 = vrot.slane %v270_v3, %v4239_v30 }
 0x110   :  { %v4607_v28 = vsel %vm953_vm11, 0.0, %v957_v51 }
 0x111   :  { %v881_v13 = vsel %vm619_vm1, %v880_v20, %v876_v0  ;;  %7477 = vst [vmem:[#allocation15_spill] sm:$0xff] %v4607_v28 }
 0x112   :  { %v279_v11 = vpop.xlane.xlu1 %278  ;;  %v276_v48 = vpop.xlane.xlu0 %275  ;;  %v932_v56 = vsel %vm908_vm6, %v881_v13, %v931_v1 }
 0x113   :  { %v889_v18 = vrot.slane %v279_v11, %v4241_v31  ;;  %v885_v25 = vrot.slane %v276_v48, %v4239_v30 }
 0x115   :  { %v890_v26 = vsel %vm619_vm1, %v889_v18, %v885_v25 }
 0x116   :  { %v285_v36 = vpop.xlane.xlu1 %284  ;;  %v282_v37 = vpop.xlane.xlu0 %281  ;;  %v933_v35 = vsel %vm910_vm7, %v890_v26, %v932_v56 }
 0x117   :  { %v898_v24 = vrot.slane %v285_v36, %v4241_v31  ;;  %v894_v34 = vrot.slane %v282_v37, %v4239_v30 }
 0x119   :  { %v899_v15 = vsel %vm619_vm1, %v898_v24, %v894_v34  ;;  %v4703_v24 = vstv %s3616_s11  ;;  %s5483_s11 = sld [smem:[#allocation3 + $0x19]] }
 0x11a   :  { %v934_v16 = vsel %vm912_vm8, %v899_v15, %v933_v35  ;;  %v4571_v42 = vpop.xlane.xlu1 %290  ;;  %v4573_v43 = vpop.xlane.xlu0 %287  ;;  %7485 = vst [vmem:[#allocation23_spill] sm:$0xff] %v4703_v24 }
 0x11b   :  { %v943_v40 = vsel %vm939_vm9, 0.0, %v934_v16 }
 0x11c   :  { %v948_v17 = vsel %vm944_vm10, %v943_v40, 0.0 }
 0x11d   :  { %v958_v41 = vrot.slane %v948_v17, 5 }
 0x11e   :  { %v4589_v14 = vpop.xlane.xlu1 %296  ;;  %1395 = vrot.lane.b32.xlu1 %v4397_v27, %s3743_s9  ;;  %v4593_v58 = vpop.xlane.xlu0 %293 }
 0x11f   :  { %v4601_v6 = vsel %vm953_vm11, %v957_v51, %v958_v41  ;;  %v4604_v23 = vsel %vm953_vm11, %v958_v41, 0.0 }
 0x120   :  { %v4611_v29 = vmul.f32 %v4578_v59, %v4601_v6  ;;  %v1507_v33 = vmul.f32 %v4578_v59, %v4604_v23  ;;  %v4617_v52 = vmul.f32 %v4581_v60, %v4601_v6  ;;  %v1666_v44 = vmul.f32 %v4581_v60, %v4604_v23 }
 0x121   :  { %v4623_v39 = vmul.f32 %v4583_v7, %v4601_v6  ;;  %v1821_v3 = vmul.f32 %v4583_v7, %v4604_v23  ;;  %v4629_v9 = vmul.f32 %v4585_v50, %v4601_v6  ;;  %v1976_v54 = vmul.f32 %v4585_v50, %v4604_v23 }
 0x122   :  { %7478 = vst [vmem:[#allocation16_spill] sm:$0xff] %v4611_v29  ;;  %7479 = vst [vmem:[#allocation17_spill] sm:$0xff] %v4617_v52  ;;  %v7346_v38 = vrot.slane %v4611_v29, 1  ;;  %v1523_v4 = vrot.slane %v1507_v33, 1  ;;  %v7345_v45 = vrot.slane %v4617_v52, 2  ;;  %v4635_v8 = vpop.xlane.xlu1 %302  ;;  %1397 = vrot.lane.b32.xlu1 %v4607_v28, %s3743_s9  ;;  %v4639_v47 = vpop.xlane.xlu0 %299  ;;  %v1682_v55 = vrot.slane %v1666_v44, 2 }
 0x123   :  { %7480 = vst [vmem:[#allocation18_spill] sm:$0xff] %v4623_v39  ;;  %7481 = vst [vmem:[#allocation19_spill] sm:$0xff] %v4629_v9  ;;  %v7344_v12 = vrot.slane %v4623_v39, 3  ;;  %v1837_v20 = vrot.slane %v1821_v3, 3  ;;  %v7343_v0 = vrot.slane %v4629_v9, 4  ;;  %v1992_v10 = vrot.slane %v1976_v54, 4  ;;  %1393 = vrot.lane.b32.xlu0 %v4598_v61, %s3743_s9 }
 0x124   :  { %v4646_v22 = vsel %vm1514_vm12, %v7346_v38, %v1523_v4  ;;  %v4650_v11 = vmul.f32 %v4587_v2, %v4601_v6  ;;  %v4657_v48 = vsel %vm1673_vm13, %v7345_v45, %v1682_v55  ;;  %v2131_v32 = vmul.f32 %v4587_v2, %v4604_v23 }
 0x125   :  { %v4662_v49 = vsel %vm1828_vm14, %v7344_v12, %v1837_v20  ;;  %v4669_v18 = vsel %vm1983_vm15, %v7343_v0, %v1992_v10  ;;  %v7350_v37 = vrot.slane %v4601_v6, 3  ;;  %v1856_v1 = vrot.slane %v4604_v23, 3 }
 0x126   :  { %7482 = vst [vmem:[#allocation20_spill] sm:$0xff] %v4650_v11  ;;  %7483 = vst [vmem:[#allocation21_spill] sm:$0xff] %v4669_v18  ;;  %v7342_v25 = vrot.slane %v4650_v11, 5  ;;  %v4672_v21 = vpop.xlane.xlu1 %308  ;;  %1399 = vrot.lane.b32.xlu1 %v4601_v6, %s3743_s9  ;;  %v4676_v19 = vpop.xlane.xlu0 %305  ;;  %v2146_v62 = vrot.slane %v2131_v32, 5  ;;  %v7349_v34 = vrot.slane %v4601_v6, 4  ;;  %v2011_v56 = vrot.slane %v4604_v23, 4 }
 0x127   :  { %1411 = vrot.lane.b32.xlu0 %v4598_v61, %s3744_s10  ;;  %v2285_v57 = vmul.f32 %v4703_v24, %v4604_v23  ;;  %v4718_v16 = vsel %vm1828_vm14, %v7350_v37, %v1856_v1  ;;  %v7348_v40 = vrot.slane %v4601_v6, 5  ;;  %v2165_v51 = vrot.slane %v4604_v23, 5 }
 0x128   :  { %v4683_v13 = vsel %vm953_vm11, %v7342_v25, %v2146_v62  ;;  %v4727_v17 = vsel %vm1983_vm15, %v7349_v34, %v2011_v56  ;;  %v7347_v33 = vrot.slane %v4601_v6, 6  ;;  %v2320_v54 = vrot.slane %v4604_v23, 6 }
 0x129   :  { %7484 = vst [vmem:[#allocation22_spill] sm:$0xff] %v4683_v13  ;;  %v4732_v41 = vsel %vm953_vm11, %v7348_v40, %v2165_v51  ;;  %v2301_v44 = vrot.slane %v2285_v57, 6  ;;  %v4744_v55 = vmul.f32 %v4703_v24, %v4601_v6  ;;  %v4794_v25 = vsel %vm953_vm11, %v955_v53, 0.0 }
 0x12a   :  { %v4685_v5 = vpop.xlane.xlu1 %314  ;;  %1413 = vrot.lane.b32.xlu1 %v4397_v27, %s3744_s10  ;;  %v4689_v63 = vpop.xlane.xlu0 %311  ;;  %v4751_v20 = vsel %vm2292_vm0, %v7347_v33, %v2320_v54  ;;  %v1539_v45 = vrot.slane %v4397_v27, 1  ;;  %v1538_v38 = vrot.slane %v4598_v61, 1  ;;  %v1541_v33 = vrot.slane %v4794_v25, 1 }
 0x12b   :  { %1415 = vrot.lane.b32.xlu0 %v4607_v28, %s3744_s10  ;;  %7486 = vst [vmem:[#allocation24_spill] sm:$0xff] %v4744_v55  ;;  %7487 = vst [vmem:[#allocation25_spill] sm:$0xff] %v4751_v20  ;;  %v7341_v10 = vrot.slane %v4744_v55, 6  ;;  %v1544_v34 = vrot.slane %v4601_v6, 1  ;;  %v1543_v55 = vrot.slane %v4607_v28, 1  ;;  %v1546_v11 = vrot.slane %v4604_v23, 1 }
 0x12c   :  { %v1540_v40 = vsel %vm1514_vm12, %v1538_v38, %v1539_v45  ;;  %v1542_v37 = vsel %vm1514_vm12, %v1539_v45, %v1541_v33 }
 0x12d   :  { %v4763_v1 = vsel %vm2292_vm0, %v7341_v10, %v2301_v44  ;;  %v1545_v52 = vsel %vm1514_vm12, %v1543_v55, %v1544_v34  ;;  %v1547_v38 = vsel %vm1514_vm12, %v1544_v34, %v1546_v11 }
 0x12e   :  { %v4693_v26 = vpop.xlane.xlu1 %320  ;;  %1417 = vrot.lane.b32.xlu1 %v4601_v6, %s3744_s10  ;;  %v4697_v36 = vpop.xlane.xlu0 %317  ;;  %7488 = vst [vmem:[#allocation26_spill] sm:$0xff] %v4763_v1 }
 0x12f   :  { %1429 = vrot.lane.b32.xlu0 %v4598_v61, %s3745_s12 }
 0x132   :  { %v4709_v35 = vpop.xlane.xlu1 %326  ;;  %1431 = vrot.lane.b32.xlu1 %v4397_v27, %s3745_s12  ;;  %v4713_v15 = vpop.xlane.xlu0 %323 }
 0x133   :  { %1433 = vrot.lane.b32.xlu0 %v4607_v28, %s3745_s12 }
 0x136   :  { %v4735_v3 = vpop.xlane.xlu1 %332  ;;  %1435 = vrot.lane.b32.xlu1 %v4601_v6, %s3745_s12  ;;  %v4739_v4 = vpop.xlane.xlu0 %329 }
 0x137   :  { %1447 = vrot.lane.b32.xlu0 %v4598_v61, %s3746_s13 }
 0x13a   :  { %v4754_v32 = vpop.xlane.xlu1 %338  ;;  %1449 = vrot.lane.b32.xlu1 %v4397_v27, %s3746_s13  ;;  %v4758_v62 = vpop.xlane.xlu0 %335 }
 0x13b   :  { %1451 = vrot.lane.b32.xlu0 %v4607_v28, %s3746_s13 }
 0x13e   :  { %v4767_v56 = vpop.xlane.xlu1 %344  ;;  %1453 = vrot.lane.b32.xlu1 %v4601_v6, %s3746_s13  ;;  %v4771_v57 = vpop.xlane.xlu0 %341 }
 0x13f   :  { %1465 = vrot.lane.b32.xlu0 %v4598_v61, %s3747_s14 }
 0x142   :  { %v4775_v51 = vpop.xlane.xlu1 %350  ;;  %1467 = vrot.lane.b32.xlu1 %v4397_v27, %s3747_s14  ;;  %v4779_v44 = vpop.xlane.xlu0 %347 }
 0x143   :  { %1469 = vrot.lane.b32.xlu0 %v4607_v28, %s3747_s14 }
 0x146   :  { %v4783_v54 = vpop.xlane.xlu1 %356  ;;  %1471 = vrot.lane.b32.xlu1 %v4601_v6, %s3747_s14  ;;  %v4787_v10 = vpop.xlane.xlu0 %353 }
 0x147   :  { %1483 = vrot.lane.b32.xlu0 %v4598_v61, %s3748_s15 }
 0x14a   :  { %v4796_v0 = vpop.xlane.xlu1 %362  ;;  %1485 = vrot.lane.b32.xlu1 %v4397_v27, %s3748_s15  ;;  %v4800_v12 = vpop.xlane.xlu0 %359 }
 0x14b   :  { %1487 = vrot.lane.b32.xlu0 %v4607_v28, %s3748_s15 }
 0x14e   :  { %v4807_v46 = vpop.xlane.xlu1 %368  ;;  %1489 = vrot.lane.b32.xlu1 %v4601_v6, %s3748_s15  ;;  %v4811_v53 = vpop.xlane.xlu0 %365 }
 0x14f   :  { %1552 = vrot.lane.b32.xlu0 %v1540_v40, %s3743_s9 }
 0x152   :  { %v4819_v9 = vpop.xlane.xlu1 %374  ;;  %1554 = vrot.lane.b32.xlu1 %v1542_v37, %s3743_s9  ;;  %v4822_v39 = vpop.xlane.xlu0 %371 }
 0x153   :  { %1556 = vrot.lane.b32.xlu0 %v1545_v52, %s3743_s9 }
 0x156   :  { %v4827_v24 = vpop.xlane.xlu1 %380  ;;  %1558 = vrot.lane.b32.xlu1 %v1547_v38, %s3743_s9  ;;  %v4830_v45 = vpop.xlane.xlu0 %377 }
 0x157   :  { %7489 = vst [vmem:[#allocation27_spill] sm:$0xff] %v4827_v24  ;;  %7490 = vst [vmem:[#allocation28_spill] sm:$0xff] %v4830_v45  ;;  %1570 = vrot.lane.b32.xlu0 %v1540_v40, %s3744_s10  ;;  %v5018_v24 = vstv %s3576_s18  ;;  %s3603_s18 = sld [smem:[#allocation3 + $0x1d]] }
 0x158   :  { %7539 = vst [vmem:[#allocation76_spill] sm:$0xff] %v5018_v24 }
 0x15a   :  { %v4833_v33 = vpop.xlane.xlu1 %386  ;;  %1572 = vrot.lane.b32.xlu1 %v1542_v37, %s3744_s10  ;;  %v4836_v29 = vpop.xlane.xlu0 %383 }
 0x15b   :  { %1574 = vrot.lane.b32.xlu0 %v1545_v52, %s3744_s10 }
 0x15e   :  { %v4839_v55 = vpop.xlane.xlu1 %392  ;;  %1576 = vrot.lane.b32.xlu1 %v1547_v38, %s3744_s10  ;;  %v4842_v11 = vpop.xlane.xlu0 %389 }
 0x15f   :  { %7491 = vst [vmem:[#allocation29_spill] sm:$0xff] %v4842_v11  ;;  %1588 = vrot.lane.b32.xlu0 %v1540_v40, %s3745_s12 }
 0x162   :  { %v4845_v34 = vpop.xlane.xlu1 %398  ;;  %1590 = vrot.lane.b32.xlu1 %v1542_v37, %s3745_s12  ;;  %v4848_v2 = vpop.xlane.xlu0 %395 }
 0x163   :  { %7492 = vst [vmem:[#allocation30_spill] sm:$0xff] %v4845_v34  ;;  %7493 = vst [vmem:[#allocation31_spill] sm:$0xff] %v4848_v2  ;;  %1592 = vrot.lane.b32.xlu0 %v1545_v52, %s3745_s12  ;;  %v5032_v34 = vstv %s3578_s19  ;;  %s3605_s19 = sld [smem:[#allocation3 + $0x1f]] }
 0x166   :  { %v4851_v50 = vpop.xlane.xlu1 %404  ;;  %1594 = vrot.lane.b32.xlu1 %v1547_v38, %s3745_s12  ;;  %v4854_v7 = vpop.xlane.xlu0 %401 }
 0x167   :  { %7494 = vst [vmem:[#allocation32_spill] sm:$0xff] %v4851_v50  ;;  %7495 = vst [vmem:[#allocation33_spill] sm:$0xff] %v4854_v7  ;;  %1606 = vrot.lane.b32.xlu0 %v1540_v40, %s3746_s13 }
 0x16a   :  { %v4857_v1 = vpop.xlane.xlu1 %410  ;;  %1608 = vrot.lane.b32.xlu1 %v1542_v37, %s3746_s13  ;;  %v4860_v60 = vpop.xlane.xlu0 %407 }
 0x16b   :  { %7496 = vst [vmem:[#allocation34_spill] sm:$0xff] %v4857_v1  ;;  %7497 = vst [vmem:[#allocation35_spill] sm:$0xff] %v4860_v60  ;;  %1610 = vrot.lane.b32.xlu0 %v1545_v52, %s3746_s13 }
 0x16e   :  { %v4863_v59 = vpop.xlane.xlu1 %416  ;;  %1612 = vrot.lane.b32.xlu1 %v1547_v38, %s3746_s13  ;;  %v4866_v13 = vpop.xlane.xlu0 %413 }
 0x16f   :  { %7498 = vst [vmem:[#allocation36_spill] sm:$0xff] %v4863_v59  ;;  %7499 = vst [vmem:[#allocation37_spill] sm:$0xff] %v4866_v13  ;;  %1624 = vrot.lane.b32.xlu0 %v1540_v40, %s3747_s14 }
 0x172   :  { %v4869_v18 = vpop.xlane.xlu1 %422  ;;  %1626 = vrot.lane.b32.xlu1 %v1542_v37, %s3747_s14  ;;  %v4872_v7 = vpop.xlane.xlu0 %419 }
 0x173   :  { %7500 = vst [vmem:[#allocation38_spill] sm:$0xff] %v4869_v18  ;;  %7501 = vst [vmem:[#allocation39_spill] sm:$0xff] %v4872_v7  ;;  %1628 = vrot.lane.b32.xlu0 %v1545_v52, %s3747_s14  ;;  %v1694_v18 = vrot.slane %v4397_v27, 2  ;;  %v1693_v7 = vrot.slane %v4598_v61, 2 }
 0x176   :  { %v4875_v1 = vpop.xlane.xlu1 %428  ;;  %1630 = vrot.lane.b32.xlu1 %v1547_v38, %s3747_s14  ;;  %v4878_v60 = vpop.xlane.xlu0 %425 }
 0x177   :  { %7502 = vst [vmem:[#allocation40_spill] sm:$0xff] %v4875_v1  ;;  %7503 = vst [vmem:[#allocation41_spill] sm:$0xff] %v4878_v60  ;;  %1642 = vrot.lane.b32.xlu0 %v1540_v40, %s3748_s15  ;;  %v1696_v1 = vrot.slane %v4794_v25, 2  ;;  %v1695_v40 = vsel %vm1673_vm13, %v1693_v7, %v1694_v18 }
 0x17a   :  { %v4881_v59 = vpop.xlane.xlu1 %434  ;;  %1644 = vrot.lane.b32.xlu1 %v1542_v37, %s3748_s15  ;;  %v4884_v13 = vpop.xlane.xlu0 %431  ;;  %v1699_v37 = vrot.slane %v4601_v6, 2 }
 0x17b   :  { %7504 = vst [vmem:[#allocation42_spill] sm:$0xff] %v4881_v59  ;;  %7505 = vst [vmem:[#allocation43_spill] sm:$0xff] %v4884_v13  ;;  %1646 = vrot.lane.b32.xlu0 %v1545_v52, %s3748_s15  ;;  %v1697_v13 = vsel %vm1673_vm13, %v1694_v18, %v1696_v1  ;;  %v1698_v52 = vrot.slane %v4607_v28, 2  ;;  %v1701_v59 = vrot.slane %v4604_v23, 2 }
 0x17d   :  { %v1702_v7 = vsel %vm1673_vm13, %v1699_v37, %v1701_v59 }
 0x17e   :  { %v4890_v50 = vpop.xlane.xlu1 %440  ;;  %1648 = vrot.lane.b32.xlu1 %v1547_v38, %s3748_s15  ;;  %v4893_v60 = vpop.xlane.xlu0 %437  ;;  %v1700_v38 = vsel %vm1673_vm13, %v1698_v52, %v1699_v37 }
 0x17f   :  { %7506 = vst [vmem:[#allocation44_spill] sm:$0xff] %v4890_v50  ;;  %7507 = vst [vmem:[#allocation45_spill] sm:$0xff] %v4893_v60  ;;  %1707 = vrot.lane.b32.xlu0 %v1695_v40, %s3743_s9 }
 0x182   :  { %v4901_v45 = vpop.xlane.xlu1 %446  ;;  %1709 = vrot.lane.b32.xlu1 %v1697_v13, %s3743_s9  ;;  %v4904_v50 = vpop.xlane.xlu0 %443 }
 0x183   :  { %7508 = vst [vmem:[#allocation46_spill] sm:$0xff] %v4901_v45  ;;  %7509 = vst [vmem:[#allocation47_spill] sm:$0xff] %v4904_v50  ;;  %1711 = vrot.lane.b32.xlu0 %v1700_v38, %s3743_s9  ;;  %v1851_v50 = vrot.slane %v4794_v25, 3  ;;  %v5016_v45 = vstv %s1382_s17  ;;  %s5545_s17 = sld [smem:[#allocation3 + $0x1b]] }
 0x184   :  { %7538 = vst [vmem:[#allocation75_spill] sm:$0xff] %v5016_v45 }
 0x186   :  { %v4909_v60 = vpop.xlane.xlu1 %452  ;;  %1713 = vrot.lane.b32.xlu1 %v1702_v7, %s3743_s9  ;;  %v4912_v18 = vpop.xlane.xlu0 %449 }
 0x187   :  { %7510 = vst [vmem:[#allocation48_spill] sm:$0xff] %v4909_v60  ;;  %7511 = vst [vmem:[#allocation49_spill] sm:$0xff] %v4912_v18  ;;  %1725 = vrot.lane.b32.xlu0 %v1695_v40, %s3744_s10  ;;  %v1849_v60 = vrot.slane %v4397_v27, 3 }
 0x18a   :  { %v4915_v23 = vpop.xlane.xlu1 %458  ;;  %1727 = vrot.lane.b32.xlu1 %v1697_v13, %s3744_s10  ;;  %v4918_v1 = vpop.xlane.xlu0 %455 }
 0x18b   :  { %7512 = vst [vmem:[#allocation50_spill] sm:$0xff] %v4915_v23  ;;  %7513 = vst [vmem:[#allocation51_spill] sm:$0xff] %v4918_v1  ;;  %1729 = vrot.lane.b32.xlu0 %v1700_v38, %s3744_s10 }
 0x18e   :  { %v4921_v52 = vpop.xlane.xlu1 %464  ;;  %1731 = vrot.lane.b32.xlu1 %v1702_v7, %s3744_s10  ;;  %v4924_v59 = vpop.xlane.xlu0 %461 }
 0x18f   :  { %7514 = vst [vmem:[#allocation52_spill] sm:$0xff] %v4921_v52  ;;  %7515 = vst [vmem:[#allocation53_spill] sm:$0xff] %v4924_v59  ;;  %1743 = vrot.lane.b32.xlu0 %v1695_v40, %s3745_s12 }
 0x192   :  { %v4927_v37 = vpop.xlane.xlu1 %470  ;;  %1745 = vrot.lane.b32.xlu1 %v1697_v13, %s3745_s12  ;;  %v4930_v18 = vpop.xlane.xlu0 %467 }
 0x193   :  { %7516 = vst [vmem:[#allocation54_spill] sm:$0xff] %v4927_v37  ;;  %7517 = vst [vmem:[#allocation55_spill] sm:$0xff] %v4930_v18  ;;  %1747 = vrot.lane.b32.xlu0 %v1700_v38, %s3745_s12 }
 0x196   :  { %v4933_v23 = vpop.xlane.xlu1 %476  ;;  %1749 = vrot.lane.b32.xlu1 %v1702_v7, %s3745_s12  ;;  %v4936_v1 = vpop.xlane.xlu0 %473 }
 0x197   :  { %7518 = vst [vmem:[#allocation56_spill] sm:$0xff] %v4933_v23  ;;  %7519 = vst [vmem:[#allocation57_spill] sm:$0xff] %v4936_v1  ;;  %1761 = vrot.lane.b32.xlu0 %v1695_v40, %s3746_s13 }
 0x19a   :  { %v4939_v52 = vpop.permute.xlu1 %1395  ;;  %1763 = vrot.lane.b32.xlu1 %v1697_v13, %s3746_s13  ;;  %v4942_v59 = vpop.permute.xlu0 %1393 }
 0x19b   :  { %7520 = vst [vmem:[#allocation58_spill] sm:$0xff] %v4939_v52  ;;  %7521 = vst [vmem:[#allocation59_spill] sm:$0xff] %v4942_v59  ;;  %1765 = vrot.lane.b32.xlu0 %v1700_v38, %s3746_s13 }
 0x19e   :  { %v4945_v37 = vpop.permute.xlu1 %1397  ;;  %1767 = vrot.lane.b32.xlu1 %v1702_v7, %s3746_s13  ;;  %v4948_v18 = vpop.permute.xlu0 %1411 }
 0x19f   :  { %7522 = vst [vmem:[#allocation60_spill] sm:$0xff] %v4945_v37  ;;  %7523 = vst [vmem:[#allocation61_spill] sm:$0xff] %v4948_v18  ;;  %1779 = vrot.lane.b32.xlu0 %v1695_v40, %s3747_s14 }
 0x1a2   :  { %v1400_v23 = vpop.permute.xlu1 %1399  ;;  %1781 = vrot.lane.b32.xlu1 %v1697_v13, %s3747_s14  ;;  %v4952_v1 = vpop.permute.xlu0 %1415 }
 0x1a3   :  { %7524 = vst [vmem:[#allocation62_spill] sm:$0xff] %v4952_v1  ;;  %1783 = vrot.lane.b32.xlu0 %v1700_v38, %s3747_s14  ;;  %v1848_v1 = vrot.slane %v4598_v61, 3 }
 0x1a6   :  { %v4955_v52 = vpop.permute.xlu1 %1413  ;;  %1785 = vrot.lane.b32.xlu1 %v1702_v7, %s3747_s14  ;;  %v4958_v59 = vpop.permute.xlu0 %1429 }
 0x1a7   :  { %7525 = vst [vmem:[#allocation63_spill] sm:$0xff] %v4955_v52  ;;  %7526 = vst [vmem:[#allocation64_spill] sm:$0xff] %v4958_v59  ;;  %1797 = vrot.lane.b32.xlu0 %v1695_v40, %s3748_s15  ;;  %v4974_v40 = vsel %vm1828_vm14, %v1848_v1, %v1849_v60 }
 0x1aa   :  { %v1418_v37 = vpop.permute.xlu1 %1417  ;;  %1799 = vrot.lane.b32.xlu1 %v1697_v13, %s3748_s15  ;;  %v4962_v18 = vpop.permute.xlu0 %1433  ;;  %v4979_v13 = vsel %vm1828_vm14, %v1849_v60, %v1851_v50 }
 0x1ab   :  { %7527 = vst [vmem:[#allocation65_spill] sm:$0xff] %v4962_v18  ;;  %1801 = vrot.lane.b32.xlu0 %v1700_v38, %s3748_s15  ;;  %v1853_v38 = vrot.slane %v4607_v28, 3  ;;  %v1423_v20 = vmul.f32 %v5018_v24, %v1418_v37  ;;  %v5037_v24 = vstv %s3579_s20  ;;  %s3606_s20 = sld [smem:[#allocation3 + $0x20]] }
 0x1ae   :  { %v4968_v52 = vpop.permute.xlu1 %1431  ;;  %1803 = vrot.lane.b32.xlu1 %v1702_v7, %s3748_s15  ;;  %v4971_v59 = vpop.permute.xlu0 %1447  ;;  %v7531_v7 = vrot.slane %v4601_v6, 3 }
 0x1af   :  { %7528 = vst [vmem:[#allocation66_spill] sm:$0xff] %v4968_v52  ;;  %7529 = vst [vmem:[#allocation67_spill] sm:$0xff] %v4971_v59  ;;  %1862 = vrot.lane.b32.xlu0 %v4974_v40, %s3743_s9 }
 0x1b0   :  { %v4989_v59 = vsel %vm1828_vm14, %v1853_v38, %v7531_v7  ;;  %v5007_v7 = vstv %s3575_s16  ;;  %s5497_s16 = sld [smem:[#allocation3 + $0x1a]] }
 0x1b1   :  { %7535 = vst [vmem:[#allocation72_spill] sm:$0xff] %v5007_v7 }
 0x1b2   :  { %v1436_v18 = vpop.permute.xlu1 %1435  ;;  %1864 = vrot.lane.b32.xlu1 %v4979_v13, %s3743_s9  ;;  %v4984_v52 = vpop.permute.xlu0 %1451 }
 0x1b3   :  { %7530 = vst [vmem:[#allocation68_spill] sm:$0xff] %v4984_v52  ;;  %1866 = vrot.lane.b32.xlu0 %v4989_v59, %s3743_s9 }
 0x1b6   :  { %v4993_v1 = vpop.permute.xlu1 %1449  ;;  %1868 = vrot.lane.b32.xlu1 %v4718_v16, %s3743_s9  ;;  %v4997_v60 = vpop.permute.xlu0 %1465 }
 0x1b7   :  { %7532 = vst [vmem:[#allocation69_spill] sm:$0xff] %v4993_v1  ;;  %7533 = vst [vmem:[#allocation70_spill] sm:$0xff] %v4997_v60  ;;  %1880 = vrot.lane.b32.xlu0 %v4974_v40, %s3744_s10  ;;  %v1405_v60 = vmul.f32 %v5007_v7, %v1400_v23 }
 0x1ba   :  { %v1454_v50 = vpop.permute.xlu1 %1453  ;;  %1882 = vrot.lane.b32.xlu1 %v4979_v13, %s3744_s10  ;;  %v5003_v38 = vpop.permute.xlu0 %1469 }
 0x1bb   :  { %7534 = vst [vmem:[#allocation71_spill] sm:$0xff] %v5003_v38  ;;  %1884 = vrot.lane.b32.xlu0 %v4989_v59, %s3744_s10  ;;  %v1387_v38 = vmul.f32 %v5016_v45, %v4601_v6  ;;  %v1459_v37 = vmul.f32 %v5032_v34, %v1454_v50 }
 0x1bd   :  { %v1409_v23 = vadd.f32 %v1405_v60, %v1387_v38 }
 0x1be   :  { %v5009_v52 = vpop.permute.xlu1 %1467  ;;  %1886 = vrot.lane.b32.xlu1 %v4718_v16, %s3744_s10  ;;  %v5014_v1 = vpop.permute.xlu0 %1483 }
 0x1bf   :  { %7536 = vst [vmem:[#allocation73_spill] sm:$0xff] %v5009_v52  ;;  %7537 = vst [vmem:[#allocation74_spill] sm:$0xff] %v5014_v1  ;;  %1898 = vrot.lane.b32.xlu0 %v4974_v40, %s3745_s12  ;;  %v5025_v52 = vstv %s3577_s1  ;;  %v1427_v45 = vadd.f32 %v1423_v20, %v1409_v23  ;;  %s3604_s1 = sld [smem:[#allocation3 + $0x1e]] }
 0x1c0   :  { %7540 = vst [vmem:[#allocation77_spill] sm:$0xff] %v5025_v52  ;;  %v1441_v1 = vmul.f32 %v5025_v52, %v1436_v18  ;;  %v5048_v52 = vstv %s3580_s21  ;;  %s3607_s21 = sld [smem:[#allocation3 + $0x21]] }
 0x1c1   :  { %7544 = vst [vmem:[#allocation81_spill] sm:$0xff] %v5048_v52 }
 0x1c2   :  { %v1472_v2 = vpop.permute.xlu1 %1471  ;;  %1900 = vrot.lane.b32.xlu1 %v4979_v13, %s3745_s12  ;;  %v5030_v7 = vpop.permute.xlu0 %1487  ;;  %v1445_v60 = vadd.f32 %v1441_v1, %v1427_v45 }
 0x1c3   :  { %7541 = vst [vmem:[#allocation78_spill] sm:$0xff] %v5030_v7  ;;  %1902 = vrot.lane.b32.xlu0 %v4989_v59, %s3745_s12  ;;  %v1477_v18 = vmul.f32 %v5037_v24, %v1472_v2 }
 0x1c4   :  { %v1463_v7 = vadd.f32 %v1459_v37, %v1445_v60 }
 0x1c6   :  { %v5039_v11 = vpop.permute.xlu1 %1485  ;;  %1904 = vrot.lane.b32.xlu1 %v4718_v16, %s3745_s12  ;;  %v5044_v38 = vpop.permute.xlu0 %1552  ;;  %v1481_v50 = vadd.f32 %v1477_v18, %v1463_v7 }
 0x1c7   :  { %7542 = vst [vmem:[#allocation79_spill] sm:$0xff] %v5039_v11  ;;  %7543 = vst [vmem:[#allocation80_spill] sm:$0xff] %v5044_v38  ;;  %1916 = vrot.lane.b32.xlu0 %v4974_v40, %s3746_s13 }
 0x1ca   :  { %v1490_v20 = vpop.permute.xlu1 %1489  ;;  %1918 = vrot.lane.b32.xlu1 %v4979_v13, %s3746_s13  ;;  %v5053_v11 = vpop.permute.xlu0 %1556 }
 0x1cb   :  { %v1495_v23 = vmul.f32 %v5048_v52, %v1490_v20  ;;  %7545 = vst [vmem:[#allocation82_spill] sm:$0xff] %v5053_v11  ;;  %1920 = vrot.lane.b32.xlu0 %v4989_v59, %s3746_s13  ;;  %v7555_v11 = vrot.slane %v4601_v6, 4 }
 0x1cd   :  { %v1499_v2 = vadd.f32 %v1495_v23, %v1481_v50  ;;  %v2004_v23 = vrot.slane %v4397_v27, 4 }
 0x1ce   :  { %v5057_v45 = vpop.permute.xlu1 %1554  ;;  %1922 = vrot.lane.b32.xlu1 %v4718_v16, %s3746_s13  ;;  %v5062_v37 = vpop.permute.xlu0 %1570 }
 0x1cf   :  { %7546 = vst [vmem:[#allocation83_spill] sm:$0xff] %v5057_v45  ;;  %v1532_v1 = vadd.f32 %v4646_v22, %v1499_v2  ;;  %7547 = vst [vmem:[#allocation84_spill] sm:$0xff] %v5062_v37  ;;  %1934 = vrot.lane.b32.xlu0 %v4974_v40, %s3747_s14  ;;  %v2003_v2 = vrot.slane %v4598_v61, 4 }
 0x1d2   :  { %1936 = vrot.lane.b32.xlu1 %v4979_v13, %s3747_s14  ;;  %v1559_v7 = vpop.permute.xlu1 %1558  ;;  %v5068_v60 = vpop.permute.xlu0 %1574 }
 0x1d3   :  { %7548 = vst [vmem:[#allocation85_spill] sm:$0xff] %v5068_v60  ;;  %1938 = vrot.lane.b32.xlu0 %v4989_v59, %s3747_s14  ;;  %v2006_v60 = vrot.slane %v4794_v25, 4 }
 0x1d6   :  { %1940 = vrot.lane.b32.xlu1 %v4718_v16, %s3747_s14  ;;  %v5074_v18 = vpop.permute.xlu1 %1572  ;;  %v5076_v22 = vpop.permute.xlu0 %1588 }
 0x1d7   :  { %7549 = vst [vmem:[#allocation86_spill] sm:$0xff] %v5074_v18  ;;  %7550 = vst [vmem:[#allocation87_spill] sm:$0xff] %v5076_v22  ;;  %1952 = vrot.lane.b32.xlu0 %v4974_v40, %s3748_s15 }
 0x1da   :  { %1954 = vrot.lane.b32.xlu1 %v4979_v13, %s3748_s15  ;;  %v1577_v20 = vpop.permute.xlu1 %1576  ;;  %v5082_v50 = vpop.permute.xlu0 %1592  ;;  %v5096_v13 = vsel %vm1983_vm15, %v2003_v2, %v2004_v23 }
 0x1db   :  { %7551 = vst [vmem:[#allocation88_spill] sm:$0xff] %v5082_v50  ;;  %1956 = vrot.lane.b32.xlu0 %v4989_v59, %s3748_s15  ;;  %v5101_v50 = vsel %vm1983_vm15, %v2004_v23, %v2006_v60  ;;  %v2008_v59 = vrot.slane %v4607_v28, 4 }
 0x1de   :  { %1958 = vrot.lane.b32.xlu1 %v4718_v16, %s3748_s15  ;;  %v5091_v22 = vpop.permute.xlu1 %1590  ;;  %v5093_v40 = vpop.permute.xlu0 %1606 }
 0x1df   :  { %7552 = vst [vmem:[#allocation89_spill] sm:$0xff] %v5091_v22  ;;  %7553 = vst [vmem:[#allocation90_spill] sm:$0xff] %v5093_v40  ;;  %2017 = vrot.lane.b32.xlu0 %v5096_v13, %s3743_s9  ;;  %v5111_v40 = vsel %vm1983_vm15, %v2008_v59, %v7555_v11  ;;  %v5129_v59 = vstv %s3582_s22  ;;  %v5143_v22 = vstv %s3584_s24  ;;  %s3608_s22 = sld [smem:[#allocation3 + $0x22]] }
 0x1e0   :  { %7559 = vst [vmem:[#allocation95_spill] sm:$0xff] %v5129_v59  ;;  %7563 = vst [vmem:[#allocation99_spill] sm:$0xff] %v5143_v22  ;;  %s3611_s24 = sld [smem:[#allocation3 + $0x25]] }
 0x1e2   :  { %2019 = vrot.lane.b32.xlu1 %v5101_v50, %s3743_s9  ;;  %v1595_v37 = vpop.permute.xlu1 %1594  ;;  %v5106_v16 = vpop.permute.xlu0 %1610 }
 0x1e3   :  { %7554 = vst [vmem:[#allocation91_spill] sm:$0xff] %v5106_v16  ;;  %2021 = vrot.lane.b32.xlu0 %v5111_v40, %s3743_s9  ;;  %v1564_v16 = vmul.f32 %v5129_v59, %v1559_v7 }
 0x1e5   :  { %v1568_v45 = vadd.f32 %v1564_v16, %v1532_v1 }
 0x1e6   :  { %2023 = vrot.lane.b32.xlu1 %v4727_v17, %s3743_s9  ;;  %v5117_v60 = vpop.permute.xlu1 %1608  ;;  %v5119_v23 = vpop.permute.xlu0 %1624 }
 0x1e7   :  { %7556 = vst [vmem:[#allocation92_spill] sm:$0xff] %v5117_v60  ;;  %7557 = vst [vmem:[#allocation93_spill] sm:$0xff] %v5119_v23  ;;  %2035 = vrot.lane.b32.xlu0 %v5096_v13, %s3744_s10  ;;  %v5138_v60 = vstv %s3583_s23  ;;  %s3610_s23 = sld [smem:[#allocation3 + $0x24]] }
 0x1e8   :  { %7562 = vst [vmem:[#allocation98_spill] sm:$0xff] %v5138_v60 }
 0x1ea   :  { %2037 = vrot.lane.b32.xlu1 %v5101_v50, %s3744_s10  ;;  %v1613_v11 = vpop.permute.xlu1 %1612  ;;  %v5125_v2 = vpop.permute.xlu0 %1628 }
 0x1eb   :  { %7558 = vst [vmem:[#allocation94_spill] sm:$0xff] %v5125_v2  ;;  %2039 = vrot.lane.b32.xlu0 %v5111_v40, %s3744_s10  ;;  %v1582_v2 = vmul.f32 %v5138_v60, %v1577_v20  ;;  %v5155_v60 = vstv %s3586_s26  ;;  %s3613_s26 = sld [smem:[#allocation3 + $0x27]] }
 0x1ec   :  { %7566 = vst [vmem:[#allocation102_spill] sm:$0xff] %v5155_v60 }
 0x1ed   :  { %v1586_v59 = vadd.f32 %v1582_v2, %v1568_v45 }
 0x1ee   :  { %2041 = vrot.lane.b32.xlu1 %v4727_v17, %s3744_s10  ;;  %v5133_v23 = vpop.permute.xlu1 %1626  ;;  %v5136_v38 = vpop.permute.xlu0 %1642 }
 0x1ef   :  { %7560 = vst [vmem:[#allocation96_spill] sm:$0xff] %v5133_v23  ;;  %7561 = vst [vmem:[#allocation97_spill] sm:$0xff] %v5136_v38  ;;  %2053 = vrot.lane.b32.xlu0 %v5096_v13, %s3745_s12  ;;  %v1600_v23 = vmul.f32 %v5143_v22, %v1595_v37  ;;  %v5150_v38 = vstv %s3585_s25  ;;  %v5166_v22 = vstv %s3587_s27  ;;  %s3612_s25 = sld [smem:[#allocation3 + $0x26]] }
 0x1f0   :  { %7565 = vst [vmem:[#allocation101_spill] sm:$0xff] %v5150_v38  ;;  %v1618_v20 = vmul.f32 %v5150_v38, %v1613_v11  ;;  %7568 = vst [vmem:[#allocation104_spill] sm:$0xff] %v5166_v22  ;;  %s3614_s27 = sld [smem:[#allocation3 + $0x28]] }
 0x1f1   :  { %v1604_v1 = vadd.f32 %v1600_v23, %v1586_v59 }
 0x1f2   :  { %2055 = vrot.lane.b32.xlu1 %v5101_v50, %s3745_s12  ;;  %v1631_v18 = vpop.permute.xlu1 %1630  ;;  %v5148_v7 = vpop.permute.xlu0 %1646 }
 0x1f3   :  { %7564 = vst [vmem:[#allocation100_spill] sm:$0xff] %v5148_v7  ;;  %2057 = vrot.lane.b32.xlu0 %v5111_v40, %s3745_s12  ;;  %v1636_v37 = vmul.f32 %v5155_v60, %v1631_v18  ;;  %v1622_v7 = vadd.f32 %v1618_v20, %v1604_v1 }
 0x1f5   :  { %v1640_v11 = vadd.f32 %v1636_v37, %v1622_v7 }
 0x1f6   :  { %2059 = vrot.lane.b32.xlu1 %v4727_v17, %s3745_s12  ;;  %v5159_v52 = vpop.permute.xlu1 %1644  ;;  %v5162_v16 = vpop.permute.xlu0 %1707 }
 0x1f7   :  { %7567 = vst [vmem:[#allocation103_spill] sm:$0xff] %v5162_v16  ;;  %2071 = vrot.lane.b32.xlu0 %v5096_v13, %s3746_s13 }
 0x1fa   :  { %2073 = vrot.lane.b32.xlu1 %v5101_v50, %s3746_s13  ;;  %v1649_v45 = vpop.permute.xlu1 %1648  ;;  %v5171_v38 = vpop.permute.xlu0 %1711 }
 0x1fb   :  { %v1654_v2 = vmul.f32 %v5166_v22, %v1649_v45  ;;  %7569 = vst [vmem:[#allocation105_spill] sm:$0xff] %v5171_v38  ;;  %2075 = vrot.lane.b32.xlu0 %v5111_v40, %s3746_s13  ;;  %v7579_v38 = vrot.slane %v4601_v6, 5 }
 0x1fd   :  { %v1658_v18 = vadd.f32 %v1654_v2, %v1640_v11  ;;  %v2158_v2 = vrot.slane %v4397_v27, 5 }
 0x1fe   :  { %2077 = vrot.lane.b32.xlu1 %v4727_v17, %s3746_s13  ;;  %v5177_v23 = vpop.permute.xlu1 %1709  ;;  %v5180_v20 = vpop.permute.xlu0 %1725 }
 0x1ff   :  { %7570 = vst [vmem:[#allocation106_spill] sm:$0xff] %v5177_v23  ;;  %v1691_v59 = vadd.f32 %v4657_v48, %v1658_v18  ;;  %7571 = vst [vmem:[#allocation107_spill] sm:$0xff] %v5180_v20  ;;  %2089 = vrot.lane.b32.xlu0 %v5096_v13, %s3747_s14  ;;  %v2157_v18 = vrot.slane %v4598_v61, 5 }
 0x202   :  { %2091 = vrot.lane.b32.xlu1 %v5101_v50, %s3747_s14  ;;  %v1714_v7 = vpop.permute.xlu1 %1713  ;;  %v5186_v1 = vpop.permute.xlu0 %1729 }
 0x203   :  { %7572 = vst [vmem:[#allocation108_spill] sm:$0xff] %v5186_v1  ;;  %2093 = vrot.lane.b32.xlu0 %v5111_v40, %s3747_s14  ;;  %v2160_v1 = vrot.slane %v4794_v25, 5 }
 0x206   :  { %2095 = vrot.lane.b32.xlu1 %v4727_v17, %s3747_s14  ;;  %v5192_v37 = vpop.permute.xlu1 %1727  ;;  %v5194_v48 = vpop.permute.xlu0 %1743 }
 0x207   :  { %7573 = vst [vmem:[#allocation109_spill] sm:$0xff] %v5192_v37  ;;  %7574 = vst [vmem:[#allocation110_spill] sm:$0xff] %v5194_v48  ;;  %2107 = vrot.lane.b32.xlu0 %v5096_v13, %s3748_s15 }
 0x20a   :  { %2109 = vrot.lane.b32.xlu1 %v5101_v50, %s3748_s15  ;;  %v1732_v45 = vpop.permute.xlu1 %1731  ;;  %v5200_v11 = vpop.permute.xlu0 %1747  ;;  %v5214_v50 = vsel %vm953_vm11, %v2157_v18, %v2158_v2 }
 0x20b   :  { %7575 = vst [vmem:[#allocation111_spill] sm:$0xff] %v5200_v11  ;;  %2111 = vrot.lane.b32.xlu0 %v5111_v40, %s3748_s15  ;;  %v5219_v11 = vsel %vm953_vm11, %v2158_v2, %v2160_v1  ;;  %v2162_v40 = vrot.slane %v4607_v28, 5 }
 0x20e   :  { %2113 = vrot.lane.b32.xlu1 %v4727_v17, %s3748_s15  ;;  %v5209_v48 = vpop.permute.xlu1 %1745  ;;  %v5211_v13 = vpop.permute.xlu0 %1761 }
 0x20f   :  { %7576 = vst [vmem:[#allocation112_spill] sm:$0xff] %v5209_v48  ;;  %7577 = vst [vmem:[#allocation113_spill] sm:$0xff] %v5211_v13  ;;  %2171 = vrot.lane.b32.xlu0 %v5214_v50, %s3743_s9  ;;  %v5229_v13 = vsel %vm953_vm11, %v2162_v40, %v7579_v38  ;;  %v5247_v40 = vstv %s3589_s28  ;;  %v5261_v48 = vstv %s3591_s30  ;;  %s3615_s28 = sld [smem:[#allocation3 + $0x29]] }
 0x210   :  { %7583 = vst [vmem:[#allocation118_spill] sm:$0xff] %v5247_v40  ;;  %7587 = vst [vmem:[#allocation122_spill] sm:$0xff] %v5261_v48  ;;  %s6240_s30 = sld [smem:[#allocation3 + $0x38]] }
 0x212   :  { %2173 = vrot.lane.b32.xlu1 %v5219_v11, %s3743_s9  ;;  %v1750_v20 = vpop.permute.xlu1 %1749  ;;  %v5224_v17 = vpop.permute.xlu0 %1765 }
 0x213   :  { %7578 = vst [vmem:[#allocation114_spill] sm:$0xff] %v5224_v17  ;;  %2175 = vrot.lane.b32.xlu0 %v5229_v13, %s3743_s9  ;;  %v1719_v17 = vmul.f32 %v5247_v40, %v1714_v7 }
 0x215   :  { %v1723_v23 = vadd.f32 %v1719_v17, %v1691_v59 }
 0x216   :  { %2177 = vrot.lane.b32.xlu1 %v4732_v41, %s3743_s9  ;;  %v5235_v1 = vpop.permute.xlu1 %1763  ;;  %v5237_v2 = vpop.permute.xlu0 %1779 }
 0x217   :  { %7580 = vst [vmem:[#allocation115_spill] sm:$0xff] %v5235_v1  ;;  %7581 = vst [vmem:[#allocation116_spill] sm:$0xff] %v5237_v2  ;;  %2189 = vrot.lane.b32.xlu0 %v5214_v50, %s3744_s10  ;;  %v5256_v1 = vstv %s3590_s29  ;;  %s6227_s29 = sld [smem:[#allocation3 + $0x31]] }
 0x218   :  { %7586 = vst [vmem:[#allocation121_spill] sm:$0xff] %v5256_v1 }
 0x21a   :  { %2191 = vrot.lane.b32.xlu1 %v5219_v11, %s3744_s10  ;;  %v1768_v38 = vpop.permute.xlu1 %1767  ;;  %v5243_v18 = vpop.permute.xlu0 %1783 }
 0x21b   :  { %7582 = vst [vmem:[#allocation117_spill] sm:$0xff] %v5243_v18  ;;  %2193 = vrot.lane.b32.xlu0 %v5229_v13, %s3744_s10  ;;  %v1737_v18 = vmul.f32 %v5256_v1, %v1732_v45  ;;  %v5273_v1 = vstv %s3593_s0  ;;  %s6294_s0 = sld [smem:[#allocation3 + $0x2c]] }
 0x21c   :  { %7590 = vst [vmem:[#allocation125_spill] sm:$0xff] %v5273_v1 }
 0x21d   :  { %v1741_v40 = vadd.f32 %v1737_v18, %v1723_v23 }
 0x21e   :  { %2195 = vrot.lane.b32.xlu1 %v4732_v41, %s3744_s10  ;;  %v5251_v2 = vpop.permute.xlu1 %1781  ;;  %v5254_v16 = vpop.permute.xlu0 %1797 }
 0x21f   :  { %7584 = vst [vmem:[#allocation119_spill] sm:$0xff] %v5251_v2  ;;  %7585 = vst [vmem:[#allocation120_spill] sm:$0xff] %v5254_v16  ;;  %2207 = vrot.lane.b32.xlu0 %v5214_v50, %s3745_s12  ;;  %v1755_v2 = vmul.f32 %v5261_v48, %v1750_v20  ;;  %v5268_v16 = vstv %s3592_s4  ;;  %v5284_v48 = vstv %s3594_s5  ;;  %s6279_s4 = sld [smem:[#allocation3 + $0x2b]] }
 0x220   :  { %7589 = vst [vmem:[#allocation124_spill] sm:$0xff] %v5268_v16  ;;  %v1773_v45 = vmul.f32 %v5268_v16, %v1768_v38  ;;  %7592 = vst [vmem:[#allocation127_spill] sm:$0xff] %v5284_v48  ;;  %s6315_s5 = sld [smem:[#allocation3 + $0x2d]] }
 0x221   :  { %v1759_v59 = vadd.f32 %v1755_v2, %v1741_v40  ;;  %v481_v2 = vmul.f32 0.125, %v4593_v58  ;;  %v486_v58 = vmul.f32 0.125, %v4672_v21 }
 0x222   :  { %2209 = vrot.lane.b32.xlu1 %v5219_v11, %s3745_s12  ;;  %v1786_v37 = vpop.permute.xlu1 %1785  ;;  %v5266_v7 = vpop.permute.xlu0 %1801 }
 0x223   :  { %7588 = vst [vmem:[#allocation123_spill] sm:$0xff] %v5266_v7  ;;  %2211 = vrot.lane.b32.xlu0 %v5229_v13, %s3745_s12  ;;  %v1791_v20 = vmul.f32 %v5273_v1, %v1786_v37  ;;  %v1777_v7 = vadd.f32 %v1773_v45, %v1759_v59  ;;  %v482_v37 = vmul.f32 0.125, %v4589_v14  ;;  %v480_v45 = vmul.f32 0.125, %v4571_v42 }
 0x224   :  { %v479_v59 = vmul.f32 0.125, %v4573_v43  ;;  %v485_v42 = vmul.f32 0.125, %v4676_v19  ;;  %v488_v19 = vmul.f32 0.125, %v4685_v5 }
 0x225   :  { %v1795_v38 = vadd.f32 %v1791_v20, %v1777_v7  ;;  %v483_v7 = vmul.f32 0.125, %v4639_v47  ;;  %v1050_v43 = vrot.slane %v482_v37, %v4241_v31  ;;  %v1041_v47 = vrot.slane %v480_v45, %v4241_v31 }
 0x226   :  { %2213 = vrot.lane.b32.xlu1 %v4732_v41, %s3745_s12  ;;  %v5277_v22 = vpop.permute.xlu1 %1799  ;;  %v5280_v17 = vpop.permute.xlu0 %1862  ;;  %v490_v37 = vmul.f32 0.125, %v4693_v26  ;;  %v2313_v26 = vrot.slane %v4397_v27, 6 }
 0x227   :  { %7591 = vst [vmem:[#allocation126_spill] sm:$0xff] %v5280_v17  ;;  %2225 = vrot.lane.b32.xlu0 %v5214_v50, %s3746_s13  ;;  %v484_v17 = vmul.f32 0.125, %v4635_v8  ;;  %v1046_v8 = vrot.slane %v481_v2, %v4239_v30  ;;  %v489_v2 = vmul.f32 0.125, %v4697_v36  ;;  %v1077_v36 = vrot.slane %v488_v19, %v4241_v31 }
 0x228   :  { %v498_v19 = vmul.f32 0.125, %v4767_v56 }
 0x22a   :  { %2227 = vrot.lane.b32.xlu1 %v5219_v11, %s3746_s13  ;;  %v1804_v23 = vpop.permute.xlu1 %1803  ;;  %v5289_v16 = vpop.permute.xlu0 %1866 }
 0x22b   :  { %v1809_v18 = vmul.f32 %v5284_v48, %v1804_v23  ;;  %7593 = vst [vmem:[#allocation128_spill] sm:$0xff] %v5289_v16  ;;  %2229 = vrot.lane.b32.xlu0 %v5229_v13, %s3746_s13 }
 0x22d   :  { %v1813_v40 = vadd.f32 %v1809_v18, %v1795_v38  ;;  %v1037_v38 = vrot.slane %v479_v59, %v4239_v30  ;;  %v1055_v18 = vrot.slane %v483_v7, %v4239_v30  ;;  %v1068_v59 = vrot.slane %v486_v58, %v4241_v31 }
 0x22e   :  { %2231 = vrot.lane.b32.xlu1 %v4732_v41, %s3746_s13  ;;  %v5301_v20 = vpop.permute.xlu1 %1864  ;;  %v5306_v14 = vpop.permute.xlu0 %1880  ;;  %v1051_v7 = vsel %vm619_vm1, %v1050_v43, %v1046_v8 }
 0x22f   :  { %v5304_v23 = vadd.f32 %v4662_v49, %v1813_v40  ;;  %7594 = vst [vmem:[#allocation129_spill] sm:$0xff] %v5306_v14  ;;  %2243 = vrot.lane.b32.xlu0 %v5214_v50, %s3747_s14  ;;  %v1059_v49 = vrot.slane %v484_v17, %v4241_v31  ;;  %v487_v40 = vmul.f32 0.125, %v4689_v63  ;;  %v1064_v17 = vrot.slane %v485_v42, %v4239_v30 }
 0x230   :  { %v1042_v14 = vsel %vm619_vm1, %v1041_v47, %v1037_v38  ;;  %v1086_v42 = vrot.slane %v490_v37, %v4241_v31  ;;  %v2312_v38 = vrot.slane %v4598_v61, 6  ;;  %v7643_v61 = vld [vmem:[#allocation55_spill] sm:$0xff] }
 0x231   :  { %v1060_v5 = vsel %vm619_vm1, %v1059_v49, %v1055_v18  ;;  %v1073_v58 = vrot.slane %v487_v40, %v4239_v30  ;;  %v1322_v8 = vsel %vm900_vm2, %v1051_v7, %v1042_v14  ;;  %v1069_v47 = vsel %vm619_vm1, %v1068_v59, %v1064_v17 }
 0x232   :  { %2245 = vrot.lane.b32.xlu1 %v5219_v11, %s3747_s14  ;;  %v5320_v21 = vpop.permute.xlu1 %1868  ;;  %v5326_v45 = vpop.permute.xlu0 %1884  ;;  %v496_v49 = vmul.f32 0.125, %v4754_v32  ;;  %v495_v18 = vmul.f32 0.125, %v4758_v62  ;;  %v497_v40 = vmul.f32 0.125, %v4771_v57  ;;  %v1323_v37 = vsel %vm902_vm3, %v1060_v5, %v1322_v8 }
 0x233   :  { %7595 = vst [vmem:[#allocation130_spill] sm:$0xff] %v5326_v45  ;;  %2247 = vrot.lane.b32.xlu0 %v5229_v13, %s3747_s14  ;;  %v1082_v45 = vrot.slane %v489_v2, %v4239_v30  ;;  %v500_v2 = vmul.f32 0.125, %v4775_v51  ;;  %v499_v14 = vmul.f32 0.125, %v4779_v44  ;;  %v2315_v59 = vrot.slane %v4794_v25, 6 }
 0x234   :  { %v1324_v32 = vsel %vm904_vm4, %v1069_v47, %v1323_v37  ;;  %v1078_v62 = vsel %vm619_vm1, %v1077_v36, %v1073_v58  ;;  %v5369_v17 = vsel %vm2292_vm0, %v2312_v38, %v2313_v26  ;;  %v492_v51 = vmul.f32 0.125, %v4709_v35 }
 0x235   :  { %v1087_v56 = vsel %vm619_vm1, %v1086_v42, %v1082_v45  ;;  %v491_v44 = vmul.f32 0.125, %v4713_v15  ;;  %v493_v7 = vmul.f32 0.125, %v4739_v4  ;;  %v1113_v5 = vrot.slane %v496_v49, %v4241_v31 }
 0x236   :  { %2249 = vrot.lane.b32.xlu1 %v4732_v41, %s3747_s14  ;;  %v5337_v63 = vpop.permute.xlu1 %1882  ;;  %v5344_v43 = vpop.permute.xlu0 %1898  ;;  %v1109_v45 = vrot.slane %v495_v18, %v4239_v30  ;;  %v1122_v36 = vrot.slane %v498_v19, %v4241_v31  ;;  %v1118_v58 = vrot.slane %v497_v40, %v4239_v30  ;;  %v1131_v42 = vrot.slane %v500_v2, %v4241_v31 }
 0x237   :  { %7596 = vst [vmem:[#allocation131_spill] sm:$0xff] %v5344_v43  ;;  %2261 = vrot.lane.b32.xlu0 %v5214_v50, %s3748_s15  ;;  %v1127_v35 = vrot.slane %v499_v14, %v4239_v30  ;;  %v502_v15 = vmul.f32 0.125, %v4783_v54  ;;  %v504_v8 = vmul.f32 0.125, %v4796_v0  ;;  %v503_v47 = vmul.f32 0.125, %v4800_v12  ;;  %v7637_v43 = vld [vmem:[#allocation51_spill] sm:$0xff] }
 0x238   :  { %v2317_v49 = vrot.slane %v4607_v28, 6  ;;  %v1095_v54 = vrot.slane %v492_v51, %v4241_v31  ;;  %v1100_v12 = vrot.slane %v493_v7, %v4239_v30  ;;  %v1123_v19 = vsel %vm619_vm1, %v1122_v36, %v1118_v58 }
 0x239   :  { %v7599_v40 = vrot.slane %v4601_v6, 6  ;;  %v1114_v2 = vsel %vm619_vm1, %v1113_v5, %v1109_v45  ;;  %v1132_v14 = vsel %vm619_vm1, %v1131_v42, %v1127_v35  ;;  %v1145_v6 = vrot.slane %v503_v47, %v4239_v30 }
 0x23a   :  { %2263 = vrot.lane.b32.xlu1 %v5219_v11, %s3748_s15  ;;  %v5360_v50 = vpop.permute.xlu1 %1886  ;;  %v5366_v57 = vpop.permute.xlu0 %1902  ;;  %v494_v11 = vmul.f32 0.125, %v4735_v3  ;;  %v501_v3 = vmul.f32 0.125, %v4787_v10  ;;  %v1091_v10 = vrot.slane %v491_v44, %v4239_v30  ;;  %v505_v51 = vmul.f32 0.125, %v4811_v53  ;;  %v7601_v53 = vld [vmem:[#allocation29_spill] sm:$0xff] }
 0x23b   :  { %7597 = vst [vmem:[#allocation132_spill] sm:$0xff] %v5366_v57  ;;  %2265 = vrot.lane.b32.xlu0 %v5229_v13, %s3748_s15  ;;  %v1325_v13 = vsel %vm906_vm5, %v1078_v62, %v1324_v32  ;;  %v5409_v37 = vsel %vm2292_vm0, %v2317_v49, %v7599_v40  ;;  %v1140_v32 = vrot.slane %v502_v15, %v4241_v31  ;;  %v508_v5 = vmul.f32 0.125, %v4819_v9  ;;  %v7603_v9 = vld [vmem:[#allocation31_spill] sm:$0xff]  ;;  %v7607_v40 = vld [vmem:[#allocation28_spill] sm:$0xff] }
 0x23c   :  { %v1326_v18 = vsel %vm908_vm6, %v1087_v56, %v1325_v13  ;;  %v1104_v0 = vrot.slane %v494_v11, %v4241_v31  ;;  %v1149_v62 = vrot.slane %v504_v8, %v4241_v31  ;;  %v506_v56 = vmul.f32 0.125, %v4807_v46 }
 0x23d   :  { %v1096_v11 = vsel %vm619_vm1, %v1095_v54, %v1091_v10  ;;  %v1329_v7 = vsel %vm900_vm2, %v1123_v19, %v1114_v2  ;;  %v507_v45 = vmul.f32 0.125, %v4822_v39  ;;  %v512_v36 = vmul.f32 0.125, %v4833_v33  ;;  %v7604_v39 = vld [vmem:[#allocation25_spill] sm:$0xff] }
 0x23e   :  { %2267 = vrot.lane.b32.xlu1 %v4732_v41, %s3748_s15  ;;  %v5387_v4 = vpop.permute.xlu1 %1900  ;;  %v5392_v38 = vpop.permute.xlu0 %1916  ;;  %v5401_v41 = vsel %vm2292_vm0, %v2313_v26, %v2315_v59  ;;  %v1136_v26 = vrot.slane %v501_v3, %v4239_v30  ;;  %v511_v58 = vmul.f32 0.125, %v4836_v29  ;;  %v514_v46 = vmul.f32 0.125, %v4839_v55  ;;  %v7602_v3 = vld [vmem:[#allocation30_spill] sm:$0xff] }
 0x23f   :  { %7598 = vst [vmem:[#allocation133_spill] sm:$0xff] %v5392_v38  ;;  %2326 = vrot.lane.b32.xlu0 %v5369_v17, %s3743_s9  ;;  %v513_v42 = vmul.f32 0.125, %v7601_v53  ;;  %v1105_v35 = vsel %vm619_vm1, %v1104_v0, %v1100_v12  ;;  %v1330_v15 = vsel %vm902_vm3, %v1132_v14, %v1329_v7  ;;  %v516_v13 = vmul.f32 0.125, %v7602_v3  ;;  %v7606_v12 = vld [vmem:[#allocation27_spill] sm:$0xff]  ;;  %v7610_v53 = vld [vmem:[#allocation34_spill] sm:$0xff] }
 0x240   :  { %v515_v8 = vmul.f32 0.125, %v7603_v9  ;;  %v1141_v29 = vsel %vm619_vm1, %v1140_v32, %v1136_v26  ;;  %v1150_v55 = vsel %vm619_vm1, %v1149_v62, %v1145_v6  ;;  %v1158_v47 = vrot.slane %v506_v56, %v4241_v31  ;;  %v7611_v3 = vld [vmem:[#allocation35_spill] sm:$0xff] }
 0x241   :  { %v1154_v49 = vrot.slane %v505_v51, %v4239_v30  ;;  %v1167_v10 = vrot.slane %v508_v5, %v4241_v31  ;;  %v1163_v0 = vrot.slane %v507_v45, %v4239_v30  ;;  %v510_v19 = vmul.f32 0.125, %v7606_v12  ;;  %v7608_v51 = vld [vmem:[#allocation32_spill] sm:$0xff]  ;;  %v7609_v5 = vld [vmem:[#allocation33_spill] sm:$0xff] }
 0x242   :  { %2328 = vrot.lane.b32.xlu1 %v5401_v41, %s3743_s9  ;;  %v5417_v59 = vpop.permute.xlu1 %1904  ;;  %v5423_v44 = vpop.permute.xlu0 %1920  ;;  %v509_v2 = vmul.f32 0.125, %v7607_v40  ;;  %v1185_v14 = vrot.slane %v512_v36, %v4241_v31  ;;  %v1181_v32 = vrot.slane %v511_v58, %v4239_v30  ;;  %v1194_v26 = vrot.slane %v514_v46, %v4241_v31 }
 0x243   :  { %7600 = vst [vmem:[#allocation134_spill] sm:$0xff] %v5423_v44  ;;  %2330 = vrot.lane.b32.xlu0 %v5409_v37, %s3743_s9  ;;  %v1190_v62 = vrot.slane %v513_v42, %v4239_v30  ;;  %v1203_v6 = vrot.slane %v516_v13, %v4241_v31  ;;  %v1199_v56 = vrot.slane %v515_v8, %v4239_v30  ;;  %v518_v7 = vmul.f32 0.125, %v7608_v51 }
 0x244   :  { %v517_v45 = vmul.f32 0.125, %v7609_v5  ;;  %v1327_v58 = vsel %vm910_vm7, %v1096_v11, %v1326_v18  ;;  %v1331_v46 = vsel %vm904_vm4, %v1141_v29, %v1330_v15  ;;  %v520_v42 = vmul.f32 0.125, %v7610_v53 }
 0x245   :  { %v519_v13 = vmul.f32 0.125, %v7611_v3  ;;  %v5478_v8 = vsel %vm912_vm8, %v1105_v35, %v1327_v58  ;;  %v1332_v12 = vsel %vm906_vm5, %v1150_v55, %v1331_v46  ;;  %v1159_v40 = vsel %vm619_vm1, %v1158_v47, %v1154_v49 }
 0x246   :  { %2332 = vrot.lane.b32.xlu1 %v7604_v39, %s3743_s9  ;;  %v5443_v33 = vpop.permute.xlu1 %1918  ;;  %v5449_v54 = vpop.permute.xlu0 %1934  ;;  %v1168_v51 = vsel %vm619_vm1, %v1167_v10, %v1163_v0  ;;  %v1176_v18 = vrot.slane %v510_v19, %v4241_v31  ;;  %v1172_v11 = vrot.slane %v509_v2, %v4239_v30  ;;  %v1186_v15 = vsel %vm619_vm1, %v1185_v14, %v1181_v32  ;;  %v7614_v2 = vld [vmem:[#allocation36_spill] sm:$0xff] }
 0x247   :  { %7605 = vst [vmem:[#allocation29_spill] sm:$0xff] %v5449_v54  ;;  %2344 = vrot.lane.b32.xlu0 %v5369_v17, %s3744_s10  ;;  %v1195_v35 = vsel %vm619_vm1, %v1194_v26, %v1190_v62  ;;  %v1204_v29 = vsel %vm619_vm1, %v1203_v6, %v1199_v56  ;;  %v1212_v55 = vrot.slane %v518_v7, %v4241_v31  ;;  %v5495_v49 = vstv %s5439_s6  ;;  %v7616_v56 = vld [vmem:[#allocation37_spill] sm:$0xff]  ;;  %s6334_s6 = sld [smem:[#allocation3 + $0x2e]] }
 0x248   :  { %v1208_v47 = vrot.slane %v517_v45, %v4239_v30  ;;  %7613 = vst [vmem:[#allocation31_spill] sm:$0xff] %v5495_v49  ;;  %v1221_v0 = vrot.slane %v520_v42, %v4241_v31  ;;  %v1217_v19 = vrot.slane %v519_v13, %v4239_v30  ;;  %v5506_v14 = vmul.f32 0.125, %v7614_v2  ;;  %v7618_v42 = vld [vmem:[#allocation38_spill] sm:$0xff]  ;;  %v7619_v13 = vld [vmem:[#allocation39_spill] sm:$0xff] }
 0x249   :  { %v1874_v32 = vmul.f32 %v5495_v49, %v5320_v21  ;;  %v1333_v62 = vsel %vm908_vm6, %v1159_v40, %v1332_v12  ;;  %v1336_v6 = vsel %vm900_vm2, %v1195_v35, %v1186_v15  ;;  %v5515_v7 = vmul.f32 0.125, %v7616_v56  ;;  %v7623_v2 = vld [vmem:[#allocation43_spill] sm:$0xff] }
 0x24a   :  { %2346 = vrot.lane.b32.xlu1 %v5401_v41, %s3744_s10  ;;  %v1923_v36 = vpop.permute.xlu1 %1922  ;;  %v5475_v9 = vpop.permute.xlu0 %1938  ;;  %v5518_v5 = vstv %s5455_s7  ;;  %v5523_v45 = vsel %vm910_vm7, %v1168_v51, %v1333_v62  ;;  %v5526_v58 = vsel %vm619_vm1, %v1176_v18, %v1172_v11  ;;  %v5529_v21 = vsel %vm902_vm3, %v1204_v29, %v1336_v6  ;;  %v7626_v62 = vld [vmem:[#allocation45_spill] sm:$0xff]  ;;  %s6350_s7 = sld [smem:[#allocation3 + $0x2f]] }
 0x24b   :  { %7612 = vst [vmem:[#allocation30_spill] sm:$0xff] %v5475_v9  ;;  %2348 = vrot.lane.b32.xlu0 %v5409_v37, %s3744_s10  ;;  %7617 = vst [vmem:[#allocation27_spill] sm:$0xff] %v5518_v5  ;;  %v1892_v46 = vmul.f32 %v5518_v5, %v5360_v50  ;;  %v5534_v53 = vsel %vm619_vm1, %v1212_v55, %v1208_v47  ;;  %v5537_v3 = vmul.f32 0.125, %v7618_v42  ;;  %v5540_v12 = vmul.f32 0.125, %v7619_v13  ;;  %v7622_v55 = vld [vmem:[#allocation42_spill] sm:$0xff]  ;;  %v7634_v9 = vld [vmem:[#allocation48_spill] sm:$0xff] }
 0x24c   :  { %v5543_v40 = vstv %s5467_s8  ;;  %v5550_v50 = vsel %vm619_vm1, %v1221_v0, %v1217_v19  ;;  %v1878_v11 = vadd.f32 %v1874_v32, %v5304_v23  ;;  %v1226_v29 = vrot.slane %v5515_v7, %v4239_v30  ;;  %v7625_v23 = vld [vmem:[#allocation44_spill] sm:$0xff]  ;;  %v7627_v13 = vld [vmem:[#allocation46_spill] sm:$0xff]  ;;  %s6371_s8 = sld [smem:[#allocation3 + $0x30]] }
 0x24d   :  { %7620 = vst [vmem:[#allocation28_spill] sm:$0xff] %v5543_v40  ;;  %v1910_v15 = vmul.f32 %v5543_v40, %v5417_v59  ;;  %v5562_v47 = vmul.f32 0.125, %v7622_v55  ;;  %v5565_v0 = vmul.f32 0.125, %v7623_v2  ;;  %v5568_v19 = vstv %s5483_s11  ;;  %s6420_s11 = sld [smem:[#allocation3 + $0x32]] }
 0x24e   :  { %2350 = vrot.lane.b32.xlu1 %v7604_v39, %s3744_s10  ;;  %v5501_v10 = vpop.permute.xlu1 %1936  ;;  %v5510_v26 = vpop.permute.xlu0 %1952  ;;  %7624 = vst [vmem:[#allocation33_spill] sm:$0xff] %v5568_v19  ;;  %v530_v32 = vmul.f32 0.125, %v7625_v23  ;;  %v529_v59 = vmul.f32 0.125, %v7626_v62  ;;  %v1896_v6 = vadd.f32 %v1892_v46, %v1878_v11  ;;  %v1928_v56 = vmul.f32 %v5568_v19, %v1923_v36  ;;  %v7630_v23 = vld [vmem:[#allocation40_spill] sm:$0xff]  ;;  %v7631_v46 = vld [vmem:[#allocation41_spill] sm:$0xff] }
 0x24f   :  { %7615 = vst [vmem:[#allocation25_spill] sm:$0xff] %v5510_v26  ;;  %2362 = vrot.lane.b32.xlu0 %v5369_v17, %s3745_s12  ;;  %v1239_v7 = vrot.slane %v5537_v3, %v4241_v31  ;;  %v1235_v42 = vrot.slane %v5540_v12, %v4239_v30  ;;  %v532_v55 = vmul.f32 0.125, %v7627_v13  ;;  %v5581_v2 = vstv %s5497_s16  ;;  %s6438_s16 = sld [smem:[#allocation3 + $0x33]] }
 0x250   :  { %7628 = vst [vmem:[#allocation34_spill] sm:$0xff] %v5581_v2  ;;  %v5588_v62 = vmul.f32 0.125, %v7630_v23  ;;  %v525_v36 = vmul.f32 0.125, %v7631_v46  ;;  %v1914_v11 = vadd.f32 %v1910_v15, %v1896_v6  ;;  %v1257_v12 = vrot.slane %v5562_v47, %v4241_v31  ;;  %v7636_v47 = vld [vmem:[#allocation50_spill] sm:$0xff] }
 0x251   :  { %v1253_v13 = vrot.slane %v5565_v0, %v4239_v30  ;;  %v534_v38 = vmul.f32 0.125, %v7634_v9  ;;  %v1266_v23 = vrot.slane %v530_v32, %v4241_v31  ;;  %v1262_v15 = vrot.slane %v529_v59, %v4239_v30  ;;  %v7640_v32 = vld [vmem:[#allocation53_spill] sm:$0xff] }
 0x252   :  { %2364 = vrot.lane.b32.xlu1 %v5401_v41, %s3745_s12  ;;  %v1941_v51 = vpop.permute.xlu1 %1940  ;;  %v5557_v35 = vpop.permute.xlu0 %1956  ;;  %v1932_v46 = vadd.f32 %v1928_v56, %v1914_v11  ;;  %v536_v44 = vmul.f32 0.125, %v7636_v47  ;;  %v535_v0 = vmul.f32 0.125, %v7637_v43  ;;  %v5609_v57 = vstv %s5545_s17  ;;  %v7642_v43 = vld [vmem:[#allocation54_spill] sm:$0xff]  ;;  %s6447_s17 = sld [smem:[#allocation3 + $0x34]] }
 0x253   :  { %7621 = vst [vmem:[#allocation32_spill] sm:$0xff] %v5557_v35  ;;  %2366 = vrot.lane.b32.xlu0 %v5409_v37, %s3745_s12  ;;  %v1946_v3 = vmul.f32 %v5581_v2, %v1941_v51  ;;  %v7633_v35 = vld [vmem:[#allocation47_spill] sm:$0xff]  ;;  %v7635_v51 = vld [vmem:[#allocation49_spill] sm:$0xff]  ;;  %7638 = vst [vmem:[#allocation37_spill] sm:$0xff] %v5609_v57  ;;  %v537_v28 = vmul.f32 0.125, %v7640_v32  ;;  %v1284_v11 = vrot.slane %v534_v38, %v4241_v31  ;;  %v540_v47 = vmul.f32 0.125, %v7642_v43 }
 0x254   :  { %v531_v54 = vmul.f32 0.125, %v7633_v35  ;;  %v533_v6 = vmul.f32 0.125, %v7635_v51  ;;  %v7639_v35 = vld [vmem:[#allocation52_spill] sm:$0xff]  ;;  %v1293_v38 = vrot.slane %v536_v44, %v4241_v31  ;;  %v1289_v43 = vrot.slane %v535_v0, %v4239_v30 }
 0x255   :  { %v538_v16 = vmul.f32 0.125, %v7639_v35  ;;  %v1950_v59 = vadd.f32 %v1946_v3, %v1932_v46  ;;  %v7644_v2 = vld [vmem:[#allocation56_spill] sm:$0xff]  ;;  %v7645_v3 = vld [vmem:[#allocation57_spill] sm:$0xff]  ;;  %v7649_v44 = vrot.slane %v5506_v14, %v4241_v31  ;;  %v1338_v14 = vsel %vm904_vm4, %v5534_v53, %v5529_v21 }
 0x256   :  { %2368 = vrot.lane.b32.xlu1 %v7604_v39, %s3745_s12  ;;  %v5585_v18 = vpop.permute.xlu1 %1954  ;;  %v5592_v26 = vpop.permute.xlu0 %2017  ;;  %v1280_v35 = vrot.slane %v533_v6, %v4239_v30  ;;  %v542_v32 = vmul.f32 0.125, %v7644_v2  ;;  %v541_v46 = vmul.f32 0.125, %v7645_v3  ;;  %v1267_v6 = vsel %vm619_vm1, %v1266_v23, %v1262_v15 }
 0x257   :  { %7629 = vst [vmem:[#allocation35_spill] sm:$0xff] %v5585_v18  ;;  %7632 = vst [vmem:[#allocation36_spill] sm:$0xff] %v5592_v26  ;;  %2380 = vrot.lane.b32.xlu0 %v5369_v17, %s3746_s13  ;;  %v1275_v26 = vrot.slane %v532_v55, %v4241_v31  ;;  %v1271_v55 = vrot.slane %v531_v54, %v4239_v30  ;;  %v539_v18 = vmul.f32 0.125, %v7643_v61 }
 0x258   :  { %v1244_v54 = vrot.slane %v525_v36, %v4239_v30  ;;  %v1302_v2 = vrot.slane %v538_v16, %v4241_v31  ;;  %v1231_v36 = vsel %vm619_vm1, %v7649_v44, %v1226_v29  ;;  %v1285_v16 = vsel %vm619_vm1, %v1284_v11, %v1280_v35 }
 0x259   :  { %v1276_v0 = vsel %vm619_vm1, %v1275_v26, %v1271_v55  ;;  %v1307_v23 = vrot.slane %v539_v18, %v4239_v30  ;;  %v1320_v15 = vrot.slane %v542_v32, %v4241_v31  ;;  %v1240_v26 = vsel %vm619_vm1, %v1239_v7, %v1235_v42 }
 0x25a   :  { %2382 = vrot.lane.b32.xlu1 %v5401_v41, %s3746_s13  ;;  %v1959_v9 = vpop.permute.xlu1 %1958  ;;  %v5616_v56 = vpop.permute.xlu0 %2021  ;;  %v1294_v18 = vsel %vm619_vm1, %v1293_v38, %v1289_v43  ;;  %v1335_v7 = vsel %vm912_vm8, %v5526_v58, %v5523_v45 }
 0x25b   :  { %v1964_v51 = vmul.f32 %v5609_v57, %v1959_v9  ;;  %7641 = vst [vmem:[#allocation38_spill] sm:$0xff] %v5616_v56  ;;  %2384 = vrot.lane.b32.xlu0 %v5409_v37, %s3746_s13  ;;  %v1248_v56 = vrot.slane %v5588_v62, %v4241_v31 }
 0x25d   :  { %v1968_v9 = vadd.f32 %v1964_v51, %v1950_v59  ;;  %v1298_v59 = vrot.slane %v537_v28, %v4239_v30  ;;  %v7647_v51 = vld [vmem:[#allocation21_spill] sm:$0xff]  ;;  %v1258_v28 = vsel %vm619_vm1, %v1257_v12, %v1253_v13 }
 0x25e   :  { %2386 = vrot.lane.b32.xlu1 %v7604_v39, %s3746_s13  ;;  %v5634_v61 = vpop.permute.xlu1 %2019  ;;  %v5642_v62 = vpop.permute.xlu0 %2035  ;;  %v1343_v29 = vsel %vm900_vm2, %v1267_v6, %v1258_v28 }
 0x25f   :  { %7646 = vst [vmem:[#allocation39_spill] sm:$0xff] %v5634_v61  ;;  %v5640_v3 = vadd.f32 %v7647_v51, %v1968_v9  ;;  %7648 = vst [vmem:[#allocation42_spill] sm:$0xff] %v5642_v62  ;;  %v1311_v61 = vrot.slane %v540_v47, %v4241_v31  ;;  %2398 = vrot.lane.b32.xlu0 %v5369_v17, %s3747_s14  ;;  %v1316_v9 = vrot.slane %v541_v46, %v4239_v30 }
 0x260   :  { %v1339_v31 = vsel %vm906_vm5, %v5550_v50, %v1338_v14  ;;  %v1249_v30 = vsel %vm619_vm1, %v1248_v56, %v1244_v54  ;;  %v1344_v13 = vsel %vm902_vm3, %v1276_v0, %v1343_v29  ;;  %v1303_v21 = vsel %vm619_vm1, %v1302_v2, %v1298_v59 }
 0x261   :  { %v1340_v42 = vsel %vm908_vm6, %v1231_v36, %v1339_v31  ;;  %v1345_v55 = vsel %vm904_vm4, %v1285_v16, %v1344_v13  ;;  %v1312_v11 = vsel %vm619_vm1, %v1311_v61, %v1307_v23  ;;  %v1354_v50 = vsel %vm939_vm9, 0.0, %v5478_v8 }
 0x262   :  { %2400 = vrot.lane.b32.xlu1 %v5401_v41, %s3747_s14  ;;  %v5665_v12 = vpop.permute.xlu1 %2023  ;;  %v5672_v53 = vpop.permute.xlu0 %2039  ;;  %v1341_v56 = vsel %vm910_vm7, %v1240_v26, %v1340_v42  ;;  %v1346_v47 = vsel %vm906_vm5, %v1294_v18, %v1345_v55  ;;  %v1321_v35 = vsel %vm619_vm1, %v1320_v15, %v1316_v9  ;;  %v1355_v46 = vsel %vm939_vm9, 0.0, %v1335_v7 }
 0x263   :  { %7650 = vst [vmem:[#allocation43_spill] sm:$0xff] %v5672_v53  ;;  %2402 = vrot.lane.b32.xlu0 %v5409_v37, %s3747_s14  ;;  %v1342_v45 = vsel %vm912_vm8, %v1249_v30, %v1341_v56  ;;  %v1347_v58 = vsel %vm908_vm6, %v1303_v21, %v1346_v47  ;;  %v1358_v38 = vsel %vm944_vm10, %v1354_v50, 0.0  ;;  %v5703_v6 = vsel %vm944_vm10, %v1355_v46, 0.0 }
 0x264   :  { %v1348_v54 = vsel %vm910_vm7, %v1312_v11, %v1347_v58  ;;  %v1356_v61 = vsel %vm939_vm9, 0.0, %v1342_v45  ;;  %v1366_v59 = vrot.slane %v1358_v38, 5  ;;  %v5762_v13 = vstv %s3603_s18  ;;  %s6472_s18 = sld [smem:[#allocation3 + $0x35]] }
 0x265   :  { %v1349_v43 = vsel %vm912_vm8, %v1321_v35, %v1348_v54  ;;  %v1360_v36 = vsel %vm944_vm10, %v1356_v61, 0.0  ;;  %7657 = vst [vmem:[#allocation48_spill] sm:$0xff] %v5762_v13  ;;  %v2029_v7 = vmul.f32 %v5762_v13, %v5665_v12  ;;  %v5772_v55 = vstv %s3604_s1  ;;  %s6485_s1 = sld [smem:[#allocation3 + $0x36]] }
 0x266   :  { %2404 = vrot.lane.b32.xlu1 %v7604_v39, %s3747_s14  ;;  %v5691_v32 = vpop.permute.xlu1 %2037  ;;  %v5695_v8 = vpop.permute.xlu0 %2053  ;;  %v1357_v51 = vsel %vm939_vm9, 0.0, %v1349_v43  ;;  %v5722_v23 = vsel %vm953_vm11, 0.0, %v1366_v59  ;;  %v1369_v28 = vrot.slane %v1360_v36, 5  ;;  %v5777_v50 = vstv %s3605_s19  ;;  %s6516_s19 = sld [smem:[#allocation3 + $0x37]] }
 0x267   :  { %7651 = vst [vmem:[#allocation44_spill] sm:$0xff] %v5695_v8  ;;  %2416 = vrot.lane.b32.xlu0 %v5369_v17, %s3748_s15  ;;  %v1367_v17 = vrot.slane %v5703_v6, 5  ;;  %v5715_v0 = vsel %vm944_vm10, %v1357_v51, 0.0  ;;  %7659 = vst [vmem:[#allocation50_spill] sm:$0xff] %v5777_v50  ;;  %v2033_v47 = vadd.f32 %v2029_v7, %v5640_v3  ;;  %v5785_v45 = vstv %s3606_s20  ;;  %v7684_v8 = vld [vmem:[#allocation69_spill] sm:$0xff]  ;;  %s6687_s20 = sld [smem:[#allocation3 + $0x3f]] }
 0x268   :  { %v7404_v15 = vrot.slane %v5715_v0, 5  ;;  %7661 = vst [vmem:[#allocation52_spill] sm:$0xff] %v5785_v45  ;;  %v5790_v54 = vstv %s3607_s21  ;;  %s6710_s21 = sld [smem:[#allocation3 + $0x39]]  ;;  %vm3509_vm1 = vcmask 130048  }
 0x269   :  { %7662 = vst [vmem:[#allocation53_spill] sm:$0xff] %v5790_v54 }
 0x26a   :  { %2418 = vrot.lane.b32.xlu1 %v5401_v41, %s3748_s15  ;;  %v2042_v2 = vpop.permute.xlu1 %2041  ;;  %v5708_v44 = vpop.permute.xlu0 %2057  ;;  %v5746_v26 = vsel %vm953_vm11, %v1369_v28, %v7404_v15 }
 0x26b   :  { %7652 = vst [vmem:[#allocation45_spill] sm:$0xff] %v5708_v44  ;;  %2420 = vrot.lane.b32.xlu0 %v5409_v37, %s3748_s15  ;;  %v5731_v37 = vsel %vm953_vm11, %v1366_v59, %v1367_v17  ;;  %v2047_v11 = vmul.f32 %v5772_v55, %v2042_v2  ;;  %v5801_v59 = vstv %s3608_s22  ;;  %v7685_v44 = vld [vmem:[#allocation73_spill] sm:$0xff]  ;;  %s6725_s22 = sld [smem:[#allocation3 + $0x3a]] }
 0x26c   :  { %7665 = vst [vmem:[#allocation56_spill] sm:$0xff] %v5801_v59  ;;  %v1475_v62 = vmul.f32 %v5037_v24, %v7685_v44 }
 0x26d   :  { %v2051_v58 = vadd.f32 %v2047_v11, %v2033_v47  ;;  %v7668_v11 = vld [vmem:[#allocation22_spill] sm:$0xff] }
 0x26e   :  { %2422 = vrot.lane.b32.xlu1 %v7604_v39, %s3748_s15  ;;  %v5719_v41 = vpop.permute.xlu1 %2055  ;;  %v5724_v16 = vpop.permute.xlu0 %2071  ;;  %v5737_v39 = vsel %vm953_vm11, 0.0, %v1369_v28 }
 0x26f   :  { %7653 = vst [vmem:[#allocation46_spill] sm:$0xff] %v5724_v16  ;;  %2444 = vrot.lane.b32.xlu0 %v5722_v23, %s3743_s9 }
 0x272   :  { %v2060_v9 = vpop.permute.xlu1 %2059  ;;  %2446 = vrot.lane.b32.xlu1 %v5731_v37, %s3743_s9  ;;  %v5739_v14 = vpop.permute.xlu0 %2075 }
 0x273   :  { %7654 = vst [vmem:[#allocation40_spill] sm:$0xff] %v5739_v14  ;;  %2448 = vrot.lane.b32.xlu0 %v5737_v39, %s3743_s9  ;;  %v2065_v12 = vmul.f32 %v5777_v50, %v2060_v9  ;;  %v2594_v14 = vrot.slane %v5746_v26, 1 }
 0x275   :  { %v2069_v3 = vadd.f32 %v2065_v12, %v2051_v58 }
 0x276   :  { %v5748_v29 = vpop.permute.xlu1 %2073  ;;  %2450 = vrot.lane.b32.xlu1 %v5746_v26, %s3743_s9  ;;  %v5752_v18 = vpop.permute.xlu0 %2089 }
 0x277   :  { %7655 = vst [vmem:[#allocation41_spill] sm:$0xff] %v5752_v18  ;;  %2462 = vrot.lane.b32.xlu0 %v5722_v23, %s3744_s10  ;;  %v7682_v18 = vld [vmem:[#allocation77_spill] sm:$0xff] }
 0x27a   :  { %v2078_v31 = vpop.permute.xlu1 %2077  ;;  %2464 = vrot.lane.b32.xlu1 %v5731_v37, %s3744_s10  ;;  %v5758_v30 = vpop.permute.xlu0 %2093 }
 0x27b   :  { %7656 = vst [vmem:[#allocation47_spill] sm:$0xff] %v5758_v30  ;;  %2466 = vrot.lane.b32.xlu0 %v5737_v39, %s3744_s10  ;;  %v2083_v46 = vmul.f32 %v5785_v45, %v2078_v31 }
 0x27d   :  { %v2087_v2 = vadd.f32 %v2083_v46, %v2069_v3 }
 0x27e   :  { %v5764_v21 = vpop.permute.xlu1 %2091  ;;  %2468 = vrot.lane.b32.xlu1 %v5746_v26, %s3744_s10  ;;  %v5770_v42 = vpop.permute.xlu0 %2107 }
 0x27f   :  { %7658 = vst [vmem:[#allocation49_spill] sm:$0xff] %v5770_v42  ;;  %2480 = vrot.lane.b32.xlu0 %v5722_v23, %s3745_s12 }
 0x282   :  { %v2096_v56 = vpop.permute.xlu1 %2095  ;;  %2482 = vrot.lane.b32.xlu1 %v5731_v37, %s3745_s12  ;;  %v5783_v35 = vpop.permute.xlu0 %2111 }
 0x283   :  { %7660 = vst [vmem:[#allocation51_spill] sm:$0xff] %v5783_v35  ;;  %2484 = vrot.lane.b32.xlu0 %v5737_v39, %s3745_s12  ;;  %v2101_v43 = vmul.f32 %v5790_v54, %v2096_v56  ;;  %v7681_v35 = vld [vmem:[#allocation66_spill] sm:$0xff] }
 0x284   :  { %v1439_v30 = vmul.f32 %v7682_v18, %v7681_v35 }
 0x285   :  { %v2105_v36 = vadd.f32 %v2101_v43, %v2087_v2  ;;  %v5840_v43 = vsel %vm953_vm11, %v1367_v17, 0.0  ;;  %v7676_v17 = vld [vmem:[#allocation75_spill] sm:$0xff] }
 0x286   :  { %v5792_v38 = vpop.permute.xlu1 %2109  ;;  %2486 = vrot.lane.b32.xlu1 %v5746_v26, %s3745_s12  ;;  %v5797_v61 = vpop.permute.xlu0 %2171  ;;  %v2591_v6 = vrot.slane %v5840_v43, 1  ;;  %v1385_v15 = vmul.f32 %v7676_v17, %v4397_v27 }
 0x287   :  { %7663 = vst [vmem:[#allocation54_spill] sm:$0xff] %v5792_v38  ;;  %7664 = vst [vmem:[#allocation55_spill] sm:$0xff] %v5797_v61  ;;  %2498 = vrot.lane.b32.xlu0 %v5722_v23, %s3746_s13  ;;  %v2588_v61 = vrot.slane %v5722_v23, 1 }
 0x28a   :  { %v2114_v51 = vpop.permute.xlu1 %2113  ;;  %2500 = vrot.lane.b32.xlu1 %v5731_v37, %s3746_s13  ;;  %v5806_v9 = vpop.permute.xlu0 %2175 }
 0x28b   :  { %v2119_v28 = vmul.f32 %v5801_v59, %v2114_v51  ;;  %7666 = vst [vmem:[#allocation57_spill] sm:$0xff] %v5806_v9  ;;  %2502 = vrot.lane.b32.xlu0 %v5737_v39, %s3746_s13  ;;  %v7673_v51 = vld [vmem:[#allocation58_spill] sm:$0xff]  ;;  %v7679_v9 = vrot.slane %v5715_v0, 5 }
 0x28d   :  { %v2123_v31 = vadd.f32 %v2119_v28, %v2105_v36  ;;  %v7674_v36 = vld [vmem:[#allocation72_spill] sm:$0xff] }
 0x28e   :  { %v5810_v7 = vpop.permute.xlu1 %2173  ;;  %2504 = vrot.lane.b32.xlu1 %v5746_v26, %s3746_s13  ;;  %v5817_v47 = vpop.permute.xlu0 %2189  ;;  %v1403_v28 = vmul.f32 %v7674_v36, %v7673_v51  ;;  %v5862_v51 = vsel %vm953_vm11, %v7679_v9, 0.0 }
 0x28f   :  { %7667 = vst [vmem:[#allocation21_spill] sm:$0xff] %v5810_v7  ;;  %v5815_v56 = vadd.f32 %v7668_v11, %v2123_v31  ;;  %7669 = vst [vmem:[#allocation22_spill] sm:$0xff] %v5817_v47  ;;  %2516 = vrot.lane.b32.xlu0 %v5722_v23, %s3747_s14  ;;  %v2589_v11 = vrot.slane %v5731_v37, 1  ;;  %v7678_v47 = vld [vmem:[#allocation76_spill] sm:$0xff]  ;;  %v2596_v35 = vrot.slane %v5862_v51, 1 }
 0x290   :  { %v1407_v42 = vadd.f32 %v1403_v28, %v1385_v15  ;;  %v1457_v15 = vmul.f32 %v5032_v34, %v7684_v8  ;;  %v2593_v28 = vrot.slane %v5737_v39, 1 }
 0x291   :  { %v5879_v0 = vsel %vm1514_vm12, %v2589_v11, %v2591_v6  ;;  %v5905_v44 = vsel %vm1514_vm12, %v2594_v14, %v2596_v35  ;;  %v7693_v35 = vld [vmem:[#allocation83_spill] sm:$0xff] }
 0x292   :  { %v5821_v12 = vpop.permute.xlu1 %2177  ;;  %2518 = vrot.lane.b32.xlu1 %v5731_v37, %s3747_s14  ;;  %v5825_v58 = vpop.permute.xlu0 %2193 }
 0x293   :  { %7670 = vst [vmem:[#allocation135_spill] sm:$0xff] %v5825_v58  ;;  %2520 = vrot.lane.b32.xlu0 %v5737_v39, %s3747_s14 }
 0x296   :  { %v5829_v46 = vpop.permute.xlu1 %2191  ;;  %2522 = vrot.lane.b32.xlu1 %v5746_v26, %s3747_s14  ;;  %v5833_v3 = vpop.permute.xlu0 %2207 }
 0x297   :  { %7671 = vst [vmem:[#allocation136_spill] sm:$0xff] %v5829_v46  ;;  %7672 = vst [vmem:[#allocation137_spill] sm:$0xff] %v5833_v3  ;;  %2534 = vrot.lane.b32.xlu0 %v5722_v23, %s3748_s15  ;;  %v7677_v3 = vld [vmem:[#allocation63_spill] sm:$0xff] }
 0x298   :  { %v1421_v58 = vmul.f32 %v7678_v47, %v7677_v3  ;;  %v5873_v3 = vsel %vm1514_vm12, %v2588_v61, %v2589_v11  ;;  %v5892_v11 = vsel %vm1514_vm12, %v2593_v28, %v2594_v14 }
 0x29a   :  { %v5842_v2 = vpop.permute.xlu1 %2195  ;;  %2536 = vrot.lane.b32.xlu1 %v5731_v37, %s3748_s15  ;;  %v5848_v31 = vpop.permute.xlu0 %2211  ;;  %v1425_v9 = vadd.f32 %v1421_v58, %v1407_v42  ;;  %v7687_v42 = vld [vmem:[#allocation9_spill] sm:$0xff] }
 0x29b   :  { %7675 = vst [vmem:[#allocation58_spill] sm:$0xff] %v5848_v31  ;;  %2538 = vrot.lane.b32.xlu0 %v5737_v39, %s3748_s15  ;;  %v5896_v8 = vmul.f32 %v7687_v42, %v4397_v27  ;;  %v1504_v58 = vmul.f32 %v7687_v42, %v4794_v25 }
 0x29c   :  { %v1443_v61 = vadd.f32 %v1439_v30, %v1425_v9  ;;  %v7689_v30 = vld [vmem:[#allocation79_spill] sm:$0xff]  ;;  %v7690_v9 = vld [vmem:[#allocation81_spill] sm:$0xff] }
 0x29d   :  { %7688 = vst [vmem:[#allocation76_spill] sm:$0xff] %v5896_v8  ;;  %v7408_v7 = vrot.slane %v5896_v8, 1  ;;  %v1518_v59 = vrot.slane %v1504_v58, 1  ;;  %v7701_v8 = vld [vmem:[#allocation99_spill] sm:$0xff] }
 0x29e   :  { %v5864_v31 = vpop.permute.xlu1 %2209  ;;  %2540 = vrot.lane.b32.xlu1 %v5746_v26, %s3748_s15  ;;  %v5870_v16 = vpop.permute.xlu0 %2225  ;;  %v1461_v6 = vadd.f32 %v1457_v15, %v1443_v61  ;;  %v7694_v61 = vld [vmem:[#allocation95_spill] sm:$0xff] }
 0x29f   :  { %7680 = vst [vmem:[#allocation72_spill] sm:$0xff] %v5864_v31  ;;  %7683 = vst [vmem:[#allocation75_spill] sm:$0xff] %v5870_v16  ;;  %2602 = vrot.lane.b32.xlu0 %v5873_v3, %s3743_s9  ;;  %v1493_v31 = vmul.f32 %v7690_v9, %v7689_v30  ;;  %v1562_v30 = vmul.f32 %v7694_v61, %v7693_v35 }
 0x2a2   :  { %v2214_v16 = vpop.permute.xlu1 %2213  ;;  %2604 = vrot.lane.b32.xlu1 %v5879_v0, %s3743_s9  ;;  %v5889_v53 = vpop.permute.xlu0 %2229 }
 0x2a3   :  { %7686 = vst [vmem:[#allocation63_spill] sm:$0xff] %v5889_v53  ;;  %2606 = vrot.lane.b32.xlu0 %v5892_v11, %s3743_s9  ;;  %v1479_v53 = vadd.f32 %v1475_v62, %v1461_v6  ;;  %v1519_v62 = vsel %vm1514_vm12, %v7408_v7, %v1518_v59 }
 0x2a5   :  { %v1497_v15 = vadd.f32 %v1493_v31, %v1479_v53  ;;  %v7696_v53 = vld [vmem:[#allocation86_spill] sm:$0xff] }
 0x2a6   :  { %v5907_v28 = vpop.permute.xlu1 %2227  ;;  %2608 = vrot.lane.b32.xlu1 %v5905_v44, %s3743_s9  ;;  %v5911_v46 = vpop.permute.xlu0 %2243  ;;  %v7697_v31 = vld [vmem:[#allocation98_spill] sm:$0xff] }
 0x2a7   :  { %7691 = vst [vmem:[#allocation66_spill] sm:$0xff] %v5907_v28  ;;  %7692 = vst [vmem:[#allocation77_spill] sm:$0xff] %v5911_v46  ;;  %2620 = vrot.lane.b32.xlu0 %v5873_v3, %s3744_s10  ;;  %v1530_v58 = vadd.f32 %v1519_v62, %v1497_v15  ;;  %v1580_v6 = vmul.f32 %v7697_v31, %v7696_v53  ;;  %v5929_v46 = vstv %s3610_s23  ;;  %v5941_v15 = vstv %s3611_s24  ;;  %v7704_v53 = vld [vmem:[#allocation92_spill] sm:$0xff]  ;;  %s6733_s23 = sld [smem:[#allocation3 + $0x3b]] }
 0x2a8   :  { %7698 = vst [vmem:[#allocation73_spill] sm:$0xff] %v5929_v46  ;;  %v2183_v7 = vmul.f32 %v5929_v46, %v5821_v12  ;;  %7703 = vst [vmem:[#allocation81_spill] sm:$0xff] %v5941_v15  ;;  %s6745_s24 = sld [smem:[#allocation3 + $0x3c]] }
 0x2a9   :  { %v1566_v35 = vadd.f32 %v1562_v30, %v1530_v58  ;;  %v2201_v30 = vmul.f32 %v5941_v15, %v5842_v2  ;;  %v5949_v58 = vstv %s3612_s25  ;;  %v5965_v15 = vstv %s3613_s26  ;;  %s6755_s25 = sld [smem:[#allocation3 + $0x3d]] }
 0x2aa   :  { %v2232_v14 = vpop.permute.xlu1 %2231  ;;  %2622 = vrot.lane.b32.xlu1 %v5879_v0, %s3744_s10  ;;  %v5920_v28 = vpop.permute.xlu0 %2247  ;;  %7706 = vst [vmem:[#allocation83_spill] sm:$0xff] %v5949_v58  ;;  %v2187_v46 = vadd.f32 %v2183_v7, %v5815_v56  ;;  %s6804_s26 = sld [smem:[#allocation3 + $0x3e]] }
 0x2ab   :  { %7695 = vst [vmem:[#allocation69_spill] sm:$0xff] %v5920_v28  ;;  %2624 = vrot.lane.b32.xlu0 %v5892_v11, %s3744_s10  ;;  %v7700_v28 = vld [vmem:[#allocation89_spill] sm:$0xff]  ;;  %v1584_v62 = vadd.f32 %v1580_v6, %v1566_v35  ;;  %v2219_v6 = vmul.f32 %v5949_v58, %v2214_v16  ;;  %v2237_v16 = vmul.f32 %v5965_v15, %v2232_v14  ;;  %v5984_v14 = vstv %s3615_s28  ;;  %s6983_s28 = sld [smem:[#allocation3 + $0x40]] }
 0x2ac   :  { %v1598_v59 = vmul.f32 %v7701_v8, %v7700_v28  ;;  %v2205_v56 = vadd.f32 %v2201_v30, %v2187_v46 }
 0x2ae   :  { %v5931_v38 = vpop.permute.xlu1 %2245  ;;  %2626 = vrot.lane.b32.xlu1 %v5905_v44, %s3744_s10  ;;  %v5939_v61 = vpop.permute.xlu0 %2261  ;;  %v1602_v12 = vadd.f32 %v1598_v59, %v1584_v62  ;;  %v5972_v62 = vstv %s3614_s27  ;;  %v2223_v58 = vadd.f32 %v2219_v6, %v2205_v56  ;;  %v7715_v6 = vld [vmem:[#allocation118_spill] sm:$0xff]  ;;  %s6961_s27 = sld [smem:[#allocation3 + $0x46]] }
 0x2af   :  { %7699 = vst [vmem:[#allocation9_spill] sm:$0xff] %v5931_v38  ;;  %7702 = vst [vmem:[#allocation79_spill] sm:$0xff] %v5939_v61  ;;  %2638 = vrot.lane.b32.xlu0 %v5873_v3, %s3745_s12  ;;  %v7705_v38 = vld [vmem:[#allocation101_spill] sm:$0xff]  ;;  %v7707_v61 = vld [vmem:[#allocation96_spill] sm:$0xff] }
 0x2b0   :  { %v1616_v31 = vmul.f32 %v7705_v38, %v7704_v53  ;;  %v1634_v8 = vmul.f32 %v5155_v60, %v7707_v61  ;;  %v7709_v53 = vld [vmem:[#allocation10_spill] sm:$0xff]  ;;  %v7710_v61 = vld [vmem:[#allocation104_spill] sm:$0xff]  ;;  %7711 = vst [vmem:[#allocation89_spill] sm:$0xff] %v5972_v62  ;;  %v2241_v46 = vadd.f32 %v2237_v16, %v2223_v58  ;;  %v7717_v58 = vld [vmem:[#allocation109_spill] sm:$0xff] }
 0x2b1   :  { %v5961_v2 = vmul.f32 %v7709_v53, %v4397_v27  ;;  %v1663_v38 = vmul.f32 %v7709_v53, %v4794_v25  ;;  %v1652_v7 = vmul.f32 %v7710_v61, %v5159_v52 }
 0x2b2   :  { %v2250_v28 = vpop.permute.xlu1 %2249  ;;  %2640 = vrot.lane.b32.xlu1 %v5879_v0, %s3745_s12  ;;  %v5957_v35 = vpop.permute.xlu0 %2265  ;;  %v1620_v59 = vadd.f32 %v1616_v31, %v1602_v12 }
 0x2b3   :  { %7708 = vst [vmem:[#allocation86_spill] sm:$0xff] %v5957_v35  ;;  %2642 = vrot.lane.b32.xlu0 %v5892_v11, %s3745_s12  ;;  %v2255_v53 = vmul.f32 %v5972_v62, %v2250_v28  ;;  %v7422_v31 = vrot.slane %v5961_v2, 2  ;;  %v1677_v12 = vrot.slane %v1663_v38, 2 }
 0x2b4   :  { %v1638_v60 = vadd.f32 %v1634_v8, %v1620_v59  ;;  %v7714_v8 = vld [vmem:[#allocation106_spill] sm:$0xff] }
 0x2b5   :  { %v1717_v59 = vmul.f32 %v7715_v6, %v7714_v8  ;;  %v2259_v28 = vadd.f32 %v2255_v53, %v2241_v46  ;;  %v1678_v38 = vsel %vm1673_vm13, %v7422_v31, %v1677_v12  ;;  %v7719_v46 = vld [vmem:[#allocation112_spill] sm:$0xff] }
 0x2b6   :  { %v5974_v35 = vpop.permute.xlu1 %2263  ;;  %2644 = vrot.lane.b32.xlu1 %v5905_v44, %s3745_s12  ;;  %v5979_v54 = vpop.permute.xlu0 %2326  ;;  %v1656_v52 = vadd.f32 %v1652_v7, %v1638_v60  ;;  %v7718_v7 = vld [vmem:[#allocation121_spill] sm:$0xff] }
 0x2b7   :  { %7712 = vst [vmem:[#allocation92_spill] sm:$0xff] %v5974_v35  ;;  %7713 = vst [vmem:[#allocation96_spill] sm:$0xff] %v5979_v54  ;;  %2656 = vrot.lane.b32.xlu0 %v5873_v3, %s3746_s13  ;;  %v1735_v16 = vmul.f32 %v7718_v7, %v7717_v58 }
 0x2b8   :  { %v1689_v60 = vadd.f32 %v1678_v38, %v1656_v52  ;;  %v7724_v38 = vld [vmem:[#allocation115_spill] sm:$0xff] }
 0x2ba   :  { %v2268_v30 = vpop.permute.xlu1 %2267  ;;  %2658 = vrot.lane.b32.xlu1 %v5879_v0, %s3746_s13  ;;  %v5991_v54 = vpop.permute.xlu0 %2330  ;;  %v1721_v53 = vadd.f32 %v1717_v59, %v1689_v60  ;;  %v7726_v60 = vld [vmem:[#allocation119_spill] sm:$0xff] }
 0x2bb   :  { %v2273_v56 = vmul.f32 %v5984_v14, %v2268_v30  ;;  %7716 = vst [vmem:[#allocation104_spill] sm:$0xff] %v5991_v54  ;;  %2660 = vrot.lane.b32.xlu0 %v5892_v11, %s3746_s13  ;;  %v7720_v30 = vld [vmem:[#allocation122_spill] sm:$0xff] }
 0x2bc   :  { %v1753_v8 = vmul.f32 %v7720_v30, %v7719_v46  ;;  %v7721_v54 = vld [vmem:[#allocation26_spill] sm:$0xff]  ;;  %v1739_v52 = vadd.f32 %v1735_v16, %v1721_v53  ;;  %v1789_v46 = vmul.f32 %v5273_v1, %v7726_v60 }
 0x2bd   :  { %v2277_v35 = vadd.f32 %v2273_v56, %v2259_v28  ;;  %v7725_v28 = vld [vmem:[#allocation124_spill] sm:$0xff] }
 0x2be   :  { %v6000_v62 = vpop.permute.xlu1 %2328  ;;  %2662 = vrot.lane.b32.xlu1 %v5905_v44, %s3746_s13  ;;  %v6009_v12 = vpop.permute.xlu0 %2344  ;;  %v1771_v56 = vmul.f32 %v7725_v28, %v7724_v38  ;;  %v1757_v59 = vadd.f32 %v1753_v8, %v1739_v52  ;;  %v1807_v38 = vmul.f32 %v5284_v48, %v5277_v22  ;;  %v1872_v22 = vmul.f32 %v5495_v49, %v5301_v20  ;;  %v7746_v49 = vld [vmem:[#allocation39_spill] sm:$0xff]  ;;  %v7750_v48 = vld [vmem:[#allocation65_spill] sm:$0xff] }
 0x2bf   :  { %v6007_v6 = vadd.f32 %v7721_v54, %v2277_v35  ;;  %7723 = vst [vmem:[#allocation109_spill] sm:$0xff] %v6009_v12  ;;  %2674 = vrot.lane.b32.xlu0 %v5873_v3, %s3747_s14  ;;  %v7728_v35 = vld [vmem:[#allocation11_spill] sm:$0xff] }
 0x2c0   :  { %v6025_v31 = vmul.f32 %v7728_v35, %v4397_v27  ;;  %v1818_v16 = vmul.f32 %v7728_v35, %v4794_v25  ;;  %v1775_v53 = vadd.f32 %v1771_v56, %v1757_v59  ;;  %v2743_v59 = vrot.slane %v5731_v37, 2 }
 0x2c1   :  { %7722 = vst [vmem:[#allocation106_spill] sm:$0xff] %v6007_v6 }
 0x2c2   :  { %v6015_v58 = vpop.permute.xlu1 %2332  ;;  %2676 = vrot.lane.b32.xlu1 %v5879_v0, %s3747_s14  ;;  %v6021_v54 = vpop.permute.xlu0 %2348  ;;  %v1793_v52 = vadd.f32 %v1789_v46, %v1775_v53  ;;  %v7425_v12 = vrot.slane %v6025_v31, 3  ;;  %v2742_v53 = vrot.slane %v5722_v23, 2 }
 0x2c3   :  { %7727 = vst [vmem:[#allocation121_spill] sm:$0xff] %v6021_v54  ;;  %2678 = vrot.lane.b32.xlu0 %v5892_v11, %s3747_s14  ;;  %v1832_v54 = vrot.slane %v1818_v16, 3 }
 0x2c4   :  { %v1811_v6 = vadd.f32 %v1807_v38, %v1793_v52 }
 0x2c5   :  { %v1833_v46 = vsel %vm1828_vm14, %v7425_v12, %v1832_v54  ;;  %v1908_v54 = vmul.f32 %v5543_v40, %v5387_v4  ;;  %v2750_v4 = vrot.slane %v5862_v51, 2  ;;  %v7733_v12 = vld [vmem:[#allocation34_spill] sm:$0xff]  ;;  %v7739_v40 = vld [vmem:[#allocation59_spill] sm:$0xff] }
 0x2c6   :  { %v6033_v8 = vpop.permute.xlu1 %2346  ;;  %2680 = vrot.lane.b32.xlu1 %v5905_v44, %s3747_s14  ;;  %v6037_v60 = vpop.permute.xlu0 %2362  ;;  %v1844_v16 = vadd.f32 %v1833_v46, %v1811_v6  ;;  %v2748_v6 = vrot.slane %v5746_v26, 2 }
 0x2c7   :  { %7729 = vst [vmem:[#allocation112_spill] sm:$0xff] %v6037_v60  ;;  %2692 = vrot.lane.b32.xlu0 %v5873_v3, %s3748_s15  ;;  %v2745_v3 = vrot.slane %v5840_v43, 2 }
 0x2c8   :  { %v1876_v38 = vadd.f32 %v1872_v22, %v1844_v16  ;;  %v2747_v22 = vrot.slane %v5737_v39, 2 }
 0x2ca   :  { %v6042_v1 = vpop.permute.xlu1 %2350  ;;  %2694 = vrot.lane.b32.xlu1 %v5879_v0, %s3748_s15  ;;  %v6048_v56 = vpop.permute.xlu0 %2366  ;;  %v1890_v0 = vmul.f32 %v5518_v5, %v5337_v63  ;;  %v6075_v63 = vsel %vm1673_vm13, %v2743_v59, %v2745_v3  ;;  %v7742_v5 = vld [vmem:[#allocation61_spill] sm:$0xff] }
 0x2cb   :  { %7730 = vst [vmem:[#allocation122_spill] sm:$0xff] %v6048_v56  ;;  %2696 = vrot.lane.b32.xlu0 %v5892_v11, %s3748_s15  ;;  %v6069_v11 = vsel %vm1673_vm13, %v2742_v53, %v2743_v59  ;;  %v6090_v59 = vsel %vm1673_vm13, %v2747_v22, %v2748_v6 }
 0x2cc   :  { %v1894_v46 = vadd.f32 %v1890_v0, %v1876_v38 }
 0x2ce   :  { %v6060_v20 = vpop.permute.xlu1 %2364  ;;  %2698 = vrot.lane.b32.xlu1 %v5905_v44, %s3748_s15  ;;  %v6066_v52 = vpop.permute.xlu0 %2380  ;;  %v1926_v44 = vmul.f32 %v5568_v19, %v5443_v33  ;;  %v1912_v53 = vadd.f32 %v1908_v54, %v1894_v46  ;;  %v7735_v33 = vld [vmem:[#allocation12_spill] sm:$0xff]  ;;  %v7737_v54 = vld [vmem:[#allocation35_spill] sm:$0xff] }
 0x2cf   :  { %7731 = vst [vmem:[#allocation26_spill] sm:$0xff] %v6066_v52  ;;  %2756 = vrot.lane.b32.xlu0 %v6069_v11, %s3743_s9  ;;  %v1944_v52 = vmul.f32 %v7733_v12, %v5501_v10  ;;  %v6094_v3 = vmul.f32 %v7735_v33, %v4397_v27  ;;  %v1973_v0 = vmul.f32 %v7735_v33, %v4794_v25  ;;  %v7745_v12 = vld [vmem:[#allocation62_spill] sm:$0xff] }
 0x2d0   :  { %v1930_v38 = vadd.f32 %v1926_v44, %v1912_v53  ;;  %v1962_v46 = vmul.f32 %v5609_v57, %v7737_v54  ;;  %v6103_v10 = vsel %vm1673_vm13, %v2748_v6, %v2750_v4  ;;  %v1402_v44 = vmul.f32 %v7674_v36, %v7739_v40  ;;  %v7740_v53 = vld [vmem:[#allocation60_spill] sm:$0xff]  ;;  %v7741_v54 = vld [vmem:[#allocation14_spill] sm:$0xff] }
 0x2d1   :  { %7736 = vst [vmem:[#allocation119_spill] sm:$0xff] %v6094_v3  ;;  %v1987_v19 = vrot.slane %v1973_v0, 4  ;;  %v1404_v6 = vmul.f32 %v7674_v36, %v7740_v53  ;;  %v1384_v57 = vmul.f32 %v7676_v17, %v7741_v54  ;;  %v7744_v0 = vld [vmem:[#allocation15_spill] sm:$0xff]  ;;  %v2027_v36 = vmul.f32 %v5762_v13, %v7746_v49 }
 0x2d2   :  { %v6081_v16 = vpop.permute.xlu1 %2368  ;;  %2758 = vrot.lane.b32.xlu1 %v6075_v63, %s3743_s9  ;;  %v6087_v60 = vpop.permute.xlu0 %2384  ;;  %v1948_v22 = vadd.f32 %v1944_v52, %v1930_v38  ;;  %v1420_v52 = vmul.f32 %v7678_v47, %v7742_v5  ;;  %v1386_v40 = vmul.f32 %v7676_v17, %v7744_v0  ;;  %v2045_v49 = vmul.f32 %v5772_v55, %v5691_v32  ;;  %v7751_v13 = vld [vmem:[#allocation67_spill] sm:$0xff] }
 0x2d3   :  { %7732 = vst [vmem:[#allocation115_spill] sm:$0xff] %v6081_v16  ;;  %7734 = vst [vmem:[#allocation124_spill] sm:$0xff] %v6087_v60  ;;  %2760 = vrot.lane.b32.xlu0 %v6090_v59, %s3743_s9  ;;  %v1406_v53 = vadd.f32 %v1402_v44, %v1384_v57  ;;  %v7752_v44 = vld [vmem:[#allocation68_spill] sm:$0xff] }
 0x2d4   :  { %v1966_v4 = vadd.f32 %v1962_v46, %v1948_v22  ;;  %v7748_v22 = vrot.slane %v6094_v3, 4  ;;  %v1408_v17 = vadd.f32 %v1404_v6, %v1386_v40  ;;  %v1456_v3 = vmul.f32 %v5032_v34, %v7751_v13  ;;  %v7755_v40 = vld [vmem:[#allocation71_spill] sm:$0xff] }
 0x2d5   :  { %v1458_v6 = vmul.f32 %v5032_v34, %v7752_v44  ;;  %v2081_v34 = vmul.f32 %v5785_v45, %v5748_v29 }
 0x2d6   :  { %v6105_v60 = vpop.permute.xlu1 %2382  ;;  %2762 = vrot.lane.b32.xlu1 %v6103_v10, %s3743_s9  ;;  %v6109_v56 = vpop.permute.xlu0 %2398  ;;  %v1988_v5 = vsel %vm1983_vm15, %v7748_v22, %v1987_v19 }
 0x2d7   :  { %7738 = vst [vmem:[#allocation11_spill] sm:$0xff] %v6109_v56  ;;  %2774 = vrot.lane.b32.xlu0 %v6069_v11, %s3744_s10  ;;  %v1422_v56 = vmul.f32 %v7678_v47, %v7745_v12  ;;  %v1440_v47 = vmul.f32 %v7682_v18, %v7750_v48  ;;  %v1999_v12 = vadd.f32 %v1988_v5, %v1966_v4  ;;  %v7754_v4 = vld [vmem:[#allocation70_spill] sm:$0xff] }
 0x2d8   :  { %v2063_v48 = vmul.f32 %v5777_v50, %v5719_v41  ;;  %v1502_v41 = vmul.f32 %v7687_v42, %v7741_v54  ;;  %v7756_v5 = vld [vmem:[#allocation74_spill] sm:$0xff] }
 0x2d9   :  { %v1426_v57 = vadd.f32 %v1422_v56, %v1408_v17  ;;  %v1476_v56 = vmul.f32 %v5037_v24, %v7755_v40  ;;  %v7757_v17 = vld [vmem:[#allocation78_spill] sm:$0xff] }
 0x2da   :  { %v6122_v38 = vpop.permute.xlu1 %2386  ;;  %2776 = vrot.lane.b32.xlu1 %v6075_v63, %s3744_s10  ;;  %v6132_v46 = vpop.permute.xlu0 %2402 }
 0x2db   :  { %7743 = vst [vmem:[#allocation12_spill] sm:$0xff] %v6122_v38  ;;  %7747 = vst [vmem:[#allocation35_spill] sm:$0xff] %v6132_v46  ;;  %v7749_v38 = vld [vmem:[#allocation64_spill] sm:$0xff]  ;;  %2778 = vrot.lane.b32.xlu0 %v6090_v59, %s3744_s10  ;;  %v1424_v46 = vadd.f32 %v1420_v52, %v1406_v53  ;;  %v1474_v52 = vmul.f32 %v5037_v24, %v7754_v4  ;;  %v1444_v13 = vadd.f32 %v1440_v47, %v1426_v57 }
 0x2dc   :  { %v1438_v16 = vmul.f32 %v7682_v18, %v7749_v38  ;;  %v2031_v38 = vadd.f32 %v2027_v36, %v1999_v12  ;;  %v1494_v24 = vmul.f32 %v7690_v9, %v7757_v17  ;;  %v7758_v12 = vld [vmem:[#allocation53_spill] sm:$0xff] }
 0x2dd   :  { %v1462_v53 = vadd.f32 %v1458_v6, %v1444_v13  ;;  %v2099_v29 = vmul.f32 %v7758_v12, %v5764_v21  ;;  %v7763_v21 = vld [vmem:[#allocation56_spill] sm:$0xff]  ;;  %v7764_v13 = vld [vmem:[#allocation10_spill] sm:$0xff] }
 0x2de   :  { %v6147_v19 = vpop.permute.xlu1 %2400  ;;  %2780 = vrot.lane.b32.xlu1 %v6103_v10, %s3744_s10  ;;  %v6155_v18 = vpop.permute.xlu0 %2416  ;;  %v1442_v32 = vadd.f32 %v1438_v16, %v1424_v46  ;;  %v2049_v22 = vadd.f32 %v2045_v49, %v2031_v38  ;;  %v1492_v16 = vmul.f32 %v7690_v9, %v7756_v5  ;;  %v1505_v38 = vmul.f32 %v7687_v42, %v7744_v0  ;;  %v7786_v12 = vld [vmem:[#allocation90_spill] sm:$0xff] }
 0x2df   :  { %7753 = vst [vmem:[#allocation59_spill] sm:$0xff] %v6155_v18  ;;  %2792 = vrot.lane.b32.xlu0 %v6069_v11, %s3745_s12  ;;  %v1480_v9 = vadd.f32 %v1476_v56, %v1462_v53  ;;  %v6193_v40 = vmul.f32 %v7764_v13, %v7741_v54  ;;  %v1515_v42 = vrot.slane %v1502_v41, 1  ;;  %v7773_v56 = vld [vmem:[#allocation84_spill] sm:$0xff] }
 0x2e0   :  { %v1460_v36 = vadd.f32 %v1456_v3, %v1442_v32  ;;  %v2067_v47 = vadd.f32 %v2063_v48, %v2049_v22  ;;  %v7760_v3 = vld [vmem:[#allocation13_spill] sm:$0xff]  ;;  %v7762_v32 = vld [vmem:[#allocation54_spill] sm:$0xff]  ;;  %v1520_v53 = vrot.slane %v1505_v38, 1 }
 0x2e1   :  { %v6181_v57 = vmul.f32 %v7760_v3, %v4397_v27  ;;  %v2128_v44 = vmul.f32 %v7760_v3, %v4794_v25  ;;  %v2117_v4 = vmul.f32 %v7763_v21, %v7762_v32  ;;  %v7767_v32 = vld [vmem:[#allocation95_spill] sm:$0xff]  ;;  %v7770_v3 = vld [vmem:[#allocation82_spill] sm:$0xff] }
 0x2e2   :  { %v6169_v46 = vpop.permute.xlu1 %2404  ;;  %2794 = vrot.lane.b32.xlu1 %v6075_v63, %s3745_s12  ;;  %v6177_v49 = vpop.permute.xlu0 %2420  ;;  %v1478_v6 = vadd.f32 %v1474_v52, %v1460_v36  ;;  %v2085_v48 = vadd.f32 %v2081_v34, %v2067_v47  ;;  %v1498_v52 = vadd.f32 %v1494_v24, %v1480_v9  ;;  %v7766_v47 = vld [vmem:[#allocation80_spill] sm:$0xff]  ;;  %v1563_v41 = vmul.f32 %v7767_v32, %v7770_v3 }
 0x2e3   :  { %7759 = vst [vmem:[#allocation60_spill] sm:$0xff] %v6177_v49  ;;  %7761 = vst [vmem:[#allocation61_spill] sm:$0xff] %v6181_v57  ;;  %2796 = vrot.lane.b32.xlu0 %v6090_v59, %s3745_s12  ;;  %v2141_v34 = vrot.slane %v2128_v44, 5  ;;  %v1561_v18 = vmul.f32 %v7767_v32, %v7766_v47  ;;  %v7771_v9 = vld [vmem:[#allocation16_spill] sm:$0xff]  ;;  %v7774_v47 = vld [vmem:[#allocation98_spill] sm:$0xff] }
 0x2e4   :  { %v1496_v22 = vadd.f32 %v1492_v16, %v1478_v6  ;;  %v2103_v36 = vadd.f32 %v2099_v29, %v2085_v48  ;;  %v7768_v16 = vld [vmem:[#allocation76_spill] sm:$0xff]  ;;  %v1674_v29 = vrot.slane %v6193_v40, 2  ;;  %v7772_v48 = vrot.slane %v7771_v9, 1  ;;  %v7776_v40 = vld [vmem:[#allocation21_spill] sm:$0xff]  ;;  %v7781_v9 = vld [vmem:[#allocation87_spill] sm:$0xff] }
 0x2e5   :  { %v7769_v6 = vrot.slane %v7768_v16, 1  ;;  %v7775_v16 = vld [vmem:[#allocation85_spill] sm:$0xff] }
 0x2e6   :  { %v6195_v5 = vpop.permute.xlu1 %2418  ;;  %2798 = vrot.lane.b32.xlu1 %v6103_v10, %s3745_s12  ;;  %v6199_v17 = vpop.permute.xlu0 %2444  ;;  %v2121_v24 = vadd.f32 %v2117_v4, %v2103_v36  ;;  %v1522_v44 = vsel %vm1514_vm12, %v1520_v53, %v7772_v48  ;;  %v1581_v3 = vmul.f32 %v7774_v47, %v7775_v16  ;;  %v1816_v4 = vmul.f32 %v7728_v35, %v7741_v54  ;;  %v7777_v36 = vld [vmem:[#allocation73_spill] sm:$0xff]  ;;  %v7780_v53 = vld [vmem:[#allocation23_spill] sm:$0xff]  ;;  %v7783_v16 = vld [vmem:[#allocation88_spill] sm:$0xff] }
 0x2e7   :  { %7765 = vst [vmem:[#allocation15_spill] sm:$0xff] %v6199_v17  ;;  %2810 = vrot.lane.b32.xlu0 %v6069_v11, %s3746_s13  ;;  %v1517_v49 = vsel %vm1514_vm12, %v1515_v42, %v7769_v6  ;;  %v1579_v17 = vmul.f32 %v7774_v47, %v7773_v56  ;;  %v1531_v42 = vadd.f32 %v1522_v44, %v1498_v52  ;;  %v7782_v48 = vld [vmem:[#allocation99_spill] sm:$0xff] }
 0x2e8   :  { %v1529_v38 = vadd.f32 %v1517_v49, %v1496_v22  ;;  %v2181_v32 = vmul.f32 %v7777_v36, %v7776_v40  ;;  %v7779_v22 = vrot.slane %v6181_v57, 5  ;;  %v2282_v52 = vmul.f32 %v7780_v53, %v4794_v25  ;;  %v7784_v57 = vld [vmem:[#allocation136_spill] sm:$0xff]  ;;  %v7785_v36 = vld [vmem:[#allocation81_spill] sm:$0xff] }
 0x2e9   :  { %v1597_v44 = vmul.f32 %v7782_v48, %v7781_v9  ;;  %v1567_v47 = vadd.f32 %v1563_v41, %v1531_v42  ;;  %v1599_v40 = vmul.f32 %v7782_v48, %v7783_v16  ;;  %v7787_v25 = vld [vmem:[#allocation101_spill] sm:$0xff]  ;;  %v6254_v9 = vmul.f32 %v7780_v53, %v4397_v27  ;;  %v7788_v42 = vld [vmem:[#allocation91_spill] sm:$0xff]  ;;  %v7793_v27 = vld [vmem:[#allocation102_spill] sm:$0xff] }
 0x2ea   :  { %v6217_v21 = vpop.permute.xlu1 %2422  ;;  %2812 = vrot.lane.b32.xlu1 %v6075_v63, %s3746_s13  ;;  %v6229_v49 = vpop.permute.xlu0 %2448  ;;  %v2142_v56 = vsel %vm953_vm11, %v7779_v22, %v2141_v34  ;;  %v1565_v6 = vadd.f32 %v1561_v18, %v1529_v38  ;;  %v2199_v34 = vmul.f32 %v7785_v36, %v7784_v57  ;;  %v1615_v18 = vmul.f32 %v7787_v25, %v7786_v12  ;;  %v7790_v12 = vld [vmem:[#allocation83_spill] sm:$0xff] }
 0x2eb   :  { %7778 = vst [vmem:[#allocation62_spill] sm:$0xff] %v6229_v49  ;;  %2814 = vrot.lane.b32.xlu0 %v6090_v59, %s3746_s13  ;;  %v2153_v49 = vadd.f32 %v2142_v56, %v2121_v24  ;;  %v6250_v38 = vmul.f32 %v7735_v33, %v7741_v54  ;;  %v1585_v24 = vadd.f32 %v1581_v3, %v1567_v47  ;;  %v7789_v56 = vld [vmem:[#allocation72_spill] sm:$0xff]  ;;  %v2296_v16 = vrot.slane %v2282_v52, 6  ;;  %v7792_v54 = vld [vmem:[#allocation93_spill] sm:$0xff]  ;;  %v7794_v3 = vld [vmem:[#allocation94_spill] sm:$0xff] }
 0x2ec   :  { %v1583_v22 = vadd.f32 %v1579_v17, %v1565_v6  ;;  %v1617_v57 = vmul.f32 %v7787_v25, %v7788_v42  ;;  %v2217_v6 = vmul.f32 %v7790_v12, %v7789_v56  ;;  %v1633_v53 = vmul.f32 %v7793_v27, %v7792_v54 }
 0x2ed   :  { %v2185_v17 = vadd.f32 %v2181_v32, %v2153_v49  ;;  %v1829_v45 = vrot.slane %v1816_v4, 3  ;;  %v1603_v50 = vadd.f32 %v1599_v40, %v1585_v24  ;;  %v1635_v47 = vmul.f32 %v7793_v27, %v7794_v3  ;;  %v7795_v32 = vld [vmem:[#allocation66_spill] sm:$0xff]  ;;  %v7797_v24 = vld [vmem:[#allocation100_spill] sm:$0xff] }
 0x2ee   :  { %v6256_v41 = vpop.permute.xlu1 %2446  ;;  %2816 = vrot.lane.b32.xlu1 %v6103_v10, %s3746_s13  ;;  %v6264_v48 = vpop.permute.xlu0 %2462  ;;  %v1601_v36 = vadd.f32 %v1597_v44, %v1583_v22  ;;  %v2235_v49 = vmul.f32 %v5965_v15, %v7795_v32  ;;  %v1664_v52 = vmul.f32 %v7764_v13, %v7744_v0  ;;  %v7796_v22 = vld [vmem:[#allocation97_spill] sm:$0xff]  ;;  %v7449_v4 = vrot.slane %v6254_v9, 6 }
 0x2ef   :  { %7791 = vst [vmem:[#allocation39_spill] sm:$0xff] %v6264_v48  ;;  %2828 = vrot.lane.b32.xlu0 %v6069_v11, %s3747_s14  ;;  %v2203_v25 = vadd.f32 %v2199_v34, %v2185_v17  ;;  %v1651_v54 = vmul.f32 %v7710_v61, %v7796_v22  ;;  %v1621_v34 = vadd.f32 %v1617_v57, %v1603_v50  ;;  %v7798_v13 = vld [vmem:[#allocation9_spill] sm:$0xff]  ;;  %v7800_v3 = vrot.slane %v5961_v2, 2 }
 0x2f0   :  { %v1619_v44 = vadd.f32 %v1615_v18, %v1601_v36  ;;  %v1653_v42 = vmul.f32 %v7710_v61, %v7797_v24  ;;  %v7799_v36 = vld [vmem:[#allocation89_spill] sm:$0xff]  ;;  %v6297_v22 = vstv %s6227_s29  ;;  %v6302_v50 = vstv %s6240_s30  ;;  %s7000_s29 = sld [smem:[#allocation3 + $0x41]] }
 0x2f1   :  { %v2221_v17 = vadd.f32 %v2217_v6, %v2203_v25  ;;  %v2253_v18 = vmul.f32 %v7799_v36, %v7798_v13  ;;  %v1676_v32 = vsel %vm1673_vm13, %v1674_v29, %v7800_v3  ;;  %v1639_v61 = vadd.f32 %v1635_v47, %v1621_v34  ;;  %v7801_v6 = vld [vmem:[#allocation92_spill] sm:$0xff]  ;;  %v7807_v3 = vld [vmem:[#allocation118_spill] sm:$0xff]  ;;  %s7011_s30 = sld [smem:[#allocation3 + $0x42]] }
 0x2f2   :  { %v6281_v40 = vpop.permute.xlu1 %2450  ;;  %2830 = vrot.lane.b32.xlu1 %v6075_v63, %s3747_s14  ;;  %v6289_v56 = vpop.permute.xlu0 %2466  ;;  %v1637_v27 = vadd.f32 %v1633_v53, %v1619_v44  ;;  %v2271_v25 = vmul.f32 %v5984_v14, %v7801_v6  ;;  %v2897_v53 = vrot.slane %v5731_v37, 3  ;;  %v1679_v44 = vrot.slane %v1664_v52, 2 }
 0x2f3   :  { %2832 = vrot.lane.b32.xlu0 %v6090_v59, %s3747_s14  ;;  %v2239_v57 = vadd.f32 %v2235_v49, %v2221_v17  ;;  %v7802_v29 = vrot.slane %v6025_v31, 3  ;;  %v2297_v13 = vsel %vm2292_vm0, %v7449_v4, %v2296_v16  ;;  %v1657_v49 = vadd.f32 %v1653_v42, %v1639_v61 }
 0x2f4   :  { %v1655_v2 = vadd.f32 %v1651_v54, %v1637_v27  ;;  %v2896_v31 = vrot.slane %v5722_v23, 3  ;;  %v7804_v54 = vld [vmem:[#allocation17_spill] sm:$0xff]  ;;  %v7806_v27 = vld [vmem:[#allocation103_spill] sm:$0xff]  ;;  %v2902_v42 = vrot.slane %v5746_v26, 3  ;;  %v6348_v4 = vstv %s6279_s4  ;;  %s7017_s4 = sld [smem:[#allocation3 + $0x43]] }
 0x2f5   :  { %v6310_v24 = vsel %vm1828_vm14, %v1829_v45, %v7802_v29  ;;  %v2257_v34 = vadd.f32 %v2253_v18, %v2239_v57  ;;  %v2899_v45 = vrot.slane %v5840_v43, 3  ;;  %v7805_v17 = vrot.slane %v7804_v54, 2  ;;  %v7808_v18 = vld [vmem:[#allocation105_spill] sm:$0xff] }
 0x2f6   :  { %v6317_v47 = vpop.permute.xlu1 %2464  ;;  %2834 = vrot.lane.b32.xlu1 %v6103_v10, %s3747_s14  ;;  %v6321_v52 = vpop.permute.xlu0 %2480  ;;  %v1716_v6 = vmul.f32 %v7807_v3, %v7806_v27  ;;  %v6332_v29 = vmul.f32 %v7728_v35, %v7744_v0  ;;  %v1718_v61 = vmul.f32 %v7807_v3, %v7808_v18  ;;  %v2901_v54 = vrot.slane %v5737_v39, 3  ;;  %v7809_v35 = vld [vmem:[#allocation107_spill] sm:$0xff] }
 0x2f7   :  { %7803 = vst [vmem:[#allocation64_spill] sm:$0xff] %v6321_v52  ;;  %v1681_v16 = vsel %vm1673_vm13, %v1679_v44, %v7805_v17  ;;  %2846 = vrot.lane.b32.xlu0 %v6069_v11, %s3748_s15  ;;  %v2275_v57 = vadd.f32 %v2271_v25, %v2257_v34  ;;  %v6342_v44 = vsel %vm1828_vm14, %v2896_v31, %v2897_v53  ;;  %v2904_v25 = vrot.slane %v5862_v51, 3  ;;  %v7810_v31 = vld [vmem:[#allocation108_spill] sm:$0xff]  ;;  %v7812_v52 = vld [vmem:[#allocation110_spill] sm:$0xff] }
 0x2f8   :  { %v1688_v17 = vadd.f32 %v1676_v32, %v1655_v2  ;;  %v1734_v27 = vmul.f32 %v7718_v7, %v7809_v35  ;;  %v1690_v34 = vadd.f32 %v1681_v16, %v1657_v49  ;;  %v1736_v3 = vmul.f32 %v7718_v7, %v7810_v31  ;;  %v7813_v49 = vld [vmem:[#allocation111_spill] sm:$0xff] }
 0x2f9   :  { %v2336_v32 = vmul.f32 %v6348_v4, %v6000_v62  ;;  %v6364_v18 = vsel %vm1828_vm14, %v2897_v53, %v2899_v45  ;;  %v1752_v48 = vmul.f32 %v7720_v30, %v7812_v52  ;;  %v6376_v7 = vsel %vm1828_vm14, %v2901_v54, %v2902_v42 }
 0x2fa   :  { %v6352_v11 = vpop.permute.xlu1 %2468  ;;  %2848 = vrot.lane.b32.xlu1 %v6075_v63, %s3748_s15  ;;  %v6361_v2 = vpop.permute.xlu0 %2484  ;;  %v1720_v35 = vadd.f32 %v1716_v6, %v1688_v17  ;;  %v6369_v63 = vstv %s6294_s0  ;;  %v1722_v62 = vadd.f32 %v1718_v61, %v1690_v34  ;;  %v1754_v16 = vmul.f32 %v7720_v30, %v7813_v49  ;;  %v7814_v6 = vld [vmem:[#allocation113_spill] sm:$0xff]  ;;  %s7033_s0 = sld [smem:[#allocation3 + $0x44]] }
 0x2fb   :  { %7811 = vst [vmem:[#allocation65_spill] sm:$0xff] %v6361_v2  ;;  %2850 = vrot.lane.b32.xlu0 %v6090_v59, %s3748_s15  ;;  %v2308_v53 = vadd.f32 %v2297_v13, %v2275_v57  ;;  %v2354_v45 = vmul.f32 %v6369_v63, %v6033_v8  ;;  %v1770_v17 = vmul.f32 %v7725_v28, %v7814_v6  ;;  %v6385_v31 = vstv %s6315_s5  ;;  %s7044_s5 = sld [smem:[#allocation3 + $0x45]] }
 0x2fc   :  { %v1738_v52 = vadd.f32 %v1734_v27, %v1720_v35  ;;  %v6392_v59 = vsel %vm1828_vm14, %v2902_v42, %v2904_v25  ;;  %v1740_v30 = vadd.f32 %v1736_v3, %v1722_v62  ;;  %v2338_v8 = vmul.f32 %v6348_v4, %v6015_v58  ;;  %v7816_v27 = vld [vmem:[#allocation114_spill] sm:$0xff]  ;;  %v7817_v35 = vld [vmem:[#allocation116_spill] sm:$0xff] }
 0x2fd   :  { %v2340_v13 = vadd.f32 %v2336_v32, %v2308_v53  ;;  %v2372_v61 = vmul.f32 %v6385_v31, %v6060_v20  ;;  %v1772_v34 = vmul.f32 %v7725_v28, %v7816_v27  ;;  %v6405_v42 = vstv %s6334_s6  ;;  %v7819_v32 = vld [vmem:[#allocation117_spill] sm:$0xff]  ;;  %v7820_v62 = vld [vmem:[#allocation120_spill] sm:$0xff]  ;;  %v7821_v53 = vld [vmem:[#allocation127_spill] sm:$0xff]  ;;  %s7092_s6 = sld [smem:[#allocation3 + $0x47]] }
 0x2fe   :  { %v6387_v2 = vpop.permute.xlu1 %2482  ;;  %2852 = vrot.lane.b32.xlu1 %v6103_v10, %s3748_s15  ;;  %v6398_v57 = vpop.permute.xlu0 %2498  ;;  %v1756_v54 = vadd.f32 %v1752_v48, %v1738_v52  ;;  %v7818_v10 = vld [vmem:[#allocation125_spill] sm:$0xff]  ;;  %v1758_v25 = vadd.f32 %v1754_v16, %v1740_v30  ;;  %v2356_v58 = vmul.f32 %v6369_v63, %v6042_v1  ;;  %v2390_v20 = vmul.f32 %v6405_v42, %v6105_v60  ;;  %v7822_v1 = vld [vmem:[#allocation106_spill] sm:$0xff]  ;;  %v7823_v30 = vld [vmem:[#allocation115_spill] sm:$0xff] }
 0x2ff   :  { %7815 = vst [vmem:[#allocation67_spill] sm:$0xff] %v6398_v57  ;;  %v1788_v49 = vmul.f32 %v7818_v10, %v7817_v35  ;;  %2910 = vrot.lane.b32.xlu0 %v6342_v44, %s3743_s9  ;;  %v2358_v3 = vadd.f32 %v2354_v45, %v2340_v13  ;;  %v1790_v28 = vmul.f32 %v7818_v10, %v7819_v32  ;;  %v6418_v6 = vstv %s6350_s7  ;;  %v7825_v10 = vld [vmem:[#allocation123_spill] sm:$0xff]  ;;  %s7102_s7 = sld [smem:[#allocation3 + $0x48]] }
 0x300   :  { %v1774_v48 = vadd.f32 %v1770_v17, %v1756_v54  ;;  %v1806_v52 = vmul.f32 %v7821_v53, %v7820_v62  ;;  %v2342_v45 = vadd.f32 %v2338_v8, %v7822_v1  ;;  %v2374_v17 = vmul.f32 %v6385_v31, %v7823_v30 }
 0x301   :  { %v2376_v60 = vadd.f32 %v2372_v61, %v2358_v3  ;;  %v2408_v13 = vmul.f32 %v6418_v6, %v6147_v19  ;;  %v1776_v27 = vadd.f32 %v1772_v34, %v1758_v25  ;;  %v1808_v32 = vmul.f32 %v7821_v53, %v7825_v10  ;;  %v7826_v3 = vld [vmem:[#allocation12_spill] sm:$0xff] }
 0x302   :  { %v6422_v16 = vpop.permute.xlu1 %2486  ;;  %2912 = vrot.lane.b32.xlu1 %v6364_v18, %s3743_s9  ;;  %v6431_v54 = vpop.permute.xlu0 %2502  ;;  %v1792_v35 = vadd.f32 %v1788_v49, %v1774_v48  ;;  %v6436_v62 = vstv %s6371_s8  ;;  %v2360_v8 = vadd.f32 %v2356_v58, %v2342_v45  ;;  %v2392_v1 = vmul.f32 %v6405_v42, %v7826_v3  ;;  %v7828_v45 = vld [vmem:[#allocation18_spill] sm:$0xff]  ;;  %s3647_s8 = sld [smem:[#allocation3 + $0x49]] }
 0x303   :  { %7824 = vst [vmem:[#allocation68_spill] sm:$0xff] %v6431_v54  ;;  %2914 = vrot.lane.b32.xlu0 %v6376_v7, %s3743_s9  ;;  %v2394_v61 = vadd.f32 %v2390_v20, %v2376_v60  ;;  %v2426_v19 = vmul.f32 %v6436_v62, %v6195_v5  ;;  %v1794_v34 = vadd.f32 %v1790_v28, %v1776_v27  ;;  %v1834_v49 = vrot.slane %v6332_v29, 3 }
 0x304   :  { %v6453_v48 = vmul.f32 %v6302_v50, %v5731_v37  ;;  %v6457_v58 = vmul.f32 %v6302_v50, %v5840_v43  ;;  %v1810_v20 = vadd.f32 %v1806_v52, %v1792_v35  ;;  %v2378_v5 = vadd.f32 %v2374_v17, %v2360_v8  ;;  %v7831_v17 = vld [vmem:[#allocation31_spill] sm:$0xff] }
 0x305   :  { %v2412_v28 = vadd.f32 %v2408_v13, %v2394_v61  ;;  %v2410_v29 = vmul.f32 %v6418_v6, %v6169_v46  ;;  %v7829_v60 = vrot.slane %v7828_v45, 3  ;;  %v1812_v27 = vadd.f32 %v1808_v32, %v1794_v34  ;;  %v7830_v46 = vld [vmem:[#allocation126_spill] sm:$0xff]  ;;  %v7832_v61 = vld [vmem:[#allocation128_spill] sm:$0xff] }
 0x306   :  { %v2501_v25 = vpop.permute.xlu1 %2500  ;;  %2916 = vrot.lane.b32.xlu1 %v6392_v59, %s3743_s9  ;;  %v6461_v53 = vpop.permute.xlu0 %2516  ;;  %v6468_v10 = vmul.f32 %v7735_v33, %v7744_v0  ;;  %v2436_v52 = vmul.f32 %v6297_v22, %v5731_v37  ;;  %v1871_v13 = vmul.f32 %v7831_v17, %v7830_v46  ;;  %v2396_v35 = vadd.f32 %v2392_v1, %v2378_v5  ;;  %v7833_v5 = vld [vmem:[#allocation129_spill] sm:$0xff] }
 0x307   :  { %7827 = vst [vmem:[#allocation70_spill] sm:$0xff] %v6461_v53  ;;  %v1836_v30 = vsel %vm1828_vm14, %v1834_v49, %v7829_v60  ;;  %2928 = vrot.lane.b32.xlu0 %v6342_v44, %s3744_s10  ;;  %v2430_v8 = vadd.f32 %v2426_v19, %v2412_v28  ;;  %v2428_v32 = vmul.f32 %v6436_v62, %v6217_v21  ;;  %v6483_v3 = vstv %s6420_s11  ;;  %v7834_v21 = vld [vmem:[#allocation27_spill] sm:$0xff]  ;;  %s3648_s11 = sld [smem:[#allocation3 + $0x4a]] }
 0x308   :  { %v1873_v33 = vmul.f32 %v7831_v17, %v7832_v61  ;;  %v1843_v19 = vadd.f32 %v6310_v24, %v1810_v20  ;;  %v1889_v28 = vmul.f32 %v7834_v21, %v7833_v5  ;;  %v2414_v45 = vadd.f32 %v2410_v29, %v2396_v35  ;;  %v7836_v61 = vld [vmem:[#allocation130_spill] sm:$0xff] }
 0x309   :  { %v2454_v60 = vmul.f32 %v6483_v3, %v6256_v41  ;;  %v1845_v17 = vadd.f32 %v1836_v30, %v1812_v27  ;;  %v1891_v53 = vmul.f32 %v7834_v21, %v7836_v61  ;;  %v2438_v49 = vmul.f32 %v6297_v22, %v5746_v26  ;;  %v7838_v30 = vld [vmem:[#allocation132_spill] sm:$0xff] }
 0x30a   :  { %v2505_v34 = vpop.permute.xlu1 %2504  ;;  %2930 = vrot.lane.b32.xlu1 %v6364_v18, %s3744_s10  ;;  %v6496_v46 = vpop.permute.xlu0 %2520  ;;  %v6503_v1 = vstv %s6438_s16  ;;  %v1875_v24 = vadd.f32 %v1871_v13, %v1843_v19  ;;  %v2440_v20 = vadd.f32 %v2436_v52, %v2430_v8  ;;  %v2432_v29 = vadd.f32 %v2428_v32, %v2414_v45  ;;  %v7839_v27 = vld [vmem:[#allocation28_spill] sm:$0xff]  ;;  %v7841_v45 = vld [vmem:[#allocation131_spill] sm:$0xff]  ;;  %s3649_s16 = sld [smem:[#allocation3 + $0x4b]] }
 0x30b   :  { %7835 = vst [vmem:[#allocation71_spill] sm:$0xff] %v6496_v46  ;;  %7837 = vst [vmem:[#allocation74_spill] sm:$0xff] %v6503_v1  ;;  %2932 = vrot.lane.b32.xlu0 %v6376_v7, %s3744_s10  ;;  %v2472_v41 = vmul.f32 %v6503_v1, %v6317_v47  ;;  %v1877_v35 = vadd.f32 %v1873_v33, %v1845_v17  ;;  %v1909_v5 = vmul.f32 %v7839_v27, %v7838_v30  ;;  %v7842_v30 = vld [vmem:[#allocation134_spill] sm:$0xff]  ;;  %v7843_v46 = vld [vmem:[#allocation33_spill] sm:$0xff] }
 0x30c   :  { %v6512_v21 = vstv %s6447_s17  ;;  %v6520_v52 = vmul.f32 %v6302_v50, %v5746_v26  ;;  %v1893_v13 = vadd.f32 %v1889_v28, %v1875_v24  ;;  %v2458_v8 = vadd.f32 %v2454_v60, %v2440_v20  ;;  %s3650_s17 = sld [smem:[#allocation3 + $0x4c]] }
 0x30d   :  { %v2456_v47 = vmul.f32 %v6483_v3, %v6281_v40  ;;  %v2490_v32 = vmul.f32 %v6512_v21, %v6387_v2  ;;  %v1895_v19 = vadd.f32 %v1891_v53, %v1877_v35  ;;  %v1907_v17 = vmul.f32 %v7839_v27, %v7841_v45  ;;  %v7844_v53 = vld [vmem:[#allocation133_spill] sm:$0xff]  ;;  %v7845_v35 = vld [vmem:[#allocation30_spill] sm:$0xff] }
 0x30e   :  { %v2519_v61 = vpop.permute.xlu1 %2518  ;;  %2934 = vrot.lane.b32.xlu1 %v6392_v59, %s3744_s10  ;;  %v6526_v33 = vpop.permute.xlu0 %2534  ;;  %v1927_v57 = vmul.f32 %v7843_v46, %v7842_v30  ;;  %v6533_v54 = vstv %s6472_s18  ;;  %v2442_v28 = vadd.f32 %v2438_v49, %v2432_v29  ;;  %v2476_v60 = vadd.f32 %v2472_v41, %v2458_v8  ;;  %v7846_v27 = vld [vmem:[#allocation34_spill] sm:$0xff]  ;;  %v7847_v8 = vld [vmem:[#allocation29_spill] sm:$0xff]  ;;  %s3651_s18 = sld [smem:[#allocation3 + $0x4d]] }
 0x30f   :  { %7840 = vst [vmem:[#allocation78_spill] sm:$0xff] %v6526_v33  ;;  %2946 = vrot.lane.b32.xlu0 %v6342_v44, %s3745_s12  ;;  %v2474_v40 = vmul.f32 %v6503_v1, %v6352_v11  ;;  %v2508_v2 = vmul.f32 %v6533_v54, %v2501_v25  ;;  %v1913_v24 = vadd.f32 %v1909_v5, %v1895_v19  ;;  %v6545_v30 = vstv %s6485_s1  ;;  %s3657_s1 = sld [smem:[#allocation3 + $0x53]] }
 0x310   :  { %v1925_v20 = vmul.f32 %v7843_v46, %v7844_v53  ;;  %v1945_v45 = vmul.f32 %v7846_v27, %v7845_v35  ;;  %v2460_v49 = vadd.f32 %v2456_v47, %v2442_v28  ;;  %v2494_v29 = vadd.f32 %v2490_v32, %v2476_v60  ;;  %v7848_v53 = vld [vmem:[#allocation32_spill] sm:$0xff]  ;;  %v7849_v35 = vld [vmem:[#allocation37_spill] sm:$0xff] }
 0x311   :  { %v2492_v11 = vmul.f32 %v6512_v21, %v6422_v16  ;;  %v2526_v25 = vmul.f32 %v6545_v30, %v2519_v61  ;;  %v1911_v46 = vadd.f32 %v1907_v17, %v1893_v13  ;;  %v1931_v5 = vadd.f32 %v1927_v57, %v1913_v24  ;;  %v7850_v13 = vld [vmem:[#allocation25_spill] sm:$0xff] }
 0x312   :  { %v2523_v33 = vpop.permute.xlu1 %2522  ;;  %2948 = vrot.lane.b32.xlu1 %v6364_v18, %s3745_s12  ;;  %v6552_v41 = vpop.permute.xlu0 %2538  ;;  %v1943_v19 = vmul.f32 %v7846_v27, %v7847_v8  ;;  %v1963_v1 = vmul.f32 %v7849_v35, %v7848_v53  ;;  %v2478_v47 = vadd.f32 %v2474_v40, %v2460_v49  ;;  %v2512_v32 = vadd.f32 %v2508_v2, %v2494_v29 }
 0x313   :  { %2950 = vrot.lane.b32.xlu0 %v6376_v7, %s3745_s12  ;;  %v2510_v28 = vmul.f32 %v6533_v54, %v2505_v34  ;;  %v2558_v16 = vmul.f32 %v6302_v50, %v5862_v51  ;;  %v1929_v61 = vadd.f32 %v1925_v20, %v1911_v46  ;;  %v1949_v60 = vadd.f32 %v1945_v45, %v1931_v5 }
 0x314   :  { %v1961_v57 = vmul.f32 %v7849_v35, %v7850_v13  ;;  %v6566_v17 = vstv %s6516_s19  ;;  %v2496_v27 = vadd.f32 %v2492_v11, %v2478_v47  ;;  %v2530_v8 = vadd.f32 %v2526_v25, %v2512_v32  ;;  %v7852_v35 = vld [vmem:[#allocation48_spill] sm:$0xff]  ;;  %s3658_s19 = sld [smem:[#allocation3 + $0x54]] }
 0x315   :  { %v2528_v40 = vmul.f32 %v6545_v30, %v2523_v33  ;;  %v1947_v49 = vadd.f32 %v1943_v19, %v1929_v61  ;;  %v1989_v20 = vrot.slane %v6468_v10, 4  ;;  %v1967_v45 = vadd.f32 %v1963_v1, %v1949_v60  ;;  %v7851_v33 = vld [vmem:[#allocation38_spill] sm:$0xff] }
 0x316   :  { %v2537_v24 = vpop.permute.xlu1 %2536  ;;  %2952 = vrot.lane.b32.xlu1 %v6392_v59, %s3745_s12  ;;  %v6572_v2 = vpop.permute.xlu0 %2602  ;;  %v2514_v29 = vadd.f32 %v2510_v28, %v2496_v27  ;;  %v7452_v46 = vrot.slane %v6520_v52, 1  ;;  %v2573_v53 = vrot.slane %v2558_v16, 1  ;;  %v1984_v11 = vrot.slane %v6250_v38, 4  ;;  %v7855_v28 = vld [vmem:[#allocation19_spill] sm:$0xff] }
 0x317   :  { %v2544_v34 = vmul.f32 %v6566_v17, %v2537_v24  ;;  %2964 = vrot.lane.b32.xlu0 %v6342_v44, %s3746_s13  ;;  %v1965_v25 = vadd.f32 %v1961_v57, %v1947_v49  ;;  %v2028_v47 = vmul.f32 %v7852_v35, %v7851_v33  ;;  %v7853_v32 = vrot.slane %v6457_v58, 1  ;;  %v7857_v24 = vld [vmem:[#allocation36_spill] sm:$0xff]  ;;  %v7859_v49 = vld [vmem:[#allocation119_spill] sm:$0xff] }
 0x318   :  { %v7854_v19 = vrot.slane %v6453_v48, 1  ;;  %v7856_v61 = vrot.slane %v7855_v28, 4  ;;  %v2532_v60 = vadd.f32 %v2528_v40, %v2514_v29  ;;  %v2026_v27 = vmul.f32 %v7852_v35, %v7857_v24 }
 0x319   :  { %v2548_v5 = vadd.f32 %v2544_v34, %v2530_v8  ;;  %v7858_v8 = vld [vmem:[#allocation43_spill] sm:$0xff]  ;;  %v7860_v33 = vrot.slane %v7859_v49, 4  ;;  %v2574_v29 = vsel %vm1514_vm12, %v7452_v46, %v2573_v53  ;;  %v7864_v53 = vld [vmem:[#allocation44_spill] sm:$0xff] }
 0x31a   :  { %v2569_v10 = vsel %vm1514_vm12, %v7854_v19, %v7853_v32  ;;  %v2541_v1 = vpop.permute.xlu1 %2540  ;;  %2966 = vrot.lane.b32.xlu1 %v6364_v18, %s3746_s13  ;;  %v1991_v16 = vsel %vm1983_vm15, %v1989_v20, %v7856_v61  ;;  %v6594_v57 = vpop.permute.xlu0 %2606  ;;  %v2046_v34 = vmul.f32 %v5772_v55, %v7858_v8  ;;  %v7861_v32 = vld [vmem:[#allocation42_spill] sm:$0xff]  ;;  %v7862_v19 = vld [vmem:[#allocation45_spill] sm:$0xff] }
 0x31b   :  { %v6591_v38 = vadd.f32 %v2569_v10, %v2548_v5  ;;  %v2546_v13 = vmul.f32 %v6566_v17, %v2541_v1  ;;  %v2000_v58 = vadd.f32 %v1991_v16, %v1967_v45  ;;  %2968 = vrot.lane.b32.xlu0 %v6376_v7, %s3746_s13  ;;  %v1986_v40 = vsel %vm1983_vm15, %v1984_v11, %v7860_v33  ;;  %v7863_v10 = vld [vmem:[#allocation50_spill] sm:$0xff]  ;;  %v7868_v33 = vld [vmem:[#allocation47_spill] sm:$0xff] }
 0x31c   :  { %v1998_v5 = vadd.f32 %v1986_v40, %v1965_v25  ;;  %v2044_v35 = vmul.f32 %v5772_v55, %v7861_v32  ;;  %v2064_v1 = vmul.f32 %v7863_v10, %v7862_v19  ;;  %v2062_v25 = vmul.f32 %v7863_v10, %v7864_v53  ;;  %v7867_v8 = vld [vmem:[#allocation46_spill] sm:$0xff]  ;;  %v7869_v40 = vld [vmem:[#allocation53_spill] sm:$0xff]  ;;  %v7872_v19 = vld [vmem:[#allocation56_spill] sm:$0xff] }
 0x31d   :  { %v2550_v20 = vadd.f32 %v2546_v13, %v2532_v60  ;;  %v2032_v45 = vadd.f32 %v2028_v47, %v2000_v58  ;;  %v7865_v47 = vld [vmem:[#allocation40_spill] sm:$0xff] }
 0x31e   :  { %v6612_v28 = vpop.permute.xlu1 %2604  ;;  %2970 = vrot.lane.b32.xlu1 %v6392_v59, %s3746_s13  ;;  %v6618_v11 = vpop.permute.xlu0 %2620  ;;  %v2030_v16 = vadd.f32 %v2026_v27, %v1998_v5  ;;  %v7866_v13 = vld [vmem:[#allocation52_spill] sm:$0xff] }
 0x31f   :  { %v6616_v61 = vadd.f32 %v2574_v29, %v2550_v20  ;;  %v2050_v60 = vadd.f32 %v2046_v34, %v2032_v45  ;;  %v2082_v55 = vmul.f32 %v7866_v13, %v7865_v47  ;;  %2982 = vrot.lane.b32.xlu0 %v6342_v44, %s3747_s14  ;;  %v2080_v49 = vmul.f32 %v7866_v13, %v7867_v8  ;;  %v7870_v45 = vld [vmem:[#allocation41_spill] sm:$0xff] }
 0x320   :  { %v2048_v58 = vadd.f32 %v2044_v35, %v2030_v16  ;;  %v2100_v20 = vmul.f32 %v7869_v40, %v7868_v33  ;;  %v2098_v32 = vmul.f32 %v7869_v40, %v7870_v45  ;;  %v7871_v35 = vld [vmem:[#allocation51_spill] sm:$0xff]  ;;  %v7874_v47 = vld [vmem:[#allocation49_spill] sm:$0xff] }
 0x321   :  { %v2068_v24 = vadd.f32 %v2064_v1, %v2050_v60  ;;  %v2118_v10 = vmul.f32 %v7872_v19, %v7871_v35  ;;  %v7873_v1 = vld [vmem:[#allocation13_spill] sm:$0xff]  ;;  %v2116_v13 = vmul.f32 %v7872_v19, %v7874_v47  ;;  %v7879_v19 = vld [vmem:[#allocation20_spill] sm:$0xff] }
 0x322   :  { %2984 = vrot.lane.b32.xlu1 %v6364_v18, %s3747_s14  ;;  %v6632_v27 = vpop.permute.xlu1 %2608  ;;  %v6634_v34 = vpop.permute.xlu0 %2624  ;;  %v2066_v29 = vadd.f32 %v2062_v25, %v2048_v58  ;;  %v2129_v16 = vmul.f32 %v7873_v1, %v7744_v0 }
 0x323   :  { %v2086_v5 = vadd.f32 %v2082_v55, %v2068_v24  ;;  %2986 = vrot.lane.b32.xlu0 %v6376_v7, %s3747_s14  ;;  %v7875_v55 = vld [vmem:[#allocation14_spill] sm:$0xff] }
 0x324   :  { %v2084_v60 = vadd.f32 %v2080_v49, %v2066_v29  ;;  %v2126_v58 = vmul.f32 %v7873_v1, %v7875_v55  ;;  %v2143_v49 = vrot.slane %v2129_v16, 5  ;;  %v7878_v29 = vld [vmem:[#allocation73_spill] sm:$0xff]  ;;  %v7880_v1 = vrot.slane %v7879_v19, 5  ;;  %v7882_v16 = vld [vmem:[#allocation55_spill] sm:$0xff] }
 0x325   :  { %v2104_v53 = vadd.f32 %v2100_v20, %v2086_v5  ;;  %v7877_v20 = vld [vmem:[#allocation57_spill] sm:$0xff]  ;;  %v3053_v19 = vrot.slane %v5840_v43, 4 }
 0x326   :  { %2988 = vrot.lane.b32.xlu1 %v6392_v59, %s3747_s14  ;;  %v6648_v25 = vpop.permute.xlu1 %2622  ;;  %v6652_v24 = vpop.permute.xlu0 %2638  ;;  %v2102_v8 = vadd.f32 %v2098_v32, %v2084_v60  ;;  %v2182_v5 = vmul.f32 %v7878_v29, %v7877_v20  ;;  %v2138_v35 = vrot.slane %v2126_v58, 5  ;;  %v2145_v47 = vsel %vm953_vm11, %v2143_v49, %v7880_v1 }
 0x327   :  { %7876 = vst [vmem:[#allocation54_spill] sm:$0xff] %v6652_v24  ;;  %v2122_v33 = vadd.f32 %v2118_v10, %v2104_v53  ;;  %3000 = vrot.lane.b32.xlu0 %v6342_v44, %s3748_s15  ;;  %v3051_v10 = vrot.slane %v5731_v37, 4  ;;  %v2180_v60 = vmul.f32 %v7878_v29, %v7882_v16  ;;  %v7883_v53 = vld [vmem:[#allocation135_spill] sm:$0xff]  ;;  %v3050_v49 = vrot.slane %v5722_v23, 4  ;;  %v7888_v29 = vld [vmem:[#allocation58_spill] sm:$0xff]  ;;  %v7906_v24 = vld [vmem:[#allocation121_spill] sm:$0xff] }
 0x328   :  { %v2120_v40 = vadd.f32 %v2116_v13, %v2102_v8  ;;  %v7884_v13 = vld [vmem:[#allocation81_spill] sm:$0xff]  ;;  %v2218_v16 = vmul.f32 %v7790_v12, %v7888_v29 }
 0x329   :  { %v2154_v44 = vadd.f32 %v2145_v47, %v2122_v33  ;;  %v2200_v8 = vmul.f32 %v7884_v13, %v7883_v53  ;;  %v7887_v33 = vld [vmem:[#allocation22_spill] sm:$0xff]  ;;  %v6692_v53 = vsel %vm1983_vm15, %v3050_v49, %v3051_v10  ;;  %v3058_v49 = vrot.slane %v5862_v51, 4 }
 0x32a   :  { %3002 = vrot.lane.b32.xlu1 %v6364_v18, %s3748_s15  ;;  %v6660_v45 = vpop.permute.xlu1 %2626  ;;  %v6665_v32 = vpop.permute.xlu0 %2642  ;;  %v7885_v18 = vld [vmem:[#allocation61_spill] sm:$0xff]  ;;  %v2198_v47 = vmul.f32 %v7884_v13, %v7887_v33  ;;  %v3055_v33 = vrot.slane %v5737_v39, 4 }
 0x32b   :  { %7881 = vst [vmem:[#allocation10_spill] sm:$0xff] %v6665_v32  ;;  %3004 = vrot.lane.b32.xlu0 %v6376_v7, %s3748_s15  ;;  %v7886_v58 = vrot.slane %v7885_v18, 5  ;;  %v2186_v46 = vadd.f32 %v2182_v5, %v2154_v44  ;;  %v7890_v13 = vld [vmem:[#allocation137_spill] sm:$0xff]  ;;  %v6784_v32 = vstv %s6725_s22  ;;  %s3665_s22 = sld [smem:[#allocation3 + $0x5b]] }
 0x32c   :  { %v2216_v18 = vmul.f32 %v7790_v12, %v7890_v13 }
 0x32d   :  { %v2140_v20 = vsel %vm953_vm11, %v2138_v35, %v7886_v58  ;;  %v2204_v44 = vadd.f32 %v2200_v8, %v2186_v46  ;;  %v7891_v58 = vld [vmem:[#allocation63_spill] sm:$0xff]  ;;  %v7893_v8 = vld [vmem:[#allocation69_spill] sm:$0xff] }
 0x32e   :  { %v2152_v1 = vadd.f32 %v2140_v20, %v2120_v40  ;;  %3006 = vrot.lane.b32.xlu1 %v6392_v59, %s3748_s15  ;;  %v6685_v7 = vpop.permute.xlu1 %2640  ;;  %v6689_v35 = vpop.permute.xlu0 %2656  ;;  %v3056_v40 = vrot.slane %v5746_v26, 4  ;;  %v2236_v20 = vmul.f32 %v5965_v15, %v7891_v58  ;;  %v6702_v59 = vsel %vm1983_vm15, %v3051_v10, %v3053_v19  ;;  %v7897_v58 = vld [vmem:[#allocation23_spill] sm:$0xff] }
 0x32f   :  { %7889 = vst [vmem:[#allocation80_spill] sm:$0xff] %v6689_v35  ;;  %3064 = vrot.lane.b32.xlu0 %v6692_v53, %s3743_s9  ;;  %v2222_v35 = vadd.f32 %v2218_v16, %v2204_v44  ;;  %v2254_v12 = vmul.f32 %v7799_v36, %v7893_v8  ;;  %v7896_v44 = vld [vmem:[#allocation86_spill] sm:$0xff] }
 0x330   :  { %v2184_v5 = vadd.f32 %v2180_v60, %v2152_v1  ;;  %v7892_v60 = vld [vmem:[#allocation75_spill] sm:$0xff]  ;;  %v6719_v19 = vsel %vm1983_vm15, %v3055_v33, %v3056_v40  ;;  %v2272_v13 = vmul.f32 %v5984_v14, %v7896_v44  ;;  %v2283_v33 = vmul.f32 %v7897_v58, %v7744_v0 }
 0x331   :  { %v2234_v46 = vmul.f32 %v5965_v15, %v7892_v60  ;;  %v2240_v16 = vadd.f32 %v2236_v20, %v2222_v35  ;;  %v2280_v60 = vmul.f32 %v7897_v58, %v7875_v55  ;;  %v6736_v35 = vsel %vm1983_vm15, %v3056_v40, %v3058_v49  ;;  %v7898_v20 = vld [vmem:[#allocation79_spill] sm:$0xff] }
 0x332   :  { %v2202_v29 = vadd.f32 %v2198_v47, %v2184_v5  ;;  %3066 = vrot.lane.b32.xlu1 %v6702_v59, %s3743_s9  ;;  %v6714_v1 = vpop.permute.xlu1 %2644  ;;  %v6716_v10 = vpop.permute.xlu0 %2660  ;;  %v7895_v5 = vld [vmem:[#allocation77_spill] sm:$0xff]  ;;  %v6764_v58 = vstv %s6710_s21  ;;  %s3661_s21 = sld [smem:[#allocation3 + $0x57]] }
 0x333   :  { %7894 = vst [vmem:[#allocation95_spill] sm:$0xff] %v6716_v10  ;;  %v2252_v15 = vmul.f32 %v7799_v36, %v7895_v5  ;;  %3068 = vrot.lane.b32.xlu0 %v6719_v19, %s3743_s9  ;;  %v6743_v5 = vstv %s6687_s20  ;;  %s3660_s20 = sld [smem:[#allocation3 + $0x56]] }
 0x334   :  { %v2220_v47 = vadd.f32 %v2216_v18, %v2202_v29  ;;  %v2258_v18 = vadd.f32 %v2254_v12, %v2240_v16  ;;  %v2270_v29 = vmul.f32 %v5984_v14, %v7898_v20  ;;  %v6751_v55 = vmul.f32 %v6743_v5, %v5731_v37  ;;  %v7900_v16 = vld [vmem:[#allocation104_spill] sm:$0xff] }
 0x335   :  { %v2293_v14 = vrot.slane %v2280_v60, 6  ;;  %v6759_v12 = vmul.f32 %v6743_v5, %v5840_v43  ;;  %v2337_v44 = vmul.f32 %v6348_v4, %v7900_v16  ;;  %v2612_v20 = vmul.f32 %v6764_v58, %v6612_v28 }
 0x336   :  { %v2238_v36 = vadd.f32 %v2234_v46, %v2220_v47  ;;  %3070 = vrot.lane.b32.xlu1 %v6736_v35, %s3743_s9  ;;  %v2659_v8 = vpop.permute.xlu1 %2658  ;;  %v6747_v0 = vpop.permute.xlu0 %2674  ;;  %v2276_v49 = vadd.f32 %v2272_v13, %v2258_v18  ;;  %v2298_v46 = vrot.slane %v2283_v33, 6  ;;  %v7901_v13 = vrot.slane %v6254_v9, 6  ;;  %v7902_v33 = vld [vmem:[#allocation24_spill] sm:$0xff] }
 0x337   :  { %7899 = vst [vmem:[#allocation76_spill] sm:$0xff] %v6747_v0  ;;  %3082 = vrot.lane.b32.xlu0 %v6692_v53, %s3744_s10  ;;  %v7905_v0 = vld [vmem:[#allocation96_spill] sm:$0xff]  ;;  %v2355_v9 = vmul.f32 %v6369_v63, %v7906_v24  ;;  %v2630_v28 = vmul.f32 %v6784_v32, %v6648_v25  ;;  %v7907_v24 = vld [vmem:[#allocation109_spill] sm:$0xff] }
 0x338   :  { %v2256_v40 = vadd.f32 %v2252_v15, %v2238_v36  ;;  %v2295_v60 = vsel %vm2292_vm0, %v2293_v14, %v7901_v13  ;;  %v7903_v36 = vrot.slane %v7902_v33, 6  ;;  %v2335_v10 = vmul.f32 %v6348_v4, %v7905_v0  ;;  %v7908_v33 = vld [vmem:[#allocation122_spill] sm:$0xff]  ;;  %v7911_v4 = vld [vmem:[#allocation124_spill] sm:$0xff] }
 0x339   :  { %v6791_v14 = vstv %s6733_s23  ;;  %v2353_v13 = vmul.f32 %v6369_v63, %v7907_v24  ;;  %v7910_v24 = vld [vmem:[#allocation112_spill] sm:$0xff]  ;;  %s3662_s23 = sld [smem:[#allocation3 + $0x58]] }
 0x33a   :  { %v2274_v47 = vadd.f32 %v2270_v29, %v2256_v40  ;;  %3084 = vrot.lane.b32.xlu1 %v6702_v59, %s3744_s10  ;;  %v2663_v15 = vpop.permute.xlu1 %2662  ;;  %v2300_v18 = vsel %vm2292_vm0, %v2298_v46, %v7903_v36  ;;  %v6776_v29 = vpop.permute.xlu0 %2678  ;;  %v2373_v36 = vmul.f32 %v6385_v31, %v7908_v33  ;;  %v2614_v40 = vmul.f32 %v6764_v58, %v6632_v27 }
 0x33b   :  { %7904 = vst [vmem:[#allocation82_spill] sm:$0xff] %v6776_v29  ;;  %v2309_v16 = vadd.f32 %v2300_v18, %v2276_v49  ;;  %3086 = vrot.lane.b32.xlu0 %v6719_v19, %s3744_s10  ;;  %v6795_v49 = vmul.f32 %v6743_v5, %v5746_v26  ;;  %v2616_v18 = vadd.f32 %v2612_v20, %v6591_v38  ;;  %v6826_v20 = vstv %s6755_s25  ;;  %s3664_s25 = sld [smem:[#allocation3 + $0x5a]] }
 0x33c   :  { %v2307_v0 = vadd.f32 %v2295_v60, %v2274_v47  ;;  %v2648_v47 = vmul.f32 %v6791_v14, %v6685_v7  ;;  %v2371_v33 = vmul.f32 %v6385_v31, %v7910_v24  ;;  %v2391_v29 = vmul.f32 %v6405_v42, %v7911_v4  ;;  %v7913_v31 = vld [vmem:[#allocation35_spill] sm:$0xff]  ;;  %v7915_v24 = vld [vmem:[#allocation60_spill] sm:$0xff] }
 0x33d   :  { %v2341_v46 = vadd.f32 %v2337_v44, %v2309_v16  ;;  %v6812_v44 = vstv %s6745_s24  ;;  %v2634_v38 = vadd.f32 %v2630_v28, %v2616_v18  ;;  %v2632_v27 = vmul.f32 %v6784_v32, %v6660_v45  ;;  %s3663_s24 = sld [smem:[#allocation3 + $0x59]] }
 0x33e   :  { %3088 = vrot.lane.b32.xlu1 %v6736_v35, %s3744_s10  ;;  %v2677_v25 = vpop.permute.xlu1 %2676  ;;  %v6814_v63 = vpop.permute.xlu0 %2692  ;;  %v2339_v60 = vadd.f32 %v2335_v10, %v2307_v0  ;;  %v2666_v7 = vmul.f32 %v6812_v44, %v2659_v8  ;;  %v2618_v28 = vadd.f32 %v2614_v40, %v6616_v61  ;;  %v2650_v45 = vmul.f32 %v6791_v14, %v6714_v1 }
 0x33f   :  { %7909 = vst [vmem:[#allocation16_spill] sm:$0xff] %v6814_v63  ;;  %v2359_v16 = vadd.f32 %v2355_v9, %v2341_v46  ;;  %3100 = vrot.lane.b32.xlu0 %v6692_v53, %s3745_s12  ;;  %v7912_v9 = vld [vmem:[#allocation26_spill] sm:$0xff]  ;;  %v2409_v46 = vmul.f32 %v6418_v6, %v7913_v31  ;;  %v2652_v18 = vadd.f32 %v2648_v47, %v2634_v38 }
 0x340   :  { %v2357_v63 = vadd.f32 %v2353_v13, %v2339_v60  ;;  %v2389_v0 = vmul.f32 %v6405_v42, %v7912_v9  ;;  %v2684_v8 = vmul.f32 %v6826_v20, %v2677_v25  ;;  %v7914_v60 = vld [vmem:[#allocation11_spill] sm:$0xff]  ;;  %v2427_v9 = vmul.f32 %v6436_v62, %v7915_v24 }
 0x341   :  { %v2377_v10 = vadd.f32 %v2373_v36, %v2359_v16  ;;  %v2407_v16 = vmul.f32 %v6418_v6, %v7914_v60  ;;  %v2636_v61 = vadd.f32 %v2632_v27, %v2618_v28  ;;  %v2670_v40 = vadd.f32 %v2666_v7, %v2652_v18 }
 0x342   :  { %3102 = vrot.lane.b32.xlu1 %v6702_v59, %s3745_s12  ;;  %v2681_v4 = vpop.permute.xlu1 %2680  ;;  %v6838_v13 = vpop.permute.xlu0 %2696  ;;  %v2375_v36 = vadd.f32 %v2371_v33, %v2357_v63  ;;  %v2668_v47 = vmul.f32 %v6812_v44, %v2663_v15  ;;  %v2716_v1 = vmul.f32 %v6743_v5, %v5862_v51  ;;  %v7916_v63 = vld [vmem:[#allocation59_spill] sm:$0xff]  ;;  %v6852_v33 = vstv %s6804_s26  ;;  %s3666_s26 = sld [smem:[#allocation3 + $0x5c]] }
 0x343   :  { %v2395_v42 = vadd.f32 %v2391_v29, %v2377_v10  ;;  %3104 = vrot.lane.b32.xlu0 %v6719_v19, %s3745_s12  ;;  %v2425_v29 = vmul.f32 %v6436_v62, %v7916_v63  ;;  %v2654_v10 = vadd.f32 %v2650_v45, %v2636_v61  ;;  %v2688_v31 = vadd.f32 %v2684_v8, %v2670_v40  ;;  %v7917_v8 = vld [vmem:[#allocation62_spill] sm:$0xff] }
 0x344   :  { %v2393_v25 = vadd.f32 %v2389_v0, %v2375_v36  ;;  %v2686_v27 = vmul.f32 %v6826_v20, %v2681_v4  ;;  %v2731_v36 = vrot.slane %v2716_v1, 2  ;;  %v2437_v45 = vmul.f32 %v6297_v22, %v5737_v39 }
 0x345   :  { %v2413_v38 = vadd.f32 %v2409_v46, %v2395_v42  ;;  %v2672_v62 = vadd.f32 %v2668_v47, %v2654_v10  ;;  %v2729_v46 = vrot.slane %v6795_v49, 2  ;;  %v2455_v4 = vmul.f32 %v6483_v3, %v7917_v8  ;;  %v7924_v8 = vld [vmem:[#allocation64_spill] sm:$0xff] }
 0x346   :  { %3106 = vrot.lane.b32.xlu1 %v6736_v35, %s3745_s12  ;;  %v2695_v6 = vpop.permute.xlu1 %2694  ;;  %v6858_v7 = vpop.permute.xlu0 %2756  ;;  %v2411_v28 = vadd.f32 %v2407_v16, %v2393_v25  ;;  %v7918_v60 = vrot.slane %v6759_v12, 2  ;;  %v7919_v16 = vrot.slane %v6751_v55, 2  ;;  %v2435_v25 = vmul.f32 %v6297_v22, %v5722_v23  ;;  %v7920_v12 = vld [vmem:[#allocation15_spill] sm:$0xff] }
 0x347   :  { %v2702_v15 = vmul.f32 %v6852_v33, %v2695_v6  ;;  %v2431_v0 = vadd.f32 %v2427_v9, %v2413_v38  ;;  %3118 = vrot.lane.b32.xlu0 %v6692_v53, %s3746_s13  ;;  %v2690_v61 = vadd.f32 %v2686_v27, %v2672_v62  ;;  %v2453_v63 = vmul.f32 %v6483_v3, %v7920_v12 }
 0x348   :  { %v2429_v42 = vadd.f32 %v2425_v29, %v2411_v28  ;;  %v2727_v24 = vsel %vm1673_vm13, %v7919_v16, %v7918_v60  ;;  %v7921_v29 = vld [vmem:[#allocation74_spill] sm:$0xff]  ;;  %v2732_v10 = vsel %vm1673_vm13, %v2729_v46, %v2731_v36  ;;  %v7922_v28 = vld [vmem:[#allocation39_spill] sm:$0xff] }
 0x349   :  { %v2706_v18 = vadd.f32 %v2702_v15, %v2688_v31  ;;  %v2441_v38 = vadd.f32 %v2437_v45, %v2431_v0  ;;  %v2473_v6 = vmul.f32 %v7921_v29, %v6289_v56  ;;  %v2471_v22 = vmul.f32 %v7921_v29, %v7922_v28  ;;  %v7923_v0 = vld [vmem:[#allocation65_spill] sm:$0xff]  ;;  %v7928_v29 = vld [vmem:[#allocation70_spill] sm:$0xff] }
 0x34a   :  { %3120 = vrot.lane.b32.xlu1 %v6702_v59, %s3746_s13  ;;  %v2699_v9 = vpop.permute.xlu1 %2698  ;;  %v6877_v1 = vpop.permute.xlu0 %2760  ;;  %v2439_v27 = vadd.f32 %v2435_v25, %v2429_v42  ;;  %v2491_v62 = vmul.f32 %v6512_v21, %v7923_v0  ;;  %v2489_v42 = vmul.f32 %v6512_v21, %v7924_v8 }
 0x34b   :  { %v6874_v40 = vadd.f32 %v2727_v24, %v2706_v18  ;;  %v2704_v47 = vmul.f32 %v6852_v33, %v2699_v9  ;;  %3122 = vrot.lane.b32.xlu0 %v6719_v19, %s3746_s13  ;;  %v2459_v15 = vadd.f32 %v2455_v4, %v2441_v38  ;;  %v7925_v4 = vld [vmem:[#allocation68_spill] sm:$0xff]  ;;  %v7926_v9 = vld [vmem:[#allocation67_spill] sm:$0xff] }
 0x34c   :  { %v2457_v45 = vadd.f32 %v2453_v63, %v2439_v27  ;;  %v2509_v60 = vmul.f32 %v6533_v54, %v7925_v4 }
 0x34d   :  { %v2708_v31 = vadd.f32 %v2704_v47, %v2690_v61  ;;  %v2477_v36 = vadd.f32 %v2473_v6, %v2459_v15  ;;  %v2507_v61 = vmul.f32 %v6533_v54, %v7926_v9  ;;  %v7927_v47 = vld [vmem:[#allocation71_spill] sm:$0xff]  ;;  %v2525_v6 = vmul.f32 %v6545_v30, %v7928_v29  ;;  %v7929_v15 = vld [vmem:[#allocation78_spill] sm:$0xff] }
 0x34e   :  { %3124 = vrot.lane.b32.xlu1 %v6736_v35, %s3746_s13  ;;  %v6896_v56 = vpop.permute.xlu1 %2758  ;;  %v6900_v18 = vpop.permute.xlu0 %2774  ;;  %v2475_v16 = vadd.f32 %v2471_v22, %v2457_v45  ;;  %v2527_v25 = vmul.f32 %v6545_v30, %v7927_v47  ;;  %v2556_v54 = vmul.f32 %v6302_v50, %v5737_v39  ;;  %v2543_v28 = vmul.f32 %v6566_v17, %v7929_v15 }
 0x34f   :  { %v6898_v3 = vadd.f32 %v2732_v10, %v2708_v31  ;;  %3136 = vrot.lane.b32.xlu0 %v6692_v53, %s3747_s14  ;;  %v2495_v24 = vadd.f32 %v2491_v62, %v2477_v36  ;;  %v2545_v10 = vmul.f32 %v6566_v17, %v6552_v41  ;;  %v2553_v30 = vmul.f32 %v6302_v50, %v5722_v23 }
 0x350   :  { %v2493_v12 = vadd.f32 %v2489_v42, %v2475_v16  ;;  %v2570_v45 = vrot.slane %v2556_v54, 1  ;;  %v2613_v17 = vmul.f32 %v6764_v58, %v6594_v57  ;;  %v7930_v50 = vrot.slane %v6520_v52, 1 }
 0x351   :  { %v2513_v63 = vadd.f32 %v2509_v60, %v2495_v24  ;;  %v2565_v42 = vrot.slane %v2553_v30, 1  ;;  %v3205_v16 = vrot.slane %v5731_v37, 5  ;;  %v2611_v24 = vmul.f32 %v6764_v58, %v6572_v2  ;;  %v7932_v58 = vld [vmem:[#allocation10_spill] sm:$0xff]  ;;  %v7935_v30 = vld [vmem:[#allocation80_spill] sm:$0xff] }
 0x352   :  { %3138 = vrot.lane.b32.xlu1 %v6702_v59, %s3747_s14  ;;  %v6914_v38 = vpop.permute.xlu1 %2762  ;;  %v6916_v21 = vpop.permute.xlu0 %2778  ;;  %v2511_v31 = vadd.f32 %v2507_v61, %v2493_v12  ;;  %v2572_v4 = vsel %vm1514_vm12, %v2570_v45, %v7930_v50  ;;  %v2631_v57 = vmul.f32 %v6784_v32, %v6634_v34  ;;  %v3204_v9 = vrot.slane %v5722_v23, 5 }
 0x353   :  { %3140 = vrot.lane.b32.xlu0 %v6719_v19, %s3747_s14  ;;  %v2531_v27 = vadd.f32 %v2527_v25, %v2513_v63  ;;  %v3207_v61 = vrot.slane %v5840_v43, 5  ;;  %v2629_v2 = vmul.f32 %v6784_v32, %v6618_v11  ;;  %v2649_v34 = vmul.f32 %v6791_v14, %v7932_v58  ;;  %v7934_v32 = vld [vmem:[#allocation95_spill] sm:$0xff] }
 0x354   :  { %v2529_v0 = vadd.f32 %v2525_v6, %v2511_v31  ;;  %v6974_v12 = vsel %vm953_vm11, %v3204_v9, %v3205_v16  ;;  %v3210_v63 = vrot.slane %v5746_v26, 5  ;;  %v2667_v54 = vmul.f32 %v6812_v44, %v7934_v32  ;;  %v7938_v9 = vld [vmem:[#allocation16_spill] sm:$0xff] }
 0x355   :  { %v2549_v62 = vadd.f32 %v2545_v10, %v2531_v27  ;;  %v7933_v10 = vld [vmem:[#allocation54_spill] sm:$0xff]  ;;  %v3209_v31 = vrot.slane %v5737_v39, 5  ;;  %v3212_v27 = vrot.slane %v5862_v51, 5 }
 0x356   :  { %3142 = vrot.lane.b32.xlu1 %v6736_v35, %s3747_s14  ;;  %v6930_v22 = vpop.permute.xlu1 %2776  ;;  %v6934_v41 = vpop.permute.xlu0 %2792  ;;  %v2547_v36 = vadd.f32 %v2543_v28, %v2529_v0  ;;  %v2647_v11 = vmul.f32 %v6791_v14, %v7933_v10  ;;  %v2665_v14 = vmul.f32 %v6812_v44, %v7935_v30  ;;  %v7936_v0 = vld [vmem:[#allocation82_spill] sm:$0xff] }
 0x357   :  { %3154 = vrot.lane.b32.xlu0 %v6692_v53, %s3748_s15  ;;  %v2581_v53 = vadd.f32 %v2572_v4, %v2549_v62  ;;  %v2685_v62 = vmul.f32 %v6826_v20, %v7936_v0  ;;  %v7937_v4 = vld [vmem:[#allocation76_spill] sm:$0xff] }
 0x359   :  { %v2617_v25 = vadd.f32 %v2613_v17, %v2581_v53  ;;  %v2703_v53 = vmul.f32 %v6852_v33, %v6838_v13  ;;  %v2701_v13 = vmul.f32 %v6852_v33, %v7938_v9 }
 0x35a   :  { %3156 = vrot.lane.b32.xlu1 %v6702_v59, %s3748_s15  ;;  %v6942_v8 = vpop.permute.xlu1 %2780  ;;  %v6947_v60 = vpop.permute.xlu0 %2796  ;;  %v7931_v59 = vrot.slane %v6453_v48, 1 }
 0x35b   :  { %3158 = vrot.lane.b32.xlu0 %v6719_v19, %s3748_s15  ;;  %v2635_v6 = vadd.f32 %v2631_v57, %v2617_v25  ;;  %v7020_v57 = vsel %vm953_vm11, %v3210_v63, %v3212_v27 }
 0x35c   :  { %v2567_v52 = vsel %vm1514_vm12, %v2565_v42, %v7931_v59  ;;  %v7005_v42 = vsel %vm953_vm11, %v3209_v31, %v3210_v63  ;;  %v7023_v59 = vstv %s6961_s27  ;;  %v2764_v63 = vstv %s6983_s28  ;;  %s3667_s27 = sld [smem:[#allocation3 + $0x5d]] }
 0x35d   :  { %v2579_v47 = vadd.f32 %v2567_v52, %v2547_v36  ;;  %v2653_v28 = vadd.f32 %v2649_v34, %v2635_v6  ;;  %v2711_v36 = vmul.f32 %v6743_v5, %v5722_v23  ;;  %v7039_v25 = vmul.f32 %v7023_v59, %v5840_v43  ;;  %s3668_s28 = sld [smem:[#allocation3 + $0x5e]] }
 0x35e   :  { %3160 = vrot.lane.b32.xlu1 %v6736_v35, %s3748_s15  ;;  %v6969_v48 = vpop.permute.xlu1 %2794  ;;  %v6971_v19 = vpop.permute.xlu0 %2810  ;;  %v6986_v35 = vsel %vm953_vm11, %v3205_v16, %v3207_v61  ;;  %v2683_v16 = vmul.f32 %v6826_v20, %v7937_v4  ;;  %v7939_v6 = vrot.slane %v6751_v55, 2  ;;  %v2767_v32 = vmul.f32 %v2764_v63, %v6877_v1 }
 0x35f   :  { %v2615_v29 = vadd.f32 %v2611_v24, %v2579_v47  ;;  %3218 = vrot.lane.b32.xlu0 %v6974_v12, %s3743_s9  ;;  %v2671_v50 = vadd.f32 %v2667_v54, %v2653_v28  ;;  %v2714_v24 = vmul.f32 %v6743_v5, %v5737_v39  ;;  %v7031_v5 = vmul.f32 %v7023_v59, %v5731_v37 }
 0x360   :  { %v2723_v58 = vrot.slane %v2711_v36, 2  ;;  %v2782_v55 = vstv %s7000_s29  ;;  %v2880_v30 = vrot.slane %v7039_v25, 3  ;;  %v2765_v1 = vmul.f32 %v2764_v63, %v6858_v7  ;;  %s3669_s29 = sld [smem:[#allocation3 + $0x5f]] }
 0x361   :  { %v2633_v15 = vadd.f32 %v2629_v2, %v2615_v29  ;;  %v2689_v52 = vadd.f32 %v2685_v62, %v2671_v50  ;;  %v2728_v34 = vrot.slane %v2714_v24, 2  ;;  %v7048_v29 = vmul.f32 %v7023_v59, %v5722_v23 }
 0x362   :  { %3220 = vrot.lane.b32.xlu1 %v6986_v35, %s3743_s9  ;;  %v6996_v45 = vpop.permute.xlu1 %2798  ;;  %v7002_v17 = vpop.permute.xlu0 %2814  ;;  %v2725_v10 = vsel %vm1673_vm13, %v2723_v58, %v7939_v6  ;;  %v2878_v31 = vrot.slane %v7031_v5, 3  ;;  %v2785_v0 = vmul.f32 %v2782_v55, %v6916_v21  ;;  %v7069_v49 = vmul.f32 %v7023_v59, %v5737_v39 }
 0x363   :  { %v2651_v44 = vadd.f32 %v2647_v11, %v2633_v15  ;;  %3222 = vrot.lane.b32.xlu0 %v7005_v42, %s3743_s9  ;;  %v2707_v33 = vadd.f32 %v2703_v53, %v2689_v52  ;;  %v2730_v27 = vsel %vm1673_vm13, %v2728_v34, %v2729_v46  ;;  %v2766_v15 = vmul.f32 %v2764_v63, %v6896_v56 }
 0x364   :  { %v2784_v46 = vmul.f32 %v2782_v55, %v6930_v22  ;;  %v2800_v56 = vstv %s7011_s30  ;;  %v2818_v62 = vstv %s7017_s4  ;;  %v7076_v36 = vmul.f32 %v7023_v59, %v5746_v26  ;;  %s3670_s30 = sld [smem:[#allocation3 + $0x60]] }
 0x365   :  { %v2669_v20 = vadd.f32 %v2665_v14, %v2651_v44  ;;  %v2739_v14 = vadd.f32 %v2730_v27, %v2707_v33  ;;  %v2783_v21 = vmul.f32 %v2782_v55, %v6900_v18  ;;  %v2803_v50 = vmul.f32 %v2800_v56, %v6947_v60  ;;  %s3671_s4 = sld [smem:[#allocation3 + $0x61]] }
 0x366   :  { %3224 = vrot.lane.b32.xlu1 %v7020_v57, %s3743_s9  ;;  %v2813_v61 = vpop.permute.xlu1 %2812  ;;  %v7035_v47 = vpop.permute.xlu0 %2828  ;;  %v2768_v22 = vmul.f32 %v2764_v63, %v6914_v38  ;;  %v2802_v53 = vmul.f32 %v2800_v56, %v6969_v48  ;;  %v2836_v24 = vstv %s7033_s0  ;;  %v2821_v18 = vmul.f32 %v2818_v62, %v7002_v17 }
 0x367   :  { %v2687_v2 = vadd.f32 %v2683_v16, %v2669_v20  ;;  %3236 = vrot.lane.b32.xlu0 %v6974_v12, %s3744_s10  ;;  %v2771_v7 = vadd.f32 %v2767_v32, %v2739_v14  ;;  %v2770_v16 = vadd.f32 %v2766_v15, %v6874_v40  ;;  %v2820_v58 = vmul.f32 %v2818_v62, %v2813_v61 }
 0x368   :  { %v2854_v40 = vstv %s7044_s5  ;;  %v2819_v33 = vmul.f32 %v2818_v62, %v6971_v19  ;;  %v2772_v17 = vadd.f32 %v2768_v22, %v6898_v3  ;;  %v2804_v6 = vmul.f32 %v2800_v56, %v6996_v45 }
 0x369   :  { %v2705_v11 = vadd.f32 %v2701_v13, %v2687_v2  ;;  %v2789_v9 = vadd.f32 %v2785_v0, %v2771_v7  ;;  %v2801_v13 = vmul.f32 %v2800_v56, %v6934_v41  ;;  %v2788_v60 = vadd.f32 %v2784_v46, %v2770_v16 }
 0x36a   :  { %3238 = vrot.lane.b32.xlu1 %v6986_v35, %s3744_s10  ;;  %v2817_v54 = vpop.permute.xlu1 %2816  ;;  %v2833_v28 = vpop.permute.xlu0 %2832  ;;  %v2786_v2 = vmul.f32 %v2782_v55, %v6942_v8  ;;  %v2837_v32 = vmul.f32 %v2836_v24, %v7035_v47  ;;  %v2870_v3 = vmul.f32 %v7023_v59, %v5862_v51  ;;  %v2877_v22 = vrot.slane %v7048_v29, 3 }
 0x36b   :  { %3240 = vrot.lane.b32.xlu0 %v7005_v42, %s3744_s10  ;;  %v2737_v44 = vadd.f32 %v2725_v10, %v2705_v11  ;;  %v2807_v48 = vadd.f32 %v2803_v50, %v2789_v9  ;;  %v2839_v34 = vmul.f32 %v2836_v24, %v2833_v28  ;;  %v2806_v63 = vadd.f32 %v2802_v53, %v2788_v60 }
 0x36c   :  { %v2790_v19 = vadd.f32 %v2786_v2, %v2772_v17  ;;  %v2822_v55 = vmul.f32 %v2818_v62, %v2817_v54  ;;  %v2918_v50 = vstv %s7092_s6  ;;  %v2881_v53 = vsel %vm1828_vm14, %v2878_v31, %v2880_v30 }
 0x36d   :  { %v2769_v52 = vadd.f32 %v2765_v1, %v2737_v44  ;;  %v2825_v11 = vadd.f32 %v2821_v18, %v2807_v48  ;;  %v2824_v15 = vadd.f32 %v2820_v58, %v2806_v63  ;;  %v2883_v1 = vrot.slane %v7076_v36, 3 }
 0x36e   :  { %3242 = vrot.lane.b32.xlu1 %v7020_v57, %s3744_s10  ;;  %v2831_v4 = vpop.permute.xlu1 %2830  ;;  %v2847_v20 = vpop.permute.xlu0 %2846  ;;  %v2808_v0 = vadd.f32 %v2804_v6, %v2790_v19  ;;  %v2879_v25 = vsel %vm1828_vm14, %v2877_v22, %v2878_v31  ;;  %v2936_v58 = vstv %s7102_s7  ;;  %v3363_v22 = vrot.slane %v5737_v39, 6 }
 0x36f   :  { %3254 = vrot.lane.b32.xlu0 %v6974_v12, %s3745_s12  ;;  %v2787_v38 = vadd.f32 %v2783_v21, %v2769_v52  ;;  %v2838_v10 = vmul.f32 %v2836_v24, %v2831_v4  ;;  %v2843_v45 = vadd.f32 %v2839_v34, %v2825_v11  ;;  %v2855_v14 = vmul.f32 %v2854_v40, %v2847_v20 }
 0x370   :  { %v2826_v59 = vadd.f32 %v2822_v55, %v2808_v0  ;;  %v2882_v4 = vrot.slane %v7069_v49, 3  ;;  %v3359_v0 = vrot.slane %v5731_v37, 6 }
 0x371   :  { %v2805_v61 = vadd.f32 %v2801_v13, %v2787_v38  ;;  %v2842_v46 = vadd.f32 %v2838_v10, %v2824_v15 }
 0x372   :  { %3256 = vrot.lane.b32.xlu1 %v6986_v35, %s3745_s12  ;;  %v2835_v41 = vpop.permute.xlu1 %2834  ;;  %v2851_v8 = vpop.permute.xlu0 %2850  ;;  %v2884_v9 = vsel %vm1828_vm14, %v2882_v4, %v2883_v1 }
 0x373   :  { %v2857_v27 = vmul.f32 %v2854_v40, %v2851_v8  ;;  %3258 = vrot.lane.b32.xlu0 %v7005_v42, %s3745_s12  ;;  %v2823_v28 = vadd.f32 %v2819_v33, %v2805_v61  ;;  %v2840_v56 = vmul.f32 %v2836_v24, %v2835_v41  ;;  %v2885_v24 = vrot.slane %v2870_v3, 3 }
 0x375   :  { %v2841_v62 = vadd.f32 %v2837_v32, %v2823_v28  ;;  %v2861_v7 = vadd.f32 %v2857_v27, %v2843_v45  ;;  %v2844_v20 = vadd.f32 %v2840_v56, %v2826_v59  ;;  %v2886_v48 = vsel %vm1828_vm14, %v2883_v1, %v2885_v24 }
 0x376   :  { %3260 = vrot.lane.b32.xlu1 %v7020_v57, %s3745_s12  ;;  %v2849_v47 = vpop.permute.xlu1 %2848  ;;  %v2911_v54 = vpop.permute.xlu0 %2910  ;;  %v2954_v32 = vstv %s3647_s8 }
 0x377   :  { %v2856_v44 = vmul.f32 %v2854_v40, %v2849_v47  ;;  %3272 = vrot.lane.b32.xlu0 %v6974_v12, %s3746_s13  ;;  %v2859_v16 = vadd.f32 %v2855_v14, %v2841_v62  ;;  %v2919_v18 = vmul.f32 %v2918_v50, %v2911_v54  ;;  %v2893_v29 = vadd.f32 %v2884_v9, %v2861_v7 }
 0x378   :  { %v3358_v54 = vrot.slane %v5722_v23, 6 }
 0x379   :  { %v2860_v21 = vadd.f32 %v2856_v44, %v2842_v46  ;;  %v2891_v30 = vadd.f32 %v2879_v25, %v2859_v16  ;;  %v2972_v44 = vstv %s3648_s11 }
 0x37a   :  { %3274 = vrot.lane.b32.xlu1 %v6986_v35, %s3746_s13  ;;  %v2853_v36 = vpop.permute.xlu1 %2852  ;;  %v2915_v49 = vpop.permute.xlu0 %2914 }
 0x37b   :  { %v2858_v52 = vmul.f32 %v2854_v40, %v2853_v36  ;;  %v2892_v13 = vadd.f32 %v2881_v53, %v2860_v21  ;;  %v2921_v60 = vmul.f32 %v2918_v50, %v2915_v49  ;;  %3276 = vrot.lane.b32.xlu0 %v7005_v42, %s3746_s13  ;;  %v2923_v17 = vadd.f32 %v2919_v18, %v2891_v30 }
 0x37c   :  { %v7151_v21 = vsel %vm2292_vm0, %v3358_v54, %v3359_v0  ;;  %v2990_v18 = vstv %s3649_s16  ;;  %s3749_s16 = smov [#allocation6]  }
 0x37d   :  { %v2862_v2 = vadd.f32 %v2858_v52, %v2844_v20  ;;  %v2925_v38 = vadd.f32 %v2921_v60, %v2893_v29 }
 0x37e   :  { %3278 = vrot.lane.b32.xlu1 %v7020_v57, %s3746_s13  ;;  %v2913_v40 = vpop.permute.xlu1 %2912  ;;  %v2929_v34 = vpop.permute.xlu0 %2928 }
 0x37f   :  { %v2920_v33 = vmul.f32 %v2918_v50, %v2913_v40  ;;  %v2894_v41 = vadd.f32 %v2886_v48, %v2862_v2  ;;  %v2937_v63 = vmul.f32 %v2936_v58, %v2929_v34  ;;  %3290 = vrot.lane.b32.xlu0 %v6974_v12, %s3747_s14 }
 0x381   :  { %v2924_v5 = vadd.f32 %v2920_v33, %v2892_v13  ;;  %v2941_v31 = vadd.f32 %v2937_v63, %v2923_v17  ;;  %v3008_v17 = vstv %s3650_s17  ;;  %s3563_s17 = sshll.u32 %s3749_s16, 4  ;;  %s3564_s17 = int_to_ptr.vmem [resolvable:$true] %s3563_s17 }
 0x382   :  { %3292 = vrot.lane.b32.xlu1 %v6986_v35, %s3747_s14  ;;  %v2917_v6 = vpop.permute.xlu1 %2916  ;;  %v2933_v8 = vpop.permute.xlu0 %2932  ;;  %p3723_p6 = scmp.lt.s32.totalorder %s3564_s17, %s3564_s17 }
 0x383   :  { %v2922_v10 = vmul.f32 %v2918_v50, %v2917_v6  ;;  %v2939_v61 = vmul.f32 %v2936_v58, %v2933_v8  ;;  %3294 = vrot.lane.b32.xlu0 %v7005_v42, %s3747_s14  ;;  %v3364_v50 = vrot.slane %v5746_v26, 6 }
 0x385   :  { %v2926_v11 = vadd.f32 %v2922_v10, %v2894_v41  ;;  %v2943_v27 = vadd.f32 %v2939_v61, %v2925_v38  ;;  %v7164_v52 = vsel %vm2292_vm0, %v3363_v22, %v3364_v50 }
 0x386   :  { %3296 = vrot.lane.b32.xlu1 %v7020_v57, %s3747_s14  ;;  %v2931_v19 = vpop.permute.xlu1 %2930  ;;  %v2947_v55 = vpop.permute.xlu0 %2946 }
 0x387   :  { %v2938_v15 = vmul.f32 %v2936_v58, %v2931_v19  ;;  %v2955_v3 = vmul.f32 %v2954_v32, %v2947_v55  ;;  %3308 = vrot.lane.b32.xlu0 %v6974_v12, %s3748_s15  ;;  %v3361_v12 = vrot.slane %v5840_v43, 6 }
 0x389   :  { %v2942_v28 = vadd.f32 %v2938_v15, %v2924_v5  ;;  %v2959_v45 = vadd.f32 %v2955_v3, %v2941_v31  ;;  %v7157_v16 = vsel %vm2292_vm0, %v3359_v0, %v3361_v12  ;;  %v3018_v31 = vstv %s3651_s18  ;;  %s3718_s18 = scalar_lea.vmem %s3564_s17, 512 }
 0x38a   :  { %3310 = vrot.lane.b32.xlu1 %v6986_v35, %s3748_s15  ;;  %v2935_v14 = vpop.permute.xlu1 %2934  ;;  %v2951_v1 = vpop.permute.xlu0 %2950  ;;  %v3020_v8 = vmul.f32 %v3018_v31, %v5731_v37  ;;  %v3021_v15 = vmul.f32 %v3018_v31, %v5840_v43  ;;  %v3024_v12 = vmul.f32 %v3018_v31, %v5862_v51  ;;  %p3719_p5 = scmp.ne.s32.totalorder %s3564_s17, %s3718_s18  ;;  %p3724_p7 = scmp.lt.s32.totalorder %s3718_s18, %s3718_s18 }
 0x38b   :  { %v2940_v47 = vmul.f32 %v2936_v58, %v2935_v14  ;;  %v2957_v46 = vmul.f32 %v2954_v32, %v2951_v1  ;;  %3312 = vrot.lane.b32.xlu0 %v7005_v42, %s3748_s15 }
 0x38c   :  { %v3034_v54 = vrot.slane %v3021_v15, 4  ;;  %p3725_p8 = por %p3724_p7, %p3723_p6 }
 0x38d   :  { %v2944_v56 = vadd.f32 %v2940_v47, %v2926_v11  ;;  %v2961_v62 = vadd.f32 %v2957_v46, %v2943_v27  ;;  %v3022_v46 = vmul.f32 %v3018_v31, %v5737_v39 }
 0x38e   :  { %3314 = vrot.lane.b32.xlu1 %v7020_v57, %s3748_s15  ;;  %v2949_v35 = vpop.permute.xlu1 %2948  ;;  %v2965_v59 = vpop.permute.xlu0 %2964  ;;  %v3366_v57 = vrot.slane %v5862_v51, 6  ;;  %p3726_p9 = pnand %p3725_p8, %p3719_p5 }
 0x38f   :  { %v2956_v7 = vmul.f32 %v2954_v32, %v2949_v35  ;;  %v2973_v42 = vmul.f32 %v2972_v44, %v2965_v59  ;;  %3372 = vrot.lane.b32.xlu0 %v7151_v21, %s3743_s9  ;;  %v3036_v22 = vrot.slane %v3022_v46, 4 }
 0x390   :  { %v7169_v13 = vsel %vm2292_vm0, %v3364_v50, %v3366_v57 }
 0x391   :  { %v2960_v4 = vadd.f32 %v2956_v7, %v2942_v28  ;;  %v2977_v36 = vadd.f32 %v2973_v42, %v2959_v45  ;;  %v3032_v28 = vrot.slane %v3020_v8, 4  ;;  %v3023_v45 = vmul.f32 %v3018_v31, %v5746_v26 }
 0x392   :  { %3374 = vrot.lane.b32.xlu1 %v7157_v16, %s3743_s9  ;;  %v2953_v53 = vpop.permute.xlu1 %2952  ;;  %v2969_v20 = vpop.permute.xlu0 %2968 }
 0x393   :  { %v2958_v24 = vmul.f32 %v2954_v32, %v2953_v53  ;;  %v2975_v9 = vmul.f32 %v2972_v44, %v2969_v20  ;;  %3376 = vrot.lane.b32.xlu0 %v7164_v52, %s3743_s9  ;;  %v3019_v32 = vmul.f32 %v3018_v31, %v5722_v23  ;;  %v3037_v59 = vrot.slane %v3023_v45, 4 }
 0x394   :  { %v3035_v53 = vsel %vm1983_vm15, %v3032_v28, %v3034_v54 }
 0x395   :  { %v2962_v49 = vadd.f32 %v2958_v24, %v2944_v56  ;;  %v2979_v29 = vadd.f32 %v2975_v9, %v2961_v62  ;;  %v3031_v1 = vrot.slane %v3019_v32, 4  ;;  %v3039_v24 = vrot.slane %v3024_v12, 4 }
 0x396   :  { %3378 = vrot.lane.b32.xlu1 %v7169_v13, %s3743_s9  ;;  %v2967_v60 = vpop.permute.xlu1 %2966  ;;  %v2983_v2 = vpop.permute.xlu0 %2982  ;;  %s3652_s9 = sld [smem:[#allocation3 + $0x4e]]  ;;  %v3038_v9 = vsel %vm1983_vm15, %v3036_v22, %v3037_v59 }
 0x397   :  { %v2974_v25 = vmul.f32 %v2972_v44, %v2967_v60  ;;  %v2991_v58 = vmul.f32 %v2990_v18, %v2983_v2  ;;  %3390 = vrot.lane.b32.xlu0 %v7151_v21, %s3744_s10  ;;  %v3033_v35 = vsel %vm1983_vm15, %v3031_v1, %v3032_v28 }
 0x399   :  { %v2978_v30 = vadd.f32 %v2974_v25, %v2960_v4  ;;  %v2995_v38 = vadd.f32 %v2991_v58, %v2977_v36 }
 0x39a   :  { %3392 = vrot.lane.b32.xlu1 %v7157_v16, %s3744_s10  ;;  %v2971_v40 = vpop.permute.xlu1 %2970  ;;  %v2987_v33 = vpop.permute.xlu0 %2986 }
 0x39b   :  { %v2976_v48 = vmul.f32 %v2972_v44, %v2971_v40  ;;  %v2993_v34 = vmul.f32 %v2990_v18, %v2987_v33  ;;  %3394 = vrot.lane.b32.xlu0 %v7164_v52, %s3744_s10 }
 0x39c   :  { %v3072_v0 = vstv %s3652_s9 }
 0x39d   :  { %v2980_v41 = vadd.f32 %v2976_v48, %v2962_v49  ;;  %v2997_v63 = vadd.f32 %v2993_v34, %v2979_v29 }
 0x39e   :  { %3396 = vrot.lane.b32.xlu1 %v7169_v13, %s3744_s10  ;;  %v2985_v5 = vpop.permute.xlu1 %2984  ;;  %v3001_v10 = vpop.permute.xlu0 %3000  ;;  %s3653_s10 = sld [smem:[#allocation3 + $0x4f]] }
 0x39f   :  { %v2992_v6 = vmul.f32 %v2990_v18, %v2985_v5  ;;  %v3009_v61 = vmul.f32 %v3008_v17, %v3001_v10  ;;  %3408 = vrot.lane.b32.xlu0 %v7151_v21, %s3745_s12 }
 0x3a1   :  { %v2996_v11 = vadd.f32 %v2992_v6, %v2978_v30  ;;  %v3013_v27 = vadd.f32 %v3009_v61, %v2995_v38  ;;  %v3040_v38 = vsel %vm1983_vm15, %v3037_v59, %v3039_v24 }
 0x3a2   :  { %3410 = vrot.lane.b32.xlu1 %v7157_v16, %s3745_s12  ;;  %v2989_v19 = vpop.permute.xlu1 %2988  ;;  %v3005_v3 = vpop.permute.xlu0 %3004 }
 0x3a3   :  { %v2994_v55 = vmul.f32 %v2990_v18, %v2989_v19  ;;  %v3011_v14 = vmul.f32 %v3008_v17, %v3005_v3  ;;  %3412 = vrot.lane.b32.xlu0 %v7164_v52, %s3745_s12  ;;  %v3045_v50 = vadd.f32 %v3033_v35, %v3013_v27 }
 0x3a4   :  { %v3090_v2 = vstv %s3653_s10 }
 0x3a5   :  { %v2998_v47 = vadd.f32 %v2994_v55, %v2980_v41  ;;  %v3015_v56 = vadd.f32 %v3011_v14, %v2997_v63 }
 0x3a6   :  { %3414 = vrot.lane.b32.xlu1 %v7169_v13, %s3745_s12  ;;  %v3003_v44 = vpop.permute.xlu1 %3002  ;;  %v3065_v7 = vpop.permute.xlu0 %3064  ;;  %s3654_s12 = sld [smem:[#allocation3 + $0x50]] }
 0x3a7   :  { %v3010_v62 = vmul.f32 %v3008_v17, %v3003_v44  ;;  %v3073_v42 = vmul.f32 %v3072_v0, %v3065_v7  ;;  %3426 = vrot.lane.b32.xlu0 %v7151_v21, %s3746_s13  ;;  %v3047_v29 = vadd.f32 %v3038_v9, %v3015_v56 }
 0x3a9   :  { %v3014_v4 = vadd.f32 %v3010_v62, %v2996_v11  ;;  %v3077_v57 = vadd.f32 %v3073_v42, %v3045_v50 }
 0x3aa   :  { %3428 = vrot.lane.b32.xlu1 %v7157_v16, %s3746_s13  ;;  %v3007_v36 = vpop.permute.xlu1 %3006  ;;  %v3069_v49 = vpop.permute.xlu0 %3068 }
 0x3ab   :  { %v3012_v20 = vmul.f32 %v3008_v17, %v3007_v36  ;;  %v3046_v18 = vadd.f32 %v3035_v53, %v3014_v4  ;;  %v3075_v60 = vmul.f32 %v3072_v0, %v3069_v49  ;;  %3430 = vrot.lane.b32.xlu0 %v7164_v52, %s3746_s13 }
 0x3ac   :  { %v3108_v8 = vstv %s3654_s12 }
 0x3ad   :  { %v3016_v25 = vadd.f32 %v3012_v20, %v2998_v47  ;;  %v3079_v58 = vadd.f32 %v3075_v60, %v3047_v29 }
 0x3ae   :  { %3432 = vrot.lane.b32.xlu1 %v7169_v13, %s3746_s13  ;;  %v3067_v30 = vpop.permute.xlu1 %3066  ;;  %v3083_v48 = vpop.permute.xlu0 %3082  ;;  %s3655_s13 = sld [smem:[#allocation3 + $0x51]] }
 0x3af   :  { %v3074_v40 = vmul.f32 %v3072_v0, %v3067_v30  ;;  %v3048_v33 = vadd.f32 %v3040_v38, %v3016_v25  ;;  %v3091_v34 = vmul.f32 %v3090_v2, %v3083_v48  ;;  %3444 = vrot.lane.b32.xlu0 %v7151_v21, %s3747_s14  ;;  %v3172_v25 = vstv %s3658_s19 }
 0x3b0   :  { %v3174_v30 = vmul.f32 %v3172_v25, %v5731_v37  ;;  %v3173_v48 = vmul.f32 %v3172_v25, %v5722_v23 }
 0x3b1   :  { %v3078_v41 = vadd.f32 %v3074_v40, %v3046_v18  ;;  %v3095_v17 = vadd.f32 %v3091_v34, %v3077_v57  ;;  %v3162_v18 = vstv %s3657_s1 }
 0x3b2   :  { %3446 = vrot.lane.b32.xlu1 %v7157_v16, %s3747_s14  ;;  %v3071_v63 = vpop.permute.xlu1 %3070  ;;  %v3087_v31 = vpop.permute.xlu0 %3086 }
 0x3b3   :  { %v3076_v5 = vmul.f32 %v3072_v0, %v3071_v63  ;;  %v3093_v6 = vmul.f32 %v3090_v2, %v3087_v31  ;;  %3448 = vrot.lane.b32.xlu0 %v7164_v52, %s3747_s14  ;;  %v3177_v31 = vmul.f32 %v3172_v25, %v5746_v26 }
 0x3b4   :  { %v3126_v1 = vstv %s3655_s13 }
 0x3b5   :  { %v3080_v10 = vadd.f32 %v3076_v5, %v3048_v33  ;;  %v3097_v61 = vadd.f32 %v3093_v6, %v3079_v58  ;;  %v3186_v5 = vrot.slane %v3174_v30, 5 }
 0x3b6   :  { %3450 = vrot.lane.b32.xlu1 %v7169_v13, %s3747_s14  ;;  %v3085_v11 = vpop.permute.xlu1 %3084  ;;  %v3101_v27 = vpop.permute.xlu0 %3100  ;;  %s3656_s14 = sld [smem:[#allocation3 + $0x52]] }
 0x3b7   :  { %v3092_v32 = vmul.f32 %v3090_v2, %v3085_v11  ;;  %v3109_v19 = vmul.f32 %v3108_v8, %v3101_v27  ;;  %3462 = vrot.lane.b32.xlu0 %v7151_v21, %s3748_s15  ;;  %v3176_v11 = vmul.f32 %v3172_v25, %v5737_v39 }
 0x3b9   :  { %v3096_v15 = vadd.f32 %v3092_v32, %v3078_v41  ;;  %v3113_v55 = vadd.f32 %v3109_v19, %v3095_v17  ;;  %v3175_v41 = vmul.f32 %v3172_v25, %v5840_v43 }
 0x3ba   :  { %3464 = vrot.lane.b32.xlu1 %v7157_v16, %s3748_s15  ;;  %v3089_v3 = vpop.permute.xlu1 %3088  ;;  %v3105_v45 = vpop.permute.xlu0 %3104 }
 0x3bb   :  { %v3094_v28 = vmul.f32 %v3090_v2, %v3089_v3  ;;  %v3111_v14 = vmul.f32 %v3108_v8, %v3105_v45  ;;  %3466 = vrot.lane.b32.xlu0 %v7164_v52, %s3748_s15  ;;  %v3188_v19 = vrot.slane %v3175_v41, 5  ;;  %v3191_v45 = vrot.slane %v3177_v31, 5 }
 0x3bc   :  { %v3144_v50 = vstv %s3656_s14  ;;  %v3262_v41 = vstv %s3661_s21  ;;  %v3280_v31 = vstv %s3662_s23 }
 0x3bd   :  { %v3098_v47 = vadd.f32 %v3094_v28, %v3080_v10  ;;  %v3115_v0 = vadd.f32 %v3111_v14, %v3097_v61 }
 0x3be   :  { %3468 = vrot.lane.b32.xlu1 %v7169_v13, %s3748_s15  ;;  %v3103_v21 = vpop.permute.xlu1 %3102  ;;  %v3119_v56 = vpop.permute.xlu0 %3118  ;;  %s3659_s15 = sld [smem:[#allocation3 + $0x55]] }
 0x3bf   :  { %v3110_v46 = vmul.f32 %v3108_v8, %v3103_v21  ;;  %v3127_v44 = vmul.f32 %v3126_v1, %v3119_v56  ;;  %v3189_v56 = vsel %vm953_vm11, %v3186_v5, %v3188_v19 }
 0x3c1   :  { %v3114_v54 = vadd.f32 %v3110_v46, %v3096_v15  ;;  %v3131_v16 = vadd.f32 %v3127_v44, %v3113_v55  ;;  %v3178_v15 = vmul.f32 %v3172_v25, %v5862_v51 }
 0x3c2   :  { %v3107_v12 = vpop.permute.xlu1 %3106  ;;  %v3123_v35 = vpop.permute.xlu0 %3122 }
 0x3c3   :  { %v3112_v62 = vmul.f32 %v3108_v8, %v3107_v12  ;;  %v3129_v7 = vmul.f32 %v3126_v1, %v3123_v35  ;;  %v3185_v8 = vrot.slane %v3173_v48, 5  ;;  %v3193_v44 = vrot.slane %v3178_v15, 5 }
 0x3c4   :  { %v3226_v61 = vstv %s3659_s15 }
 0x3c5   :  { %v3116_v59 = vadd.f32 %v3112_v62, %v3098_v47  ;;  %v3133_v52 = vadd.f32 %v3129_v7, %v3115_v0  ;;  %v3187_v3 = vsel %vm953_vm11, %v3185_v8, %v3186_v5  ;;  %v3190_v0 = vrot.slane %v3176_v11, 5 }
 0x3c6   :  { %v3121_v42 = vpop.permute.xlu1 %3120  ;;  %v3137_v22 = vpop.permute.xlu0 %3136 }
 0x3c7   :  { %v3128_v4 = vmul.f32 %v3126_v1, %v3121_v42  ;;  %v3145_v57 = vmul.f32 %v3144_v50, %v3137_v22  ;;  %v3194_v42 = vsel %vm953_vm11, %v3191_v45, %v3193_v44 }
 0x3c9   :  { %v3132_v13 = vadd.f32 %v3128_v4, %v3114_v54  ;;  %v3149_v36 = vadd.f32 %v3145_v57, %v3131_v16  ;;  %v3192_v16 = vsel %vm953_vm11, %v3190_v0, %v3191_v45  ;;  %v3316_v0 = vstv %s3664_s25 }
 0x3ca   :  { %v3125_v53 = vpop.permute.xlu1 %3124  ;;  %v3141_v20 = vpop.permute.xlu0 %3140 }
 0x3cb   :  { %v3130_v24 = vmul.f32 %v3126_v1, %v3125_v53  ;;  %v3147_v9 = vmul.f32 %v3144_v50, %v3141_v20 }
 0x3cd   :  { %v3134_v49 = vadd.f32 %v3130_v24, %v3116_v59  ;;  %v3151_v29 = vadd.f32 %v3147_v9, %v3133_v52 }
 0x3ce   :  { %v3139_v60 = vpop.permute.xlu1 %3138  ;;  %v3155_v58 = vpop.permute.xlu0 %3154 }
 0x3cf   :  { %v3146_v2 = vmul.f32 %v3144_v50, %v3139_v60  ;;  %v3163_v38 = vmul.f32 %v3162_v18, %v3155_v58 }
 0x3d1   :  { %v3150_v40 = vadd.f32 %v3146_v2, %v3132_v13  ;;  %v3167_v33 = vadd.f32 %v3163_v38, %v3149_v36 }
 0x3d2   :  { %v3143_v34 = vpop.permute.xlu1 %3142  ;;  %v3159_v63 = vpop.permute.xlu0 %3158 }
 0x3d3   :  { %v3148_v17 = vmul.f32 %v3144_v50, %v3143_v34  ;;  %v3165_v6 = vmul.f32 %v3162_v18, %v3159_v63  ;;  %v3199_v14 = vadd.f32 %v3187_v3, %v3167_v33  ;;  %v3244_v33 = vstv %s3660_s20 }
 0x3d5   :  { %v3152_v10 = vadd.f32 %v3148_v17, %v3134_v49  ;;  %v3169_v32 = vadd.f32 %v3165_v6, %v3151_v29  ;;  %v7255_v6 = vstv %s3665_s22 }
 0x3d6   :  { %v3157_v27 = vpop.permute.xlu1 %3156  ;;  %v3219_v28 = vpop.permute.xlu0 %3218  ;;  %v7259_v11 = vmul.f32 %v7255_v6, %v5731_v37  ;;  %v3329_v19 = vmul.f32 %v7255_v6, %v5840_v43  ;;  %v7269_v37 = vmul.f32 %v7255_v6, %v5746_v26  ;;  %v3332_v43 = vmul.f32 %v7255_v6, %v5862_v51 }
 0x3d7   :  { %v3164_v55 = vmul.f32 %v3162_v18, %v3157_v27  ;;  %v3227_v47 = vmul.f32 %v3226_v61, %v3219_v28  ;;  %v3201_v35 = vadd.f32 %v3192_v16, %v3169_v32  ;;  %v7261_v32 = vstv %s3663_s24 }
 0x3d9   :  { %v3168_v1 = vadd.f32 %v3164_v55, %v3150_v40  ;;  %v7230_v21 = vadd.f32 %v3227_v47, %v3199_v14 }
 0x3da   :  { %v3161_v46 = vpop.permute.xlu1 %3160  ;;  %v3223_v12 = vpop.permute.xlu0 %3222 }
 0x3db   :  { %v3166_v54 = vmul.f32 %v3162_v18, %v3161_v46  ;;  %v3200_v62 = vadd.f32 %v3189_v56, %v3168_v1  ;;  %v3229_v7 = vmul.f32 %v3226_v61, %v3223_v12  ;;  %v3340_v1 = vrot.slane %v7259_v11, 6 }
 0x3dc   :  { %v3342_v56 = vrot.slane %v3329_v19, 6 }
 0x3dd   :  { %v3170_v59 = vadd.f32 %v3166_v54, %v3152_v10  ;;  %v7234_v50 = vadd.f32 %v3229_v7, %v3201_v35 }
 0x3de   :  { %v3221_v52 = vpop.permute.xlu1 %3220  ;;  %v7237_v22 = vpop.permute.xlu0 %3236  ;;  %v3343_v26 = vsel %vm2292_vm0, %v3340_v1, %v3342_v56 }
 0x3df   :  { %v3228_v4 = vmul.f32 %v3226_v61, %v3221_v52  ;;  %v3202_v57 = vadd.f32 %v3194_v42, %v3170_v59  ;;  %v3345_v52 = vrot.slane %v7269_v37, 6  ;;  %v3347_v42 = vrot.slane %v3332_v43, 6 }
 0x3e1   :  { %v3232_v13 = vadd.f32 %v3228_v4, %v3200_v62 }
 0x3e2   :  { %v3225_v36 = vpop.permute.xlu1 %3224  ;;  %v7239_v24 = vpop.permute.xlu0 %3240 }
 0x3e3   :  { %v3230_v53 = vmul.f32 %v3226_v61, %v3225_v36 }
 0x3e5   :  { %v3234_v20 = vadd.f32 %v3230_v53, %v3202_v57 }
 0x3e6   :  { %v3239_v9 = vpop.permute.xlu1 %3238  ;;  %v7241_v49 = vpop.permute.xlu0 %3254 }
 0x3e7   :  { %v3246_v34 = vmul.f32 %v3244_v33, %v3239_v9 }
 0x3e9   :  { %v3250_v10 = vadd.f32 %v3246_v34, %v3232_v13 }
 0x3ea   :  { %v3243_v18 = vpop.permute.xlu1 %3242  ;;  %v7243_v29 = vpop.permute.xlu0 %3258 }
 0x3eb   :  { %v3248_v8 = vmul.f32 %v3244_v33, %v3243_v18 }
 0x3ed   :  { %v3252_v45 = vadd.f32 %v3248_v8, %v3234_v20  ;;  %v3348_v20 = vsel %vm2292_vm0, %v3345_v52, %v3347_v42 }
 0x3ee   :  { %v3257_v60 = vpop.permute.xlu1 %3256  ;;  %v7245_v25 = vpop.permute.xlu0 %3272 }
 0x3ef   :  { %v3264_v63 = vmul.f32 %v3262_v41, %v3257_v60  ;;  %v3281_v8 = vmul.f32 %v3280_v31, %v7245_v25  ;;  %v3327_v25 = vmul.f32 %v7255_v6, %v5722_v23 }
 0x3f1   :  { %v3268_v15 = vadd.f32 %v3264_v63, %v3250_v10  ;;  %v3247_v10 = vmul.f32 %v3244_v33, %v7239_v24 }
 0x3f2   :  { %v3261_v2 = vpop.permute.xlu1 %3260  ;;  %v7247_v58 = vpop.permute.xlu0 %3276 }
 0x3f3   :  { %v3266_v55 = vmul.f32 %v3262_v41, %v3261_v2 }
 0x3f5   :  { %v3270_v44 = vadd.f32 %v3266_v55, %v3252_v45 }
 0x3f6   :  { %v3275_v30 = vpop.permute.xlu1 %3274  ;;  %v7249_v38 = vpop.permute.xlu0 %3290 }
 0x3f7   :  { %v3282_v61 = vmul.f32 %v3280_v31, %v3275_v30  ;;  %v3245_v30 = vmul.f32 %v3244_v33, %v7237_v22  ;;  %v3299_v22 = vmul.f32 %v7261_v32, %v7249_v38  ;;  %v3380_v38 = vstv %s3666_s26 }
 0x3f9   :  { %v3286_v14 = vadd.f32 %v3282_v61, %v3268_v15  ;;  %v3249_v63 = vadd.f32 %v3245_v30, %v7230_v21  ;;  %v3265_v15 = vmul.f32 %v3262_v41, %v7243_v29  ;;  %v3283_v21 = vmul.f32 %v3280_v31, %v7247_v58 }
 0x3fa   :  { %v3279_v40 = vpop.permute.xlu1 %3278  ;;  %v7251_v48 = vpop.permute.xlu0 %3294  ;;  %v3339_v58 = vrot.slane %v3327_v25, 6 }
 0x3fb   :  { %v3284_v47 = vmul.f32 %v3280_v31, %v3279_v40  ;;  %v3301_v29 = vmul.f32 %v7261_v32, %v7251_v48  ;;  %v3398_v31 = vstv %s3667_s27 }
 0x3fd   :  { %v3288_v35 = vadd.f32 %v3284_v47, %v3270_v44  ;;  %v3341_v44 = vsel %vm2292_vm0, %v3339_v58, %v3340_v1 }
 0x3fe   :  { %v3293_v17 = vpop.permute.xlu1 %3292  ;;  %v7253_v5 = vpop.permute.xlu0 %3308 }
 0x3ff   :  { %v3300_v3 = vmul.f32 %v7261_v32, %v3293_v17  ;;  %v3263_v17 = vmul.f32 %v3262_v41, %v7241_v49  ;;  %v3251_v49 = vadd.f32 %v3247_v10, %v7234_v50  ;;  %v3317_v24 = vmul.f32 %v3316_v0, %v7253_v5 }
 0x400   :  { %v3330_v5 = vmul.f32 %v7255_v6, %v5737_v39 }
 0x401   :  { %v3304_v54 = vadd.f32 %v3300_v3, %v3286_v14  ;;  %v3267_v19 = vadd.f32 %v3263_v17, %v3249_v63  ;;  %v3269_v45 = vadd.f32 %v3265_v15, %v3251_v49 }
 0x402   :  { %v3297_v27 = vpop.permute.xlu1 %3296  ;;  %v3313_v28 = vpop.permute.xlu0 %3312 }
 0x403   :  { %v3302_v16 = vmul.f32 %v7261_v32, %v3297_v27  ;;  %v3285_v55 = vadd.f32 %v3281_v8, %v3267_v19  ;;  %v3287_v41 = vadd.f32 %v3283_v21, %v3269_v45  ;;  %v3319_v47 = vmul.f32 %v3316_v0, %v3313_v28 }
 0x404   :  { %v3344_v28 = vrot.slane %v3330_v5, 6 }
 0x405   :  { %v3306_v4 = vadd.f32 %v3302_v16, %v3288_v35  ;;  %v3303_v14 = vadd.f32 %v3299_v22, %v3285_v55  ;;  %v3305_v23 = vadd.f32 %v3301_v29, %v3287_v41 }
 0x406   :  { %v3311_v46 = vpop.permute.xlu1 %3310  ;;  %v3373_v62 = vpop.permute.xlu0 %3372  ;;  %v3346_v6 = vsel %vm2292_vm0, %v3344_v28, %v3345_v52 }
 0x407   :  { %v3318_v12 = vmul.f32 %v3316_v0, %v3311_v46  ;;  %v3321_v50 = vadd.f32 %v3317_v24, %v3303_v14  ;;  %v3381_v43 = vmul.f32 %v3380_v38, %v3373_v62  ;;  %v3323_v48 = vadd.f32 %v3319_v47, %v3305_v23 }
 0x408   :  { %v3452_v62 = vstv %s3670_s30 }
 0x409   :  { %v3322_v7 = vadd.f32 %v3318_v12, %v3304_v54  ;;  %v3416_v54 = vstv %s3668_s28  ;;  %v3353_v32 = vadd.f32 %v3341_v44, %v3321_v50  ;;  %v3355_v11 = vadd.f32 %v3346_v6, %v3323_v48 }
 0x40a   :  { %v3315_v59 = vpop.permute.xlu1 %3314  ;;  %v3377_v13 = vpop.permute.xlu0 %3376 }
 0x40b   :  { %v3320_v57 = vmul.f32 %v3316_v0, %v3315_v59  ;;  %v7278_v51 = vadd.f32 %v3343_v26, %v3322_v7  ;;  %v3434_v0 = vstv %s3669_s29  ;;  %v3385_v7 = vadd.f32 %v3381_v43, %v3353_v32 }
 0x40c   :  { %v3383_v59 = vmul.f32 %v3380_v38, %v3377_v13 }
 0x40d   :  { %v3324_v36 = vadd.f32 %v3320_v57, %v3306_v4 }
 0x40e   :  { %v7280_v53 = vpop.permute.xlu1 %3374  ;;  %v3391_v9 = vpop.permute.xlu0 %3390 }
 0x40f   :  { %v7285_v18 = vadd.f32 %v3348_v20, %v3324_v36  ;;  %v3399_v16 = vmul.f32 %v3398_v31, %v3391_v9  ;;  %v3382_v57 = vmul.f32 %v3380_v38, %v7280_v53  ;;  %v3387_v20 = vadd.f32 %v3383_v59, %v3355_v11 }
 0x411   :  { %v3403_v26 = vadd.f32 %v3399_v16, %v3385_v7  ;;  %v3386_v8 = vadd.f32 %v3382_v57, %v7278_v51 }
 0x412   :  { %v7287_v60 = vpop.permute.xlu1 %3378  ;;  %v3395_v2 = vpop.permute.xlu0 %3394 }
 0x413   :  { %v3401_v1 = vmul.f32 %v3398_v31, %v3395_v2  ;;  %v3384_v2 = vmul.f32 %v3380_v38, %v7287_v60 }
 0x415   :  { %v3405_v63 = vadd.f32 %v3401_v1, %v3387_v20  ;;  %v3388_v51 = vadd.f32 %v3384_v2, %v7285_v18 }
 0x416   :  { %v7290_v40 = vpop.permute.xlu1 %3392  ;;  %v3409_v34 = vpop.permute.xlu0 %3408 }
 0x417   :  { %v3417_v39 = vmul.f32 %v3416_v54, %v3409_v34  ;;  %v3400_v13 = vmul.f32 %v3398_v31, %v7290_v40  ;;  %v3470_v34 = vstv %s3671_s4  ;;  %v3480_v40 = vstv %s7330_s2 }
 0x419   :  { %v3421_v9 = vadd.f32 %v3417_v39, %v3403_v26  ;;  %v3404_v21 = vadd.f32 %v3400_v13, %v3386_v8 }
 0x41a   :  { %v7296_v61 = vpop.permute.xlu1 %3396  ;;  %v3413_v27 = vpop.permute.xlu0 %3412 }
 0x41b   :  { %v3419_v30 = vmul.f32 %v3416_v54, %v3413_v27  ;;  %v3402_v27 = vmul.f32 %v3398_v31, %v7296_v61 }
 0x41d   :  { %v3423_v22 = vadd.f32 %v3419_v30, %v3405_v63  ;;  %v3406_v47 = vadd.f32 %v3402_v27, %v3388_v51 }
 0x41e   :  { %v3411_v33 = vpop.permute.xlu1 %3410  ;;  %v3427_v3 = vpop.permute.xlu0 %3426 }
 0x41f   :  { %v3435_v42 = vmul.f32 %v3434_v0, %v3427_v3  ;;  %v3418_v19 = vmul.f32 %v3416_v54, %v3411_v33 }
 0x421   :  { %v3439_v37 = vadd.f32 %v3435_v42, %v3421_v9  ;;  %v3422_v60 = vadd.f32 %v3418_v19, %v3404_v21 }
 0x422   :  { %v3415_v46 = vpop.permute.xlu1 %3414  ;;  %v3431_v56 = vpop.permute.xlu0 %3430 }
 0x423   :  { %v3437_v10 = vmul.f32 %v3434_v0, %v3431_v56  ;;  %v3420_v33 = vmul.f32 %v3416_v54, %v3415_v46 }
 0x425   :  { %v3441_v25 = vadd.f32 %v3437_v10, %v3423_v22  ;;  %v3424_v56 = vadd.f32 %v3420_v33, %v3406_v47 }
 0x426   :  { %v3429_v12 = vpop.permute.xlu1 %3428  ;;  %v3445_v35 = vpop.permute.xlu0 %3444 }
 0x427   :  { %v3453_v17 = vmul.f32 %v3452_v62, %v3445_v35  ;;  %v3436_v24 = vmul.f32 %v3434_v0, %v3429_v12 }
 0x429   :  { %v3457_v53 = vadd.f32 %v3453_v17, %v3439_v37  ;;  %v3440_v58 = vadd.f32 %v3436_v24, %v3422_v60 }
 0x42a   :  { %v3433_v4 = vpop.permute.xlu1 %3432  ;;  %v3449_v36 = vpop.permute.xlu0 %3448 }
 0x42b   :  { %v3455_v49 = vmul.f32 %v3452_v62, %v3449_v36  ;;  %v3438_v61 = vmul.f32 %v3434_v0, %v3433_v4 }
 0x42d   :  { %v3459_v38 = vadd.f32 %v3455_v49, %v3441_v25  ;;  %v3442_v16 = vadd.f32 %v3438_v61, %v3424_v56 }
 0x42e   :  { %v3447_v52 = vpop.permute.xlu1 %3446  ;;  %v3463_v15 = vpop.permute.xlu0 %3462 }
 0x42f   :  { %v3471_v55 = vmul.f32 %v3470_v34, %v3463_v15  ;;  %v3454_v14 = vmul.f32 %v3452_v62, %v3447_v52 }
 0x431   :  { %v3475_v3 = vadd.f32 %v3471_v55, %v3457_v53  ;;  %v3458_v23 = vadd.f32 %v3454_v14, %v3440_v58 }
 0x432   :  { %v3451_v45 = vpop.permute.xlu1 %3450  ;;  %v3467_v29 = vpop.permute.xlu0 %3466 }
 0x433   :  { %v3481_v41 = vadd.f32 %v3480_v40, %v3475_v3  ;;  %v3473_v50 = vmul.f32 %v3470_v34, %v3467_v29  ;;  %v3456_v43 = vmul.f32 %v3452_v62, %v3451_v45 }
 0x435   :  { %v3477_v5 = vadd.f32 %v3473_v50, %v3459_v38  ;;  %v3672_v48 = vmul.f32 -1.442695, %v3481_v41  ;;  %v3460_v54 = vadd.f32 %v3456_v43, %v3442_v16 }
 0x436   :  { %v3465_v31 = vpop.permute.xlu1 %3464 }
 0x437   :  { %v3472_v44 = vmul.f32 %v3470_v34, %v3465_v31  ;;  %v3483_v32 = vadd.f32 %v3480_v40, %v3477_v5  ;;  %3690 = vpow2.f32 %v3672_v48 }
 0x439   :  { %v3476_v18 = vadd.f32 %v3472_v44, %v3458_v23  ;;  %v3674_v12 = vmul.f32 -1.442695, %v3483_v32 }
 0x43a   :  { %v3469_v46 = vpop.permute.xlu1 %3468 }
 0x43b   :  { %v3482_v28 = vadd.f32 %v3480_v40, %v3476_v18  ;;  %v3474_v35 = vmul.f32 %v3470_v34, %v3469_v46  ;;  %3692 = vpow2.f32 %v3674_v12 }
 0x43d   :  { %v3673_v7 = vmul.f32 -1.442695, %v3482_v28  ;;  %v3478_v59 = vadd.f32 %v3474_v35, %v3460_v54 }
 0x43f   :  { %3694 = vpow2.f32 %v3673_v7  ;;  %v3484_v0 = vadd.f32 %v3480_v40, %v3478_v59 }
 0x441   :  { %v3675_v39 = vmul.f32 -1.442695, %v3484_v0 }
 0x443   :  { %3696 = vpow2.f32 %v3675_v39 }
 0x444   :  { %v3691_v6 = vpop.eup %3690 }
 0x445   :  { %v3497_v26 = vadd.f32 1.0, %v3691_v6 }
 0x448   :  { %v3693_v62 = vpop.eup %3692 }
 0x449   :  { %v3499_v1 = vadd.f32 1.0, %v3693_v62 }
 0x44c   :  { %v3695_v11 = vpop.eup %3694 }
 0x44d   :  { %v3498_v42 = vadd.f32 1.0, %v3695_v11 }
 0x44f   :  { %3698 = vrcp.f32 %v3498_v42 }
 0x450   :  { %v3697_v4 = vpop.eup %3696  ;;  %3700 = vrcp.f32 %v3497_v26 }
 0x451   :  { %3702 = vrcp.f32 %v3499_v1  ;;  %v3500_v57 = vadd.f32 1.0, %v3697_v4 }
 0x453   :  { %3704 = vrcp.f32 %v3500_v57 }
 0x45c   :  { %v3699_v36 = vpop.eup %3698 }
 0x45d   :  { %v3701_v20 = vpop.eup %3700  ;;  %v3527_v30 = vsel %vm3509_vm1, %v3699_v36, -inf  ;;  %v3511_v17 = vsel %vm3509_vm1, %v3699_v36, inf }
 0x45e   :  { %v3703_v9 = vpop.eup %3702  ;;  %v3526_v34 = vsel %vm3509_vm1, %v3701_v20, -inf  ;;  %v3510_v63 = vsel %vm3509_vm1, %v3701_v20, inf }
 0x45f   :  { %v3528_v37 = vsel %vm3509_vm1, %v3703_v9, -inf  ;;  %v3512_v52 = vsel %vm3509_vm1, %v3703_v9, inf  ;;  %v3530_v2 = vmax.f32 %v3526_v34, %v3527_v30  ;;  %v3514_v15 = vmin.f32 %v3510_v63, %v3511_v17 }
 0x460   :  { %v3705_v13 = vpop.eup %3704 }
 0x461   :  { %v3529_v10 = vsel %vm3509_vm1, %v3705_v13, -inf  ;;  %v3513_v8 = vsel %vm3509_vm1, %v3705_v13, inf }
 0x462   :  { %v3531_v19 = vmax.f32 %v3528_v37, %v3529_v10  ;;  %v3515_v22 = vmin.f32 %v3512_v52, %v3513_v8 }
 0x464   :  { %v3532_v53 = vmax.f32 %v3530_v2, %v3531_v19  ;;  %v3516_v49 = vmin.f32 %v3514_v15, %v3515_v22 }
 0x466   :  { %3533 = vmax.xlane.f32.xlu1 %v3532_v53  ;;  %3517 = vmin.xlane.f32.xlu0 %v3516_v49 }
 0x4ef   :  { %v3534_v55 = vpop.xlane.xlu1 %3533  ;;  %v3518_v21 = vpop.xlane.xlu0 %3517 }
 0x4f0   :  { %v3535_v27 = vrot.slane %v3534_v55, 4  ;;  %v3519_v24 = vrot.slane %v3518_v21, 4 }
 0x4f2   :  { %v3536_v40 = vmax.f32 %v3534_v55, %v3535_v27  ;;  %v3520_v25 = vmin.f32 %v3518_v21, %v3519_v24 }
 0x4f4   :  { %v3537_v3 = vrot.slane %v3536_v40, 2  ;;  %v3521_v45 = vrot.slane %v3520_v25, 2 }
 0x4f6   :  { %v3538_v51 = vmax.f32 %v3536_v40, %v3537_v3  ;;  %v3522_v60 = vmin.f32 %v3520_v25, %v3521_v45 }
 0x4f8   :  { %v3523_v33 = vrot.slane %v3522_v60, 1  ;;  %v3539_v14 = vrot.slane %v3538_v51, 1 }
 0x4fa   :  { %v3524_v29 = vmin.f32 %v3522_v60, %v3523_v33  ;;  %v3540_v38 = vmax.f32 %v3538_v51, %v3539_v14 }
 0x4fc   :  { %3676 = vpush %v3524_v29 }
 0x4fd   :  { %3678 = vpush %v3540_v38 }
 0x52d   :  { %s3677_s2 = spop %3676 }
 0x52e   :  { %s3679_s6 = spop %3678 }
 0x52f   :  { %s3542_s7 = ssub.f32 %s3679_s6, %s3677_s2 }
 0x531   :  { %s3543_s8 = smul.f32 0.75, %s3542_s7 }
 0x533   :  { %s3544_s11 = sadd.f32 %s3677_s2, %s3543_s8 }
 0x535   :  { %v3545_v41 = vstv %s3544_s11 }
 0x536   :  { %vm3546_vm2 = vcmp.lt.f32.partialorder %v3701_v20, %v3545_v41  ;;  %vm3547_vm3 = vcmp.lt.f32.partialorder %v3699_v36, %v3545_v41  ;;  %vm3548_vm4 = vcmp.lt.f32.partialorder %v3703_v9, %v3545_v41  ;;  %vm3549_vm5 = vcmp.lt.f32.partialorder %v3705_v13, %v3545_v41 }
 0x537   :  { %v3550_v50 = vsel %vm3546_vm2, 0.0, %v3701_v20  ;;  %v3551_v47 = vsel %vm3547_vm3, 0.0, %v3699_v36  ;;  %v3552_v58 = vsel %vm3548_vm4, 0.0, %v3703_v9  ;;  %v3553_v61 = vsel %vm3549_vm5, 0.0, %v3705_v13 }
 0x538   :  { %3554 = vst [vmem:[#allocation6] sm:$0xff] %v3550_v50  ;;  %3555 = vst [vmem:[#allocation6 + $0x8] sm:$0xff] %v3551_v47 }
 0x539   :  { %3556 = vst [vmem:[#allocation6 + $0x10] sm:$0xff] %v3552_v58  ;;  %3557 = vst [vmem:[#allocation6 + $0x18] sm:$0xff] %v3553_v61 }
 0x53a   :  { %3729 = shalt.err (!%p3726_p9)
}
 0x53b   :  { %s3750_s9 = smov 128   ;;  %s3751_s10 = smov 8  }
 0x53c   :  { %3569 = dma.vmem_to_hbm [thread:$0]  %s3564_s17, 512, %s7331_s3, [#allocation4], %s3750_s9, %s3750_s9, %s3751_s10  }
 0x53d   :  { %3740 = dma.done.wait [#allocation4], 512  }
 0x53e   :  { %3741 = vsyncadd [#allocation4], 4294966784 }
 0x53f   :  { %3573 = vsyncpa [#allocation4], 1 }
 0x540   :  { %3574 = vsyncpa [#allocation5], 1 }

</bundles_post_ra>
